<compile_context>
chip_gen: v7x
topology: tpu7x:2x2x1
jax: 0.10.0
libtpu: 0.0.40
codegen_flags: <defaults>
</compile_context>

<pallas_src>
import functools

import numpy as np
import jax
import jax.numpy as jnp
from jax import lax
from jax.experimental import pallas as pl
from jax.experimental.pallas import tpu as pltpu

# ----------------------------- configuration --------------------------------
NUM_SENSORS = 8      # input feature size
HIDDEN = 32          # hidden_units
N_QUBITS = 4         # QLSTM default (QShallowRegressionLSTM's n_qubits=0 is nonsensical)
N_QLAYERS = 1
N_VROT = 3
DIM = 2 ** N_QUBITS  # 16 statevector amplitudes
BATCH = 2
SEQ = 8
INV_SQRT2 = 0.7071067811865476


# --------------------- quantum-circuit constant setup (glue) ----------------
def _rx(t):
    c, s = np.cos(t / 2.0), np.sin(t / 2.0)
    return np.array([[c, -1j * s], [-1j * s, c]], dtype=np.complex128)


def _ry(t):
    c, s = np.cos(t / 2.0), np.sin(t / 2.0)
    return np.array([[c, -s], [s, c]], dtype=np.complex128)


def _rz(t):
    return np.array([[np.exp(-1j * t / 2.0), 0.0], [0.0, np.exp(1j * t / 2.0)]],
                    dtype=np.complex128)


def _embed_1q(mat2, wire, n=N_QUBITS):
    ops = [np.eye(2, dtype=np.complex128)] * n
    ops[wire] = mat2
    u = ops[0]
    for m in ops[1:]:
        u = np.kron(u, m)        # wire 0 is the most-significant bit (PennyLane order)
    return u


def _cnot(control, target, n=N_QUBITS):
    dim = 2 ** n
    u = np.zeros((dim, dim), dtype=np.complex128)
    for j in range(dim):
        bits = [(j >> (n - 1 - k)) & 1 for k in range(n)]
        if bits[control] == 1:
            bits2 = list(bits)
            bits2[target] ^= 1
            j2 = sum(b << (n - 1 - k) for k, b in enumerate(bits2))
        else:
            j2 = j
        u[j2, j] = 1.0
    return u


def build_ansatz_unitary(weights):
    """weights: (n_qlayers, 3, n_qubits) -> 16x16 unitary of the trainable ansatz."""
    u = np.eye(DIM, dtype=np.complex128)
    for l in range(weights.shape[0]):
        # CNOT ring, offsets 1 and 2 (circuit order)
        for i in (1, 2):
            for j in range(N_QUBITS):
                t = j + i if j + i < N_QUBITS else j + i - N_QUBITS
                u = _cnot(j, t) @ u
        # per-qubit RX -> RY -> RZ
        for q in range(N_QUBITS):
            rot = _rz(weights[l, 2, q]) @ _ry(weights[l, 1, q]) @ _rx(weights[l, 0, q])
            u = _embed_1q(rot, q) @ u
    return u


# ----------------------- constant packing (wrapper-side) ---------------------
def pack_constants(params, *, H, F, NQ, D):
    """Pack every constant operand into one lane-dense f32 slab (single DMA)."""
    LANES = max(8 * D, 4 * H, H + 1, NQ)
    GATE_SCALE = (0.5, 0.5, 1.0, 0.5)        # forget, input, update(tanh), output

    W_in = np.asarray(params["W_in"], np.float64)        # (NQ, H+F)
    b_in = np.asarray(params["b_in"], np.float64)        # (NQ,)
    W_out = np.asarray(params["W_out"], np.float64)      # (H, NQ)
    b_out = np.asarray(params["b_out"], np.float64)      # (H,)
    W_lin = np.asarray(params["W_lin"], np.float64).reshape(-1)   # (H,)
    b_lin = float(np.asarray(params["b_lin"]).reshape(-1)[0])

    # fused real/imag unitary of the 4 gate ansaetze, split into psi_r / psi_i row blocks
    UrT, UiT = [], []
    for g in range(4):
        u = build_ansatz_unitary(np.asarray(params["q_weights"][g], np.float64))
        UrT.append(np.real(u.T))                         # row-vector convention
        UiT.append(np.imag(u.T))
    UrT_all = np.concatenate(UrT, axis=1)                # (D, 4D)
    UiT_all = np.concatenate(UiT, axis=1)
    uni_top = np.concatenate([UrT_all, UiT_all], axis=1)    # (D, 8D)  multiplies psi_r
    uni_bot = np.concatenate([-UiT_all, UrT_all], axis=1)   # (D, 8D)  multiplies psi_i

    # PauliZ signs folded into clayer_out: Wz = sgn @ W_out^T
    bits = np.array([[(j >> (NQ - 1 - q)) & 1 for q in range(NQ)] for j in range(D)],
                    np.float64)                          # (D, NQ)
    sgn = 1.0 - 2.0 * bits
    Wz = sgn @ W_out.T                                   # (D, H)

    # (Re^2 + Im^2) @ Wz  ==  chi2 @ wz_stacked  with Wz stacked over both halves;
    # sigmoid gates (f, i, o) folded to z/2 for the tanh-only nonlinearity.
    wz_stacked = np.zeros((8 * D, 4 * H), np.float64)
    bz = np.zeros((4 * H,), np.float64)
    for g in range(4):
        blk = GATE_SCALE[g] * Wz
        wz_stacked[g * D:(g + 1) * D, g * H:(g + 1) * H] = blk
        wz_stacked[4 * D + g * D:4 * D + (g + 1) * D, g * H:(g + 1) * H] = blk
        bz[g * H:(g + 1) * H] = GATE_SCALE[g] * b_out

    rows = 10 * D + 3 + H + F
    rows_pad = -(-rows // 8) * 8
    slab = np.zeros((rows_pad, LANES), np.float32)
    r = 0
    slab[r:r + D, :8 * D] = uni_top;            r += D
    slab[r:r + D, :8 * D] = uni_bot;            r += D
    slab[r:r + 8 * D, :4 * H] = wz_stacked;     r += 8 * D
    slab[r, :4 * H] = bz;                       r += 1
    slab[r, :H] = W_lin
    slab[r, H] = b_lin;                         r += 1
    slab[r:r + H, :NQ] = W_in.T[:H, :];         r += H      # wh (acts on h)
    slab[r:r + F, :NQ] = W_in.T[H:H + F, :];    r += F      # wx (acts on x)
    slab[r, :NQ] = b_in;                        r += 1
    assert r == rows
    return slab


# ------------------------------- Pallas kernel -------------------------------
def qlstm_kernel(x_ref, slab_ref, out_ref, *, seq_len, batch, hidden, n_qubits, dim, feat):
    T, B, H, NQ, D, F = seq_len, batch, hidden, n_qubits, dim, feat

    r_wz = 2 * D
    r_bz = 10 * D
    r_head = r_bz + 1
    r_wh = r_head + 1
    r_wx = r_wh + H
    r_bin = r_wx + F

    # ---- hoisted constant loads (once per call, off the recurrent critical path) ----
    uni_top = slab_ref[0:D, 0:8 * D]              # (D, 8D)   psi_r block of fused unitary
    uni_bot = slab_ref[D:2 * D, 0:8 * D]          # (D, 8D)   psi_i block
    wz = slab_ref[r_wz:r_wz + 8 * D, 0:4 * H]     # (8D, 4H)  stacked sgn@W_out^T (sigmoid gates *0.5)
    bz = slab_ref[r_bz:r_bz + 1, 0:4 * H]         # (1, 4H)
    wlin = slab_ref[r_head:r_head + 1, 0:H]       # (1, H)    regression head weights
    blin = slab_ref[r_head:r_head + 1, H:H + 1]   # (1, 1)    regression head bias
    wh = slab_ref[r_wh:r_wh + H, 0:NQ]            # (H, NQ)   clayer_in columns acting on h
    wx = slab_ref[r_wx:r_wx + F, 0:NQ]            # (F, NQ)   clayer_in columns acting on x
    b_in = slab_ref[r_bin:r_bin + 1, 0:NQ]        # (1, NQ)

    # gate-lane scale / offset for the tanh-only nonlinearity:
    #   sigmoid(z) = 0.5 + 0.5*tanh(z/2)   (z/2 already folded into wz / bz)
    lane4h = lax.broadcasted_iota(jnp.int32, (1, 4 * H), 1)
    is_g = (lane4h >= 2 * H) & (lane4h < 3 * H)
    g_scale = jnp.where(is_g, 1.0, 0.5).astype(jnp.float32)
    g_offset = jnp.where(is_g, 0.0, 0.5).astype(jnp.float32)

    # per-qubit bit masks over the D basis states (qubit 0 = MSB, PennyLane order)
    idx_d = lax.broadcasted_iota(jnp.int32, (1, D), 1)
    bit_masks = [((idx_d >> (NQ - 1 - q)) & 1) == 1 for q in range(NQ)]

    # ---- x-projection of clayer_in for all T steps in ONE dot (no scratch) ----
    xp_all = jnp.dot(x_ref[...], wx, preferred_element_type=jnp.float32) + b_in   # (T*B, NQ)

    h = jnp.zeros((B, H), jnp.float32)
    c = jnp.zeros((B, H), jnp.float32)

    for t in range(T):                        # fully unrolled; static slices everywhere
        # clayer_in on [h | x_t]   (only h @ wh sits on the recurrent critical path)
        y = xp_all[t * B:(t + 1) * B, :] + jnp.dot(h, wh,
                                                   preferred_element_type=jnp.float32)

        # per-qubit state after H -> RY(arctan y) -> RZ(arctan y^2), via half-angle
        # identities; rsqrt-only (no sqrt / reciprocal).  cos terms bounded away from 0.
        y2 = y * y
        cos_t = lax.rsqrt(1.0 + y2)                  # cos(arctan(y))
        sin_t = y * cos_t
        u = (1.0 + cos_t) * 0.5
        ru = lax.rsqrt(u)
        c2 = u * ru                                  # cos(theta/2)
        s2 = sin_t * 0.5 * ru                        # sin(theta/2)
        ca = (c2 - s2) * INV_SQRT2                   # cos(theta/2 + pi/4)
        sa = (c2 + s2) * INV_SQRT2                   # sin(theta/2 + pi/4)

        cos_p = lax.rsqrt(1.0 + y2 * y2)             # cos(arctan(y^2))
        sin_p = y2 * cos_p
        v = (1.0 + cos_p) * 0.5
        rv = lax.rsqrt(v)
        cp = v * rv                                  # cos(phi/2)
        sp = sin_p * 0.5 * rv                        # sin(phi/2)

        a_r = cp * ca                                # amplitude of |0>
        a_i = -(sp * ca)
        b_r = cp * sa                                # amplitude of |1>
        b_i = sp * sa

        # per-qubit factors over all D basis states (constant-mask selects, independent)
        fr = [jnp.where(bit_masks[q], b_r[:, q:q + 1], a_r[:, q:q + 1]) for q in range(NQ)]
        fi = [jnp.where(bit_masks[q], b_i[:, q:q + 1], a_i[:, q:q + 1]) for q in range(NQ)]

        # pairwise TREE combine of the product state (depth log2(NQ) instead of NQ)
        facs = list(zip(fr, fi))
        while len(facs) > 1:
            nxt = []
            for i in range(0, len(facs) - 1, 2):
                (xr, xi), (yr, yi) = facs[i], facs[i + 1]
                nxt.append((xr * yr - xi * yi, xr * yi + xi * yr))
            if len(facs) % 2:
                nxt.append(facs[-1])
            facs = nxt
        psi_r, psi_i = facs[0]                        # (B, D) each

        # all four gate circuits: chi = [psi_r | psi_i] @ uni, done as two dots (no concat)
        chi = (jnp.dot(psi_r, uni_top, preferred_element_type=jnp.float32)
               + jnp.dot(psi_i, uni_bot, preferred_element_type=jnp.float32))   # (B, 8D)

        # |amp|^2 fold + <Z> readout + clayer_out for all four gates in ONE K=8D dot
        z_all = jnp.dot(chi * chi, wz, preferred_element_type=jnp.float32) + bz  # (B, 4H)

        # single tanh; sigmoid gates recovered via the pre-folded 0.5 scaling
        gates = jnp.tanh(z_all) * g_scale + g_offset
        f_t = gates[:, 0:H]
        i_t = gates[:, H:2 * H]
        g_t = gates[:, 2 * H:3 * H]
        o_t = gates[:, 3 * H:4 * H]

        c = f_t * c + i_t * g_t
        h = o_t * jnp.tanh(c)

    # final regression head: Linear(H -> 1)
    out_ref[...] = jnp.sum(h * wlin, axis=1, keepdims=True) + blin


# ------------------------------- wrapper -------------------------------------
def qshallow_regression_lstm(x, params):
    """x: (batch, seq, features) float32. Returns (batch,) like `linear(hn).flatten()`."""
    B, T, F = x.shape
    H = params["W_out"].shape[0]
    NQ = params["W_in"].shape[0]
    D = 2 ** NQ

    # (T*B, F): row t*B + b holds x[b, t, :]  -> one prologue dot inside the kernel
    x_flat = jnp.transpose(x, (1, 0, 2)).reshape(T * B, F).astype(jnp.float32)
    slab = pack_constants(params, H=H, F=F, NQ=NQ, D=D)

    kernel = functools.partial(qlstm_kernel, seq_len=T, batch=B, hidden=H,
                               n_qubits=NQ, dim=D, feat=F)
    vmem = pl.BlockSpec(memory_space=pltpu.MemorySpace.VMEM)
    out = pl.pallas_call(
        kernel,
        out_shape=jax.ShapeDtypeStruct((B, 1), jnp.float32),
        in_specs=[vmem, vmem],               # 2 input DMAs total: x + packed constant slab
        out_specs=vmem,
    )(x_flat, jnp.asarray(slab))
    return out.reshape(B)


# --------------------------- pure-JAX reference -------------------------------
def reference_forward(x, params):
    B, T, F = x.shape
    H = params["W_out"].shape[0]
    W_in, b_in = params["W_in"], params["b_in"]
    W_out, b_out = params["W_out"], params["b_out"]
    W_lin, b_lin = params["W_lin"], params["b_lin"]

    us, sgn = [], np.zeros((DIM, N_QUBITS), np.float32)
    for j in range(DIM):
        for q in range(N_QUBITS):
            sgn[j, q] = 1.0 - 2.0 * ((j >> (N_QUBITS - 1 - q)) & 1)
    for g in range(4):
        us.append(jnp.asarray(build_ansatz_unitary(np.asarray(params["q_weights"][g])),
                              jnp.complex64))
    sgn = jnp.asarray(sgn)

    sigmoid = lambda z: 1.0 / (1.0 + jnp.exp(-z))
    h = jnp.zeros((B, H), jnp.float32)
    c = jnp.zeros((B, H), jnp.float32)
    for t in range(T):
        x_t = x[:, t, :]
        v = jnp.concatenate([h, x_t], axis=1)
        y = v @ W_in.T + b_in
        theta = jnp.arctan(y)
        phi = jnp.arctan(y * y)
        ca = jnp.cos(theta / 2 + jnp.pi / 4)
        sa = jnp.sin(theta / 2 + jnp.pi / 4)
        a = jnp.exp(-1j * phi / 2).astype(jnp.complex64) * ca
        b_amp = jnp.exp(1j * phi / 2).astype(jnp.complex64) * sa
        psi = jnp.ones((B, 1), jnp.complex64)
        for q in range(N_QUBITS):
            qb = jnp.stack([a[:, q], b_amp[:, q]], axis=1)             # (B, 2)
            psi = (psi[:, :, None] * qb[:, None, :]).reshape(B, -1)
        zs = []
        for g in range(4):
            chi = psi @ us[g].T
            prob = jnp.abs(chi) ** 2
            expz = prob @ sgn
            zs.append(expz @ W_out.T + b_out)
        f_t, i_t = sigmoid(zs[0]), sigmoid(zs[1])
        g_t, o_t = jnp.tanh(zs[2]), sigmoid(zs[3])
        c = f_t * c + i_t * g_t
        h = o_t * jnp.tanh(c)
    return (h @ W_lin.T + b_lin).reshape(-1)


# ---------------------------------- main --------------------------------------
if __name__ == "__main__":
    key = jax.random.PRNGKey(0)
    ks = jax.random.split(key, 8)

    concat = HIDDEN + NUM_SENSORS
    k_in = 1.0 / np.sqrt(concat)
    k_out = 1.0 / np.sqrt(N_QUBITS)
    k_lin = 1.0 / np.sqrt(HIDDEN)

    params = {
        "W_in": jax.random.uniform(ks[0], (N_QUBITS, concat), jnp.float32, -k_in, k_in),
        "b_in": jax.random.uniform(ks[1], (N_QUBITS,), jnp.float32, -k_in, k_in),
        # TorchLayer default init: uniform in [0, 2*pi); one weight tensor per gate VQC
        "q_weights": jax.random.uniform(ks[2], (4, N_QLAYERS, N_VROT, N_QUBITS),
                                        jnp.float32, 0.0, 2.0 * np.pi),
        "W_out": jax.random.uniform(ks[3], (HIDDEN, N_QUBITS), jnp.float32, -k_out, k_out),
        "b_out": jax.random.uniform(ks[4], (HIDDEN,), jnp.float32, -k_out, k_out),
        "W_lin": jax.random.uniform(ks[5], (1, HIDDEN), jnp.float32, -k_lin, k_lin),
        "b_lin": jax.random.uniform(ks[6], (1,), jnp.float32, -k_lin, k_lin),
    }

    x = jax.random.normal(ks[7], (BATCH, SEQ, NUM_SENSORS), jnp.float32)

    out = qshallow_regression_lstm(x, params)
    out = jax.block_until_ready(out)

    ref = jax.block_until_ready(reference_forward(x, params))
    np.testing.assert_allclose(np.asarray(out), np.asarray(ref), rtol=5e-3, atol=5e-3)
    assert out.shape == (BATCH,) and np.all(np.isfinite(np.asarray(out)))

    print("KERNEL_OK")
</pallas_src>

<mosaic_0001>
module attributes {stable_mosaic.version = 11 : i64} {
  func.func @qlstm_kernel(%arg0: memref<16x8xf32, #tpu.memory_space<vmem>>, %arg1: memref<208x128xf32, #tpu.memory_space<vmem>>, %arg2: memref<2x1xf32, #tpu.memory_space<vmem>>) attributes {dimension_semantics = [], scalar_prefetch = 0 : i64, scratch_operands = 0 : i64, tpu.core_type = #tpu.core_type<tc>} {
    %c0 = arith.constant 0 : index
    %c0_0 = arith.constant 0 : index
    %0 = vector.load %arg1[%c0, %c0_0] : memref<208x128xf32, #tpu.memory_space<vmem>>, vector<16x128xf32>
    %c16 = arith.constant 16 : index
    %c0_1 = arith.constant 0 : index
    %1 = vector.load %arg1[%c16, %c0_1] : memref<208x128xf32, #tpu.memory_space<vmem>>, vector<16x128xf32>
    %c32 = arith.constant 32 : index
    %c0_2 = arith.constant 0 : index
    %2 = vector.load %arg1[%c32, %c0_2] : memref<208x128xf32, #tpu.memory_space<vmem>>, vector<128x128xf32>
    %c160 = arith.constant 160 : index
    %c0_3 = arith.constant 0 : index
    %3 = vector.load %arg1[%c160, %c0_3] : memref<208x128xf32, #tpu.memory_space<vmem>>, vector<1x128xf32>
    %c161 = arith.constant 161 : index
    %c0_4 = arith.constant 0 : index
    %4 = vector.load %arg1[%c161, %c0_4] : memref<208x128xf32, #tpu.memory_space<vmem>>, vector<1x32xf32>
    %c161_5 = arith.constant 161 : index
    %c32_6 = arith.constant 32 : index
    %5 = vector.load %arg1[%c161_5, %c32_6] : memref<208x128xf32, #tpu.memory_space<vmem>>, vector<1x1xf32>
    %c162 = arith.constant 162 : index
    %c0_7 = arith.constant 0 : index
    %6 = vector.load %arg1[%c162, %c0_7] : memref<208x128xf32, #tpu.memory_space<vmem>>, vector<32x4xf32>
    %c194 = arith.constant 194 : index
    %c0_8 = arith.constant 0 : index
    %7 = vector.load %arg1[%c194, %c0_8] : memref<208x128xf32, #tpu.memory_space<vmem>>, vector<8x4xf32>
    %c202 = arith.constant 202 : index
    %c0_9 = arith.constant 0 : index
    %8 = vector.load %arg1[%c202, %c0_9] : memref<208x128xf32, #tpu.memory_space<vmem>>, vector<1x4xf32>
    %9 = tpu.iota {dimensions = array<i32: 1>} : vector<1x128xi32>
    %c64_i32 = arith.constant 64 : i32
    %10 = vector.broadcast %c64_i32 : i32 to vector<1x128xi32>
    %11 = arith.cmpi sge, %9, %10 : vector<1x128xi32>
    %c96_i32 = arith.constant 96 : i32
    %12 = vector.broadcast %c96_i32 : i32 to vector<1x128xi32>
    %13 = arith.cmpi slt, %9, %12 : vector<1x128xi32>
    %14 = arith.andi %11, %13 : vector<1x128xi1>
    %cst = arith.constant 1.000000e+00 : f32
    %cst_10 = arith.constant 5.000000e-01 : f32
    %15 = vector.broadcast %cst : f32 to vector<1x128xf32>
    %16 = vector.broadcast %cst_10 : f32 to vector<1x128xf32>
    %17 = arith.select %14, %15, %16 : vector<1x128xi1>, vector<1x128xf32>
    %cst_11 = arith.constant 0.000000e+00 : f32
    %cst_12 = arith.constant 5.000000e-01 : f32
    %18 = vector.broadcast %cst_11 : f32 to vector<1x128xf32>
    %19 = vector.broadcast %cst_12 : f32 to vector<1x128xf32>
    %20 = arith.select %14, %18, %19 : vector<1x128xi1>, vector<1x128xf32>
    %21 = tpu.iota {dimensions = array<i32: 1>} : vector<1x16xi32>
    %c3_i32 = arith.constant 3 : i32
    %22 = vector.broadcast %c3_i32 : i32 to vector<1x16xi32>
    %23 = arith.shrsi %21, %22 : vector<1x16xi32>
    %c1_i32 = arith.constant 1 : i32
    %24 = vector.broadcast %c1_i32 : i32 to vector<1x16xi32>
    %25 = arith.andi %23, %24 : vector<1x16xi32>
    %c1_i32_13 = arith.constant 1 : i32
    %26 = vector.broadcast %c1_i32_13 : i32 to vector<1x16xi32>
    %27 = arith.cmpi eq, %25, %26 : vector<1x16xi32>
    %c2_i32 = arith.constant 2 : i32
    %28 = vector.broadcast %c2_i32 : i32 to vector<1x16xi32>
    %29 = arith.shrsi %21, %28 : vector<1x16xi32>
    %c1_i32_14 = arith.constant 1 : i32
    %30 = vector.broadcast %c1_i32_14 : i32 to vector<1x16xi32>
    %31 = arith.andi %29, %30 : vector<1x16xi32>
    %c1_i32_15 = arith.constant 1 : i32
    %32 = vector.broadcast %c1_i32_15 : i32 to vector<1x16xi32>
    %33 = arith.cmpi eq, %31, %32 : vector<1x16xi32>
    %c1_i32_16 = arith.constant 1 : i32
    %34 = vector.broadcast %c1_i32_16 : i32 to vector<1x16xi32>
    %35 = arith.shrsi %21, %34 : vector<1x16xi32>
    %c1_i32_17 = arith.constant 1 : i32
    %36 = vector.broadcast %c1_i32_17 : i32 to vector<1x16xi32>
    %37 = arith.andi %35, %36 : vector<1x16xi32>
    %c1_i32_18 = arith.constant 1 : i32
    %38 = vector.broadcast %c1_i32_18 : i32 to vector<1x16xi32>
    %39 = arith.cmpi eq, %37, %38 : vector<1x16xi32>
    %c0_i32 = arith.constant 0 : i32
    %40 = vector.broadcast %c0_i32 : i32 to vector<1x16xi32>
    %41 = arith.shrsi %21, %40 : vector<1x16xi32>
    %c1_i32_19 = arith.constant 1 : i32
    %42 = vector.broadcast %c1_i32_19 : i32 to vector<1x16xi32>
    %43 = arith.andi %41, %42 : vector<1x16xi32>
    %c1_i32_20 = arith.constant 1 : i32
    %44 = vector.broadcast %c1_i32_20 : i32 to vector<1x16xi32>
    %45 = arith.cmpi eq, %43, %44 : vector<1x16xi32>
    %c0_21 = arith.constant 0 : index
    %c0_22 = arith.constant 0 : index
    %46 = vector.load %arg0[%c0_21, %c0_22] : memref<16x8xf32, #tpu.memory_space<vmem>>, vector<16x8xf32>
    %cst_23 = arith.constant dense<0.000000e+00> : vector<16x4xf32>
    %47 = tpu.matmul %46, %7, %cst_23 {dimension_numbers = #tpu.dot_dimension_numbers<[1], [0], [0], [1], [0, 0, 1, 1], [], []>} : vector<16x8xf32>, vector<8x4xf32>, vector<16x4xf32> -> vector<16x4xf32>
    %48 = vector.broadcast %8 : vector<1x4xf32> to vector<16x4xf32>
    %49 = arith.addf %47, %48 : vector<16x4xf32>
    %cst_24 = arith.constant 0.000000e+00 : f32
    %50 = vector.broadcast %cst_24 : f32 to vector<2x32xf32>
    %cst_25 = arith.constant 0.000000e+00 : f32
    %51 = vector.broadcast %cst_25 : f32 to vector<2x32xf32>
    %52 = vector.extract_strided_slice %49 {offsets = [0, 0], sizes = [2, 4], strides = [1, 1]} : vector<16x4xf32> to vector<2x4xf32>
    %cst_26 = arith.constant dense<0.000000e+00> : vector<2x4xf32>
    %53 = tpu.matmul %50, %6, %cst_26 {dimension_numbers = #tpu.dot_dimension_numbers<[1], [0], [0], [1], [0, 0, 1, 1], [], []>} : vector<2x32xf32>, vector<32x4xf32>, vector<2x4xf32> -> vector<2x4xf32>
    %54 = arith.addf %52, %53 : vector<2x4xf32>
    %55 = arith.mulf %54, %54 : vector<2x4xf32>
    %cst_27 = arith.constant 1.000000e+00 : f32
    %56 = vector.broadcast %cst_27 : f32 to vector<2x4xf32>
    %57 = arith.addf %56, %55 : vector<2x4xf32>
    %58 = math.rsqrt %57 : vector<2x4xf32>
    %59 = arith.mulf %54, %58 : vector<2x4xf32>
    %cst_28 = arith.constant 1.000000e+00 : f32
    %60 = vector.broadcast %cst_28 : f32 to vector<2x4xf32>
    %61 = arith.addf %60, %58 : vector<2x4xf32>
    %cst_29 = arith.constant 5.000000e-01 : f32
    %62 = vector.broadcast %cst_29 : f32 to vector<2x4xf32>
    %63 = arith.mulf %61, %62 : vector<2x4xf32>
    %64 = math.rsqrt %63 : vector<2x4xf32>
    %65 = arith.mulf %63, %64 : vector<2x4xf32>
    %cst_30 = arith.constant 5.000000e-01 : f32
    %66 = vector.broadcast %cst_30 : f32 to vector<2x4xf32>
    %67 = arith.mulf %59, %66 : vector<2x4xf32>
    %68 = arith.mulf %67, %64 : vector<2x4xf32>
    %69 = arith.subf %65, %68 : vector<2x4xf32>
    %cst_31 = arith.constant 0.707106769 : f32
    %70 = vector.broadcast %cst_31 : f32 to vector<2x4xf32>
    %71 = arith.mulf %69, %70 : vector<2x4xf32>
    %72 = arith.addf %65, %68 : vector<2x4xf32>
    %cst_32 = arith.constant 0.707106769 : f32
    %73 = vector.broadcast %cst_32 : f32 to vector<2x4xf32>
    %74 = arith.mulf %72, %73 : vector<2x4xf32>
    %75 = arith.mulf %55, %55 : vector<2x4xf32>
    %cst_33 = arith.constant 1.000000e+00 : f32
    %76 = vector.broadcast %cst_33 : f32 to vector<2x4xf32>
    %77 = arith.addf %76, %75 : vector<2x4xf32>
    %78 = math.rsqrt %77 : vector<2x4xf32>
    %79 = arith.mulf %55, %78 : vector<2x4xf32>
    %cst_34 = arith.constant 1.000000e+00 : f32
    %80 = vector.broadcast %cst_34 : f32 to vector<2x4xf32>
    %81 = arith.addf %80, %78 : vector<2x4xf32>
    %cst_35 = arith.constant 5.000000e-01 : f32
    %82 = vector.broadcast %cst_35 : f32 to vector<2x4xf32>
    %83 = arith.mulf %81, %82 : vector<2x4xf32>
    %84 = math.rsqrt %83 : vector<2x4xf32>
    %85 = arith.mulf %83, %84 : vector<2x4xf32>
    %cst_36 = arith.constant 5.000000e-01 : f32
    %86 = vector.broadcast %cst_36 : f32 to vector<2x4xf32>
    %87 = arith.mulf %79, %86 : vector<2x4xf32>
    %88 = arith.mulf %87, %84 : vector<2x4xf32>
    %89 = arith.mulf %85, %71 : vector<2x4xf32>
    %90 = arith.mulf %88, %71 : vector<2x4xf32>
    %cst_37 = arith.constant 0.000000e+00 : f32
    %91 = vector.broadcast %cst_37 : f32 to vector<2x4xf32>
    %92 = arith.subf %91, %90 : vector<2x4xf32>
    %93 = arith.mulf %85, %74 : vector<2x4xf32>
    %94 = arith.mulf %88, %74 : vector<2x4xf32>
    %95 = vector.extract_strided_slice %93 {offsets = [0, 0], sizes = [2, 1], strides = [1, 1]} : vector<2x4xf32> to vector<2x1xf32>
    %96 = vector.extract_strided_slice %89 {offsets = [0, 0], sizes = [2, 1], strides = [1, 1]} : vector<2x4xf32> to vector<2x1xf32>
    %97 = vector.shape_cast %27 : vector<1x16xi1> to vector<1x16xi1>
    %98 = vector.broadcast %97 : vector<1x16xi1> to vector<2x16xi1>
    %99 = vector.shape_cast %95 : vector<2x1xf32> to vector<2x1xf32>
    %100 = vector.broadcast %99 : vector<2x1xf32> to vector<2x16xf32>
    %101 = vector.shape_cast %96 : vector<2x1xf32> to vector<2x1xf32>
    %102 = vector.broadcast %101 : vector<2x1xf32> to vector<2x16xf32>
    %103 = arith.select %98, %100, %102 : vector<2x16xi1>, vector<2x16xf32>
    %104 = vector.extract_strided_slice %93 {offsets = [0, 1], sizes = [2, 1], strides = [1, 1]} : vector<2x4xf32> to vector<2x1xf32>
    %105 = vector.extract_strided_slice %89 {offsets = [0, 1], sizes = [2, 1], strides = [1, 1]} : vector<2x4xf32> to vector<2x1xf32>
    %106 = vector.shape_cast %33 : vector<1x16xi1> to vector<1x16xi1>
    %107 = vector.broadcast %106 : vector<1x16xi1> to vector<2x16xi1>
    %108 = vector.shape_cast %104 : vector<2x1xf32> to vector<2x1xf32>
    %109 = vector.broadcast %108 : vector<2x1xf32> to vector<2x16xf32>
    %110 = vector.shape_cast %105 : vector<2x1xf32> to vector<2x1xf32>
    %111 = vector.broadcast %110 : vector<2x1xf32> to vector<2x16xf32>
    %112 = arith.select %107, %109, %111 : vector<2x16xi1>, vector<2x16xf32>
    %113 = vector.extract_strided_slice %93 {offsets = [0, 2], sizes = [2, 1], strides = [1, 1]} : vector<2x4xf32> to vector<2x1xf32>
    %114 = vector.extract_strided_slice %89 {offsets = [0, 2], sizes = [2, 1], strides = [1, 1]} : vector<2x4xf32> to vector<2x1xf32>
    %115 = vector.shape_cast %39 : vector<1x16xi1> to vector<1x16xi1>
    %116 = vector.broadcast %115 : vector<1x16xi1> to vector<2x16xi1>
    %117 = vector.shape_cast %113 : vector<2x1xf32> to vector<2x1xf32>
    %118 = vector.broadcast %117 : vector<2x1xf32> to vector<2x16xf32>
    %119 = vector.shape_cast %114 : vector<2x1xf32> to vector<2x1xf32>
    %120 = vector.broadcast %119 : vector<2x1xf32> to vector<2x16xf32>
    %121 = arith.select %116, %118, %120 : vector<2x16xi1>, vector<2x16xf32>
    %122 = vector.extract_strided_slice %93 {offsets = [0, 3], sizes = [2, 1], strides = [1, 1]} : vector<2x4xf32> to vector<2x1xf32>
    %123 = vector.extract_strided_slice %89 {offsets = [0, 3], sizes = [2, 1], strides = [1, 1]} : vector<2x4xf32> to vector<2x1xf32>
    %124 = vector.shape_cast %45 : vector<1x16xi1> to vector<1x16xi1>
    %125 = vector.broadcast %124 : vector<1x16xi1> to vector<2x16xi1>
    %126 = vector.shape_cast %122 : vector<2x1xf32> to vector<2x1xf32>
    %127 = vector.broadcast %126 : vector<2x1xf32> to vector<2x16xf32>
    %128 = vector.shape_cast %123 : vector<2x1xf32> to vector<2x1xf32>
    %129 = vector.broadcast %128 : vector<2x1xf32> to vector<2x16xf32>
    %130 = arith.select %125, %127, %129 : vector<2x16xi1>, vector<2x16xf32>
    %131 = vector.extract_strided_slice %94 {offsets = [0, 0], sizes = [2, 1], strides = [1, 1]} : vector<2x4xf32> to vector<2x1xf32>
    %132 = vector.extract_strided_slice %92 {offsets = [0, 0], sizes = [2, 1], strides = [1, 1]} : vector<2x4xf32> to vector<2x1xf32>
    %133 = vector.shape_cast %27 : vector<1x16xi1> to vector<1x16xi1>
    %134 = vector.broadcast %133 : vector<1x16xi1> to vector<2x16xi1>
    %135 = vector.shape_cast %131 : vector<2x1xf32> to vector<2x1xf32>
    %136 = vector.broadcast %135 : vector<2x1xf32> to vector<2x16xf32>
    %137 = vector.shape_cast %132 : vector<2x1xf32> to vector<2x1xf32>
    %138 = vector.broadcast %137 : vector<2x1xf32> to vector<2x16xf32>
    %139 = arith.select %134, %136, %138 : vector<2x16xi1>, vector<2x16xf32>
    %140 = vector.extract_strided_slice %94 {offsets = [0, 1], sizes = [2, 1], strides = [1, 1]} : vector<2x4xf32> to vector<2x1xf32>
    %141 = vector.extract_strided_slice %92 {offsets = [0, 1], sizes = [2, 1], strides = [1, 1]} : vector<2x4xf32> to vector<2x1xf32>
    %142 = vector.shape_cast %33 : vector<1x16xi1> to vector<1x16xi1>
    %143 = vector.broadcast %142 : vector<1x16xi1> to vector<2x16xi1>
    %144 = vector.shape_cast %140 : vector<2x1xf32> to vector<2x1xf32>
    %145 = vector.broadcast %144 : vector<2x1xf32> to vector<2x16xf32>
    %146 = vector.shape_cast %141 : vector<2x1xf32> to vector<2x1xf32>
    %147 = vector.broadcast %146 : vector<2x1xf32> to vector<2x16xf32>
    %148 = arith.select %143, %145, %147 : vector<2x16xi1>, vector<2x16xf32>
    %149 = vector.extract_strided_slice %94 {offsets = [0, 2], sizes = [2, 1], strides = [1, 1]} : vector<2x4xf32> to vector<2x1xf32>
    %150 = vector.extract_strided_slice %92 {offsets = [0, 2], sizes = [2, 1], strides = [1, 1]} : vector<2x4xf32> to vector<2x1xf32>
    %151 = vector.shape_cast %39 : vector<1x16xi1> to vector<1x16xi1>
    %152 = vector.broadcast %151 : vector<1x16xi1> to vector<2x16xi1>
    %153 = vector.shape_cast %149 : vector<2x1xf32> to vector<2x1xf32>
    %154 = vector.broadcast %153 : vector<2x1xf32> to vector<2x16xf32>
    %155 = vector.shape_cast %150 : vector<2x1xf32> to vector<2x1xf32>
    %156 = vector.broadcast %155 : vector<2x1xf32> to vector<2x16xf32>
    %157 = arith.select %152, %154, %156 : vector<2x16xi1>, vector<2x16xf32>
    %158 = vector.extract_strided_slice %94 {offsets = [0, 3], sizes = [2, 1], strides = [1, 1]} : vector<2x4xf32> to vector<2x1xf32>
    %159 = vector.extract_strided_slice %92 {offsets = [0, 3], sizes = [2, 1], strides = [1, 1]} : vector<2x4xf32> to vector<2x1xf32>
    %160 = vector.shape_cast %45 : vector<1x16xi1> to vector<1x16xi1>
    %161 = vector.broadcast %160 : vector<1x16xi1> to vector<2x16xi1>
    %162 = vector.shape_cast %158 : vector<2x1xf32> to vector<2x1xf32>
    %163 = vector.broadcast %162 : vector<2x1xf32> to vector<2x16xf32>
    %164 = vector.shape_cast %159 : vector<2x1xf32> to vector<2x1xf32>
    %165 = vector.broadcast %164 : vector<2x1xf32> to vector<2x16xf32>
    %166 = arith.select %161, %163, %165 : vector<2x16xi1>, vector<2x16xf32>
    %167 = arith.mulf %103, %112 : vector<2x16xf32>
    %168 = arith.mulf %139, %148 : vector<2x16xf32>
    %169 = arith.subf %167, %168 : vector<2x16xf32>
    %170 = arith.mulf %103, %148 : vector<2x16xf32>
    %171 = arith.mulf %139, %112 : vector<2x16xf32>
    %172 = arith.addf %170, %171 : vector<2x16xf32>
    %173 = arith.mulf %121, %130 : vector<2x16xf32>
    %174 = arith.mulf %157, %166 : vector<2x16xf32>
    %175 = arith.subf %173, %174 : vector<2x16xf32>
    %176 = arith.mulf %121, %166 : vector<2x16xf32>
    %177 = arith.mulf %157, %130 : vector<2x16xf32>
    %178 = arith.addf %176, %177 : vector<2x16xf32>
    %179 = arith.mulf %169, %175 : vector<2x16xf32>
    %180 = arith.mulf %172, %178 : vector<2x16xf32>
    %181 = arith.subf %179, %180 : vector<2x16xf32>
    %182 = arith.mulf %169, %178 : vector<2x16xf32>
    %183 = arith.mulf %172, %175 : vector<2x16xf32>
    %184 = arith.addf %182, %183 : vector<2x16xf32>
    %cst_38 = arith.constant dense<0.000000e+00> : vector<2x128xf32>
    %185 = tpu.matmul %181, %0, %cst_38 {dimension_numbers = #tpu.dot_dimension_numbers<[1], [0], [0], [1], [0, 0, 1, 1], [], []>} : vector<2x16xf32>, vector<16x128xf32>, vector<2x128xf32> -> vector<2x128xf32>
    %cst_39 = arith.constant dense<0.000000e+00> : vector<2x128xf32>
    %186 = tpu.matmul %184, %1, %cst_39 {dimension_numbers = #tpu.dot_dimension_numbers<[1], [0], [0], [1], [0, 0, 1, 1], [], []>} : vector<2x16xf32>, vector<16x128xf32>, vector<2x128xf32> -> vector<2x128xf32>
    %187 = arith.addf %185, %186 : vector<2x128xf32>
    %188 = arith.mulf %187, %187 : vector<2x128xf32>
    %cst_40 = arith.constant dense<0.000000e+00> : vector<2x128xf32>
    %189 = tpu.matmul %188, %2, %cst_40 {dimension_numbers = #tpu.dot_dimension_numbers<[1], [0], [0], [1], [0, 0, 1, 1], [], []>} : vector<2x128xf32>, vector<128x128xf32>, vector<2x128xf32> -> vector<2x128xf32>
    %190 = vector.broadcast %3 : vector<1x128xf32> to vector<2x128xf32>
    %191 = arith.addf %189, %190 : vector<2x128xf32>
    %192 = math.tanh %191 : vector<2x128xf32>
    %193 = vector.broadcast %17 : vector<1x128xf32> to vector<2x128xf32>
    %194 = arith.mulf %192, %193 : vector<2x128xf32>
    %195 = vector.broadcast %20 : vector<1x128xf32> to vector<2x128xf32>
    %196 = arith.addf %194, %195 : vector<2x128xf32>
    %197 = vector.extract_strided_slice %196 {offsets = [0, 0], sizes = [2, 32], strides = [1, 1]} : vector<2x128xf32> to vector<2x32xf32>
    %198 = vector.extract_strided_slice %196 {offsets = [0, 32], sizes = [2, 32], strides = [1, 1]} : vector<2x128xf32> to vector<2x32xf32>
    %199 = vector.extract_strided_slice %196 {offsets = [0, 64], sizes = [2, 32], strides = [1, 1]} : vector<2x128xf32> to vector<2x32xf32>
    %200 = vector.extract_strided_slice %196 {offsets = [0, 96], sizes = [2, 32], strides = [1, 1]} : vector<2x128xf32> to vector<2x32xf32>
    %201 = arith.mulf %197, %51 : vector<2x32xf32>
    %202 = arith.mulf %198, %199 : vector<2x32xf32>
    %203 = arith.addf %201, %202 : vector<2x32xf32>
    %204 = math.tanh %203 : vector<2x32xf32>
    %205 = arith.mulf %200, %204 : vector<2x32xf32>
    %206 = vector.extract_strided_slice %49 {offsets = [2, 0], sizes = [2, 4], strides = [1, 1]} : vector<16x4xf32> to vector<2x4xf32>
    %cst_41 = arith.constant dense<0.000000e+00> : vector<2x4xf32>
    %207 = tpu.matmul %205, %6, %cst_41 {dimension_numbers = #tpu.dot_dimension_numbers<[1], [0], [0], [1], [0, 0, 1, 1], [], []>} : vector<2x32xf32>, vector<32x4xf32>, vector<2x4xf32> -> vector<2x4xf32>
    %208 = arith.addf %206, %207 : vector<2x4xf32>
    %209 = arith.mulf %208, %208 : vector<2x4xf32>
    %cst_42 = arith.constant 1.000000e+00 : f32
    %210 = vector.broadcast %cst_42 : f32 to vector<2x4xf32>
    %211 = arith.addf %210, %209 : vector<2x4xf32>
    %212 = math.rsqrt %211 : vector<2x4xf32>
    %213 = arith.mulf %208, %212 : vector<2x4xf32>
    %cst_43 = arith.constant 1.000000e+00 : f32
    %214 = vector.broadcast %cst_43 : f32 to vector<2x4xf32>
    %215 = arith.addf %214, %212 : vector<2x4xf32>
    %cst_44 = arith.constant 5.000000e-01 : f32
    %216 = vector.broadcast %cst_44 : f32 to vector<2x4xf32>
    %217 = arith.mulf %215, %216 : vector<2x4xf32>
    %218 = math.rsqrt %217 : vector<2x4xf32>
    %219 = arith.mulf %217, %218 : vector<2x4xf32>
    %cst_45 = arith.constant 5.000000e-01 : f32
    %220 = vector.broadcast %cst_45 : f32 to vector<2x4xf32>
    %221 = arith.mulf %213, %220 : vector<2x4xf32>
    %222 = arith.mulf %221, %218 : vector<2x4xf32>
    %223 = arith.subf %219, %222 : vector<2x4xf32>
    %cst_46 = arith.constant 0.707106769 : f32
    %224 = vector.broadcast %cst_46 : f32 to vector<2x4xf32>
    %225 = arith.mulf %223, %224 : vector<2x4xf32>
    %226 = arith.addf %219, %222 : vector<2x4xf32>
    %cst_47 = arith.constant 0.707106769 : f32
    %227 = vector.broadcast %cst_47 : f32 to vector<2x4xf32>
    %228 = arith.mulf %226, %227 : vector<2x4xf32>
    %229 = arith.mulf %209, %209 : vector<2x4xf32>
    %cst_48 = arith.constant 1.000000e+00 : f32
    %230 = vector.broadcast %cst_48 : f32 to vector<2x4xf32>
    %231 = arith.addf %230, %229 : vector<2x4xf32>
    %232 = math.rsqrt %231 : vector<2x4xf32>
    %233 = arith.mulf %209, %232 : vector<2x4xf32>
    %cst_49 = arith.constant 1.000000e+00 : f32
    %234 = vector.broadcast %cst_49 : f32 to vector<2x4xf32>
    %235 = arith.addf %234, %232 : vector<2x4xf32>
    %cst_50 = arith.constant 5.000000e-01 : f32
    %236 = vector.broadcast %cst_50 : f32 to vector<2x4xf32>
    %237 = arith.mulf %235, %236 : vector<2x4xf32>
    %238 = math.rsqrt %237 : vector<2x4xf32>
    %239 = arith.mulf %237, %238 : vector<2x4xf32>
    %cst_51 = arith.constant 5.000000e-01 : f32
    %240 = vector.broadcast %cst_51 : f32 to vector<2x4xf32>
    %241 = arith.mulf %233, %240 : vector<2x4xf32>
    %242 = arith.mulf %241, %238 : vector<2x4xf32>
    %243 = arith.mulf %239, %225 : vector<2x4xf32>
    %244 = arith.mulf %242, %225 : vector<2x4xf32>
    %cst_52 = arith.constant 0.000000e+00 : f32
    %245 = vector.broadcast %cst_52 : f32 to vector<2x4xf32>
    %246 = arith.subf %245, %244 : vector<2x4xf32>
    %247 = arith.mulf %239, %228 : vector<2x4xf32>
    %248 = arith.mulf %242, %228 : vector<2x4xf32>
    %249 = vector.extract_strided_slice %247 {offsets = [0, 0], sizes = [2, 1], strides = [1, 1]} : vector<2x4xf32> to vector<2x1xf32>
    %250 = vector.extract_strided_slice %243 {offsets = [0, 0], sizes = [2, 1], strides = [1, 1]} : vector<2x4xf32> to vector<2x1xf32>
    %251 = vector.shape_cast %27 : vector<1x16xi1> to vector<1x16xi1>
    %252 = vector.broadcast %251 : vector<1x16xi1> to vector<2x16xi1>
    %253 = vector.shape_cast %249 : vector<2x1xf32> to vector<2x1xf32>
    %254 = vector.broadcast %253 : vector<2x1xf32> to vector<2x16xf32>
    %255 = vector.shape_cast %250 : vector<2x1xf32> to vector<2x1xf32>
    %256 = vector.broadcast %255 : vector<2x1xf32> to vector<2x16xf32>
    %257 = arith.select %252, %254, %256 : vector<2x16xi1>, vector<2x16xf32>
    %258 = vector.extract_strided_slice %247 {offsets = [0, 1], sizes = [2, 1], strides = [1, 1]} : vector<2x4xf32> to vector<2x1xf32>
    %259 = vector.extract_strided_slice %243 {offsets = [0, 1], sizes = [2, 1], strides = [1, 1]} : vector<2x4xf32> to vector<2x1xf32>
    %260 = vector.shape_cast %33 : vector<1x16xi1> to vector<1x16xi1>
    %261 = vector.broadcast %260 : vector<1x16xi1> to vector<2x16xi1>
    %262 = vector.shape_cast %258 : vector<2x1xf32> to vector<2x1xf32>
    %263 = vector.broadcast %262 : vector<2x1xf32> to vector<2x16xf32>
    %264 = vector.shape_cast %259 : vector<2x1xf32> to vector<2x1xf32>
    %265 = vector.broadcast %264 : vector<2x1xf32> to vector<2x16xf32>
    %266 = arith.select %261, %263, %265 : vector<2x16xi1>, vector<2x16xf32>
    %267 = vector.extract_strided_slice %247 {offsets = [0, 2], sizes = [2, 1], strides = [1, 1]} : vector<2x4xf32> to vector<2x1xf32>
    %268 = vector.extract_strided_slice %243 {offsets = [0, 2], sizes = [2, 1], strides = [1, 1]} : vector<2x4xf32> to vector<2x1xf32>
    %269 = vector.shape_cast %39 : vector<1x16xi1> to vector<1x16xi1>
    %270 = vector.broadcast %269 : vector<1x16xi1> to vector<2x16xi1>
    %271 = vector.shape_cast %267 : vector<2x1xf32> to vector<2x1xf32>
    %272 = vector.broadcast %271 : vector<2x1xf32> to vector<2x16xf32>
    %273 = vector.shape_cast %268 : vector<2x1xf32> to vector<2x1xf32>
    %274 = vector.broadcast %273 : vector<2x1xf32> to vector<2x16xf32>
    %275 = arith.select %270, %272, %274 : vector<2x16xi1>, vector<2x16xf32>
    %276 = vector.extract_strided_slice %247 {offsets = [0, 3], sizes = [2, 1], strides = [1, 1]} : vector<2x4xf32> to vector<2x1xf32>
    %277 = vector.extract_strided_slice %243 {offsets = [0, 3], sizes = [2, 1], strides = [1, 1]} : vector<2x4xf32> to vector<2x1xf32>
    %278 = vector.shape_cast %45 : vector<1x16xi1> to vector<1x16xi1>
    %279 = vector.broadcast %278 : vector<1x16xi1> to vector<2x16xi1>
    %280 = vector.shape_cast %276 : vector<2x1xf32> to vector<2x1xf32>
    %281 = vector.broadcast %280 : vector<2x1xf32> to vector<2x16xf32>
    %282 = vector.shape_cast %277 : vector<2x1xf32> to vector<2x1xf32>
    %283 = vector.broadcast %282 : vector<2x1xf32> to vector<2x16xf32>
    %284 = arith.select %279, %281, %283 : vector<2x16xi1>, vector<2x16xf32>
    %285 = vector.extract_strided_slice %248 {offsets = [0, 0], sizes = [2, 1], strides = [1, 1]} : vector<2x4xf32> to vector<2x1xf32>
    %286 = vector.extract_strided_slice %246 {offsets = [0, 0], sizes = [2, 1], strides = [1, 1]} : vector<2x4xf32> to vector<2x1xf32>
    %287 = vector.shape_cast %27 : vector<1x16xi1> to vector<1x16xi1>
    %288 = vector.broadcast %287 : vector<1x16xi1> to vector<2x16xi1>
    %289 = vector.shape_cast %285 : vector<2x1xf32> to vector<2x1xf32>
    %290 = vector.broadcast %289 : vector<2x1xf32> to vector<2x16xf32>
    %291 = vector.shape_cast %286 : vector<2x1xf32> to vector<2x1xf32>
    %292 = vector.broadcast %291 : vector<2x1xf32> to vector<2x16xf32>
    %293 = arith.select %288, %290, %292 : vector<2x16xi1>, vector<2x16xf32>
    %294 = vector.extract_strided_slice %248 {offsets = [0, 1], sizes = [2, 1], strides = [1, 1]} : vector<2x4xf32> to vector<2x1xf32>
    %295 = vector.extract_strided_slice %246 {offsets = [0, 1], sizes = [2, 1], strides = [1, 1]} : vector<2x4xf32> to vector<2x1xf32>
    %296 = vector.shape_cast %33 : vector<1x16xi1> to vector<1x16xi1>
    %297 = vector.broadcast %296 : vector<1x16xi1> to vector<2x16xi1>
    %298 = vector.shape_cast %294 : vector<2x1xf32> to vector<2x1xf32>
    %299 = vector.broadcast %298 : vector<2x1xf32> to vector<2x16xf32>
    %300 = vector.shape_cast %295 : vector<2x1xf32> to vector<2x1xf32>
    %301 = vector.broadcast %300 : vector<2x1xf32> to vector<2x16xf32>
    %302 = arith.select %297, %299, %301 : vector<2x16xi1>, vector<2x16xf32>
    %303 = vector.extract_strided_slice %248 {offsets = [0, 2], sizes = [2, 1], strides = [1, 1]} : vector<2x4xf32> to vector<2x1xf32>
    %304 = vector.extract_strided_slice %246 {offsets = [0, 2], sizes = [2, 1], strides = [1, 1]} : vector<2x4xf32> to vector<2x1xf32>
    %305 = vector.shape_cast %39 : vector<1x16xi1> to vector<1x16xi1>
    %306 = vector.broadcast %305 : vector<1x16xi1> to vector<2x16xi1>
    %307 = vector.shape_cast %303 : vector<2x1xf32> to vector<2x1xf32>
    %308 = vector.broadcast %307 : vector<2x1xf32> to vector<2x16xf32>
    %309 = vector.shape_cast %304 : vector<2x1xf32> to vector<2x1xf32>
    %310 = vector.broadcast %309 : vector<2x1xf32> to vector<2x16xf32>
    %311 = arith.select %306, %308, %310 : vector<2x16xi1>, vector<2x16xf32>
    %312 = vector.extract_strided_slice %248 {offsets = [0, 3], sizes = [2, 1], strides = [1, 1]} : vector<2x4xf32> to vector<2x1xf32>
    %313 = vector.extract_strided_slice %246 {offsets = [0, 3], sizes = [2, 1], strides = [1, 1]} : vector<2x4xf32> to vector<2x1xf32>
    %314 = vector.shape_cast %45 : vector<1x16xi1> to vector<1x16xi1>
    %315 = vector.broadcast %314 : vector<1x16xi1> to vector<2x16xi1>
    %316 = vector.shape_cast %312 : vector<2x1xf32> to vector<2x1xf32>
    %317 = vector.broadcast %316 : vector<2x1xf32> to vector<2x16xf32>
    %318 = vector.shape_cast %313 : vector<2x1xf32> to vector<2x1xf32>
    %319 = vector.broadcast %318 : vector<2x1xf32> to vector<2x16xf32>
    %320 = arith.select %315, %317, %319 : vector<2x16xi1>, vector<2x16xf32>
    %321 = arith.mulf %257, %266 : vector<2x16xf32>
    %322 = arith.mulf %293, %302 : vector<2x16xf32>
    %323 = arith.subf %321, %322 : vector<2x16xf32>
    %324 = arith.mulf %257, %302 : vector<2x16xf32>
    %325 = arith.mulf %293, %266 : vector<2x16xf32>
    %326 = arith.addf %324, %325 : vector<2x16xf32>
    %327 = arith.mulf %275, %284 : vector<2x16xf32>
    %328 = arith.mulf %311, %320 : vector<2x16xf32>
    %329 = arith.subf %327, %328 : vector<2x16xf32>
    %330 = arith.mulf %275, %320 : vector<2x16xf32>
    %331 = arith.mulf %311, %284 : vector<2x16xf32>
    %332 = arith.addf %330, %331 : vector<2x16xf32>
    %333 = arith.mulf %323, %329 : vector<2x16xf32>
    %334 = arith.mulf %326, %332 : vector<2x16xf32>
    %335 = arith.subf %333, %334 : vector<2x16xf32>
    %336 = arith.mulf %323, %332 : vector<2x16xf32>
    %337 = arith.mulf %326, %329 : vector<2x16xf32>
    %338 = arith.addf %336, %337 : vector<2x16xf32>
    %cst_53 = arith.constant dense<0.000000e+00> : vector<2x128xf32>
    %339 = tpu.matmul %335, %0, %cst_53 {dimension_numbers = #tpu.dot_dimension_numbers<[1], [0], [0], [1], [0, 0, 1, 1], [], []>} : vector<2x16xf32>, vector<16x128xf32>, vector<2x128xf32> -> vector<2x128xf32>
    %cst_54 = arith.constant dense<0.000000e+00> : vector<2x128xf32>
    %340 = tpu.matmul %338, %1, %cst_54 {dimension_numbers = #tpu.dot_dimension_numbers<[1], [0], [0], [1], [0, 0, 1, 1], [], []>} : vector<2x16xf32>, vector<16x128xf32>, vector<2x128xf32> -> vector<2x128xf32>
    %341 = arith.addf %339, %340 : vector<2x128xf32>
    %342 = arith.mulf %341, %341 : vector<2x128xf32>
    %cst_55 = arith.constant dense<0.000000e+00> : vector<2x128xf32>
    %343 = tpu.matmul %342, %2, %cst_55 {dimension_numbers = #tpu.dot_dimension_numbers<[1], [0], [0], [1], [0, 0, 1, 1], [], []>} : vector<2x128xf32>, vector<128x128xf32>, vector<2x128xf32> -> vector<2x128xf32>
    %344 = vector.broadcast %3 : vector<1x128xf32> to vector<2x128xf32>
    %345 = arith.addf %343, %344 : vector<2x128xf32>
    %346 = math.tanh %345 : vector<2x128xf32>
    %347 = vector.broadcast %17 : vector<1x128xf32> to vector<2x128xf32>
    %348 = arith.mulf %346, %347 : vector<2x128xf32>
    %349 = vector.broadcast %20 : vector<1x128xf32> to vector<2x128xf32>
    %350 = arith.addf %348, %349 : vector<2x128xf32>
    %351 = vector.extract_strided_slice %350 {offsets = [0, 0], sizes = [2, 32], strides = [1, 1]} : vector<2x128xf32> to vector<2x32xf32>
    %352 = vector.extract_strided_slice %350 {offsets = [0, 32], sizes = [2, 32], strides = [1, 1]} : vector<2x128xf32> to vector<2x32xf32>
    %353 = vector.extract_strided_slice %350 {offsets = [0, 64], sizes = [2, 32], strides = [1, 1]} : vector<2x128xf32> to vector<2x32xf32>
    %354 = vector.extract_strided_slice %350 {offsets = [0, 96], sizes = [2, 32], strides = [1, 1]} : vector<2x128xf32> to vector<2x32xf32>
    %355 = arith.mulf %351, %203 : vector<2x32xf32>
    %356 = arith.mulf %352, %353 : vector<2x32xf32>
    %357 = arith.addf %355, %356 : vector<2x32xf32>
    %358 = math.tanh %357 : vector<2x32xf32>
    %359 = arith.mulf %354, %358 : vector<2x32xf32>
    %360 = vector.extract_strided_slice %49 {offsets = [4, 0], sizes = [2, 4], strides = [1, 1]} : vector<16x4xf32> to vector<2x4xf32>
    %cst_56 = arith.constant dense<0.000000e+00> : vector<2x4xf32>
    %361 = tpu.matmul %359, %6, %cst_56 {dimension_numbers = #tpu.dot_dimension_numbers<[1], [0], [0], [1], [0, 0, 1, 1], [], []>} : vector<2x32xf32>, vector<32x4xf32>, vector<2x4xf32> -> vector<2x4xf32>
    %362 = arith.addf %360, %361 : vector<2x4xf32>
    %363 = arith.mulf %362, %362 : vector<2x4xf32>
    %cst_57 = arith.constant 1.000000e+00 : f32
    %364 = vector.broadcast %cst_57 : f32 to vector<2x4xf32>
    %365 = arith.addf %364, %363 : vector<2x4xf32>
    %366 = math.rsqrt %365 : vector<2x4xf32>
    %367 = arith.mulf %362, %366 : vector<2x4xf32>
    %cst_58 = arith.constant 1.000000e+00 : f32
    %368 = vector.broadcast %cst_58 : f32 to vector<2x4xf32>
    %369 = arith.addf %368, %366 : vector<2x4xf32>
    %cst_59 = arith.constant 5.000000e-01 : f32
    %370 = vector.broadcast %cst_59 : f32 to vector<2x4xf32>
    %371 = arith.mulf %369, %370 : vector<2x4xf32>
    %372 = math.rsqrt %371 : vector<2x4xf32>
    %373 = arith.mulf %371, %372 : vector<2x4xf32>
    %cst_60 = arith.constant 5.000000e-01 : f32
    %374 = vector.broadcast %cst_60 : f32 to vector<2x4xf32>
    %375 = arith.mulf %367, %374 : vector<2x4xf32>
    %376 = arith.mulf %375, %372 : vector<2x4xf32>
    %377 = arith.subf %373, %376 : vector<2x4xf32>
    %cst_61 = arith.constant 0.707106769 : f32
    %378 = vector.broadcast %cst_61 : f32 to vector<2x4xf32>
    %379 = arith.mulf %377, %378 : vector<2x4xf32>
    %380 = arith.addf %373, %376 : vector<2x4xf32>
    %cst_62 = arith.constant 0.707106769 : f32
    %381 = vector.broadcast %cst_62 : f32 to vector<2x4xf32>
    %382 = arith.mulf %380, %381 : vector<2x4xf32>
    %383 = arith.mulf %363, %363 : vector<2x4xf32>
    %cst_63 = arith.constant 1.000000e+00 : f32
    %384 = vector.broadcast %cst_63 : f32 to vector<2x4xf32>
    %385 = arith.addf %384, %383 : vector<2x4xf32>
    %386 = math.rsqrt %385 : vector<2x4xf32>
    %387 = arith.mulf %363, %386 : vector<2x4xf32>
    %cst_64 = arith.constant 1.000000e+00 : f32
    %388 = vector.broadcast %cst_64 : f32 to vector<2x4xf32>
    %389 = arith.addf %388, %386 : vector<2x4xf32>
    %cst_65 = arith.constant 5.000000e-01 : f32
    %390 = vector.broadcast %cst_65 : f32 to vector<2x4xf32>
    %391 = arith.mulf %389, %390 : vector<2x4xf32>
    %392 = math.rsqrt %391 : vector<2x4xf32>
    %393 = arith.mulf %391, %392 : vector<2x4xf32>
    %cst_66 = arith.constant 5.000000e-01 : f32
    %394 = vector.broadcast %cst_66 : f32 to vector<2x4xf32>
    %395 = arith.mulf %387, %394 : vector<2x4xf32>
    %396 = arith.mulf %395, %392 : vector<2x4xf32>
    %397 = arith.mulf %393, %379 : vector<2x4xf32>
    %398 = arith.mulf %396, %379 : vector<2x4xf32>
    %cst_67 = arith.constant 0.000000e+00 : f32
    %399 = vector.broadcast %cst_67 : f32 to vector<2x4xf32>
    %400 = arith.subf %399, %398 : vector<2x4xf32>
    %401 = arith.mulf %393, %382 : vector<2x4xf32>
    %402 = arith.mulf %396, %382 : vector<2x4xf32>
    %403 = vector.extract_strided_slice %401 {offsets = [0, 0], sizes = [2, 1], strides = [1, 1]} : vector<2x4xf32> to vector<2x1xf32>
    %404 = vector.extract_strided_slice %397 {offsets = [0, 0], sizes = [2, 1], strides = [1, 1]} : vector<2x4xf32> to vector<2x1xf32>
    %405 = vector.shape_cast %27 : vector<1x16xi1> to vector<1x16xi1>
    %406 = vector.broadcast %405 : vector<1x16xi1> to vector<2x16xi1>
    %407 = vector.shape_cast %403 : vector<2x1xf32> to vector<2x1xf32>
    %408 = vector.broadcast %407 : vector<2x1xf32> to vector<2x16xf32>
    %409 = vector.shape_cast %404 : vector<2x1xf32> to vector<2x1xf32>
    %410 = vector.broadcast %409 : vector<2x1xf32> to vector<2x16xf32>
    %411 = arith.select %406, %408, %410 : vector<2x16xi1>, vector<2x16xf32>
    %412 = vector.extract_strided_slice %401 {offsets = [0, 1], sizes = [2, 1], strides = [1, 1]} : vector<2x4xf32> to vector<2x1xf32>
    %413 = vector.extract_strided_slice %397 {offsets = [0, 1], sizes = [2, 1], strides = [1, 1]} : vector<2x4xf32> to vector<2x1xf32>
    %414 = vector.shape_cast %33 : vector<1x16xi1> to vector<1x16xi1>
    %415 = vector.broadcast %414 : vector<1x16xi1> to vector<2x16xi1>
    %416 = vector.shape_cast %412 : vector<2x1xf32> to vector<2x1xf32>
    %417 = vector.broadcast %416 : vector<2x1xf32> to vector<2x16xf32>
    %418 = vector.shape_cast %413 : vector<2x1xf32> to vector<2x1xf32>
    %419 = vector.broadcast %418 : vector<2x1xf32> to vector<2x16xf32>
    %420 = arith.select %415, %417, %419 : vector<2x16xi1>, vector<2x16xf32>
    %421 = vector.extract_strided_slice %401 {offsets = [0, 2], sizes = [2, 1], strides = [1, 1]} : vector<2x4xf32> to vector<2x1xf32>
    %422 = vector.extract_strided_slice %397 {offsets = [0, 2], sizes = [2, 1], strides = [1, 1]} : vector<2x4xf32> to vector<2x1xf32>
    %423 = vector.shape_cast %39 : vector<1x16xi1> to vector<1x16xi1>
    %424 = vector.broadcast %423 : vector<1x16xi1> to vector<2x16xi1>
    %425 = vector.shape_cast %421 : vector<2x1xf32> to vector<2x1xf32>
    %426 = vector.broadcast %425 : vector<2x1xf32> to vector<2x16xf32>
    %427 = vector.shape_cast %422 : vector<2x1xf32> to vector<2x1xf32>
    %428 = vector.broadcast %427 : vector<2x1xf32> to vector<2x16xf32>
    %429 = arith.select %424, %426, %428 : vector<2x16xi1>, vector<2x16xf32>
    %430 = vector.extract_strided_slice %401 {offsets = [0, 3], sizes = [2, 1], strides = [1, 1]} : vector<2x4xf32> to vector<2x1xf32>
    %431 = vector.extract_strided_slice %397 {offsets = [0, 3], sizes = [2, 1], strides = [1, 1]} : vector<2x4xf32> to vector<2x1xf32>
    %432 = vector.shape_cast %45 : vector<1x16xi1> to vector<1x16xi1>
    %433 = vector.broadcast %432 : vector<1x16xi1> to vector<2x16xi1>
    %434 = vector.shape_cast %430 : vector<2x1xf32> to vector<2x1xf32>
    %435 = vector.broadcast %434 : vector<2x1xf32> to vector<2x16xf32>
    %436 = vector.shape_cast %431 : vector<2x1xf32> to vector<2x1xf32>
    %437 = vector.broadcast %436 : vector<2x1xf32> to vector<2x16xf32>
    %438 = arith.select %433, %435, %437 : vector<2x16xi1>, vector<2x16xf32>
    %439 = vector.extract_strided_slice %402 {offsets = [0, 0], sizes = [2, 1], strides = [1, 1]} : vector<2x4xf32> to vector<2x1xf32>
    %440 = vector.extract_strided_slice %400 {offsets = [0, 0], sizes = [2, 1], strides = [1, 1]} : vector<2x4xf32> to vector<2x1xf32>
    %441 = vector.shape_cast %27 : vector<1x16xi1> to vector<1x16xi1>
    %442 = vector.broadcast %441 : vector<1x16xi1> to vector<2x16xi1>
    %443 = vector.shape_cast %439 : vector<2x1xf32> to vector<2x1xf32>
    %444 = vector.broadcast %443 : vector<2x1xf32> to vector<2x16xf32>
    %445 = vector.shape_cast %440 : vector<2x1xf32> to vector<2x1xf32>
    %446 = vector.broadcast %445 : vector<2x1xf32> to vector<2x16xf32>
    %447 = arith.select %442, %444, %446 : vector<2x16xi1>, vector<2x16xf32>
    %448 = vector.extract_strided_slice %402 {offsets = [0, 1], sizes = [2, 1], strides = [1, 1]} : vector<2x4xf32> to vector<2x1xf32>
    %449 = vector.extract_strided_slice %400 {offsets = [0, 1], sizes = [2, 1], strides = [1, 1]} : vector<2x4xf32> to vector<2x1xf32>
    %450 = vector.shape_cast %33 : vector<1x16xi1> to vector<1x16xi1>
    %451 = vector.broadcast %450 : vector<1x16xi1> to vector<2x16xi1>
    %452 = vector.shape_cast %448 : vector<2x1xf32> to vector<2x1xf32>
    %453 = vector.broadcast %452 : vector<2x1xf32> to vector<2x16xf32>
    %454 = vector.shape_cast %449 : vector<2x1xf32> to vector<2x1xf32>
    %455 = vector.broadcast %454 : vector<2x1xf32> to vector<2x16xf32>
    %456 = arith.select %451, %453, %455 : vector<2x16xi1>, vector<2x16xf32>
    %457 = vector.extract_strided_slice %402 {offsets = [0, 2], sizes = [2, 1], strides = [1, 1]} : vector<2x4xf32> to vector<2x1xf32>
    %458 = vector.extract_strided_slice %400 {offsets = [0, 2], sizes = [2, 1], strides = [1, 1]} : vector<2x4xf32> to vector<2x1xf32>
    %459 = vector.shape_cast %39 : vector<1x16xi1> to vector<1x16xi1>
    %460 = vector.broadcast %459 : vector<1x16xi1> to vector<2x16xi1>
    %461 = vector.shape_cast %457 : vector<2x1xf32> to vector<2x1xf32>
    %462 = vector.broadcast %461 : vector<2x1xf32> to vector<2x16xf32>
    %463 = vector.shape_cast %458 : vector<2x1xf32> to vector<2x1xf32>
    %464 = vector.broadcast %463 : vector<2x1xf32> to vector<2x16xf32>
    %465 = arith.select %460, %462, %464 : vector<2x16xi1>, vector<2x16xf32>
    %466 = vector.extract_strided_slice %402 {offsets = [0, 3], sizes = [2, 1], strides = [1, 1]} : vector<2x4xf32> to vector<2x1xf32>
    %467 = vector.extract_strided_slice %400 {offsets = [0, 3], sizes = [2, 1], strides = [1, 1]} : vector<2x4xf32> to vector<2x1xf32>
    %468 = vector.shape_cast %45 : vector<1x16xi1> to vector<1x16xi1>
    %469 = vector.broadcast %468 : vector<1x16xi1> to vector<2x16xi1>
    %470 = vector.shape_cast %466 : vector<2x1xf32> to vector<2x1xf32>
    %471 = vector.broadcast %470 : vector<2x1xf32> to vector<2x16xf32>
    %472 = vector.shape_cast %467 : vector<2x1xf32> to vector<2x1xf32>
    %473 = vector.broadcast %472 : vector<2x1xf32> to vector<2x16xf32>
    %474 = arith.select %469, %471, %473 : vector<2x16xi1>, vector<2x16xf32>
    %475 = arith.mulf %411, %420 : vector<2x16xf32>
    %476 = arith.mulf %447, %456 : vector<2x16xf32>
    %477 = arith.subf %475, %476 : vector<2x16xf32>
    %478 = arith.mulf %411, %456 : vector<2x16xf32>
    %479 = arith.mulf %447, %420 : vector<2x16xf32>
    %480 = arith.addf %478, %479 : vector<2x16xf32>
    %481 = arith.mulf %429, %438 : vector<2x16xf32>
    %482 = arith.mulf %465, %474 : vector<2x16xf32>
    %483 = arith.subf %481, %482 : vector<2x16xf32>
    %484 = arith.mulf %429, %474 : vector<2x16xf32>
    %485 = arith.mulf %465, %438 : vector<2x16xf32>
    %486 = arith.addf %484, %485 : vector<2x16xf32>
    %487 = arith.mulf %477, %483 : vector<2x16xf32>
    %488 = arith.mulf %480, %486 : vector<2x16xf32>
    %489 = arith.subf %487, %488 : vector<2x16xf32>
    %490 = arith.mulf %477, %486 : vector<2x16xf32>
    %491 = arith.mulf %480, %483 : vector<2x16xf32>
    %492 = arith.addf %490, %491 : vector<2x16xf32>
    %cst_68 = arith.constant dense<0.000000e+00> : vector<2x128xf32>
    %493 = tpu.matmul %489, %0, %cst_68 {dimension_numbers = #tpu.dot_dimension_numbers<[1], [0], [0], [1], [0, 0, 1, 1], [], []>} : vector<2x16xf32>, vector<16x128xf32>, vector<2x128xf32> -> vector<2x128xf32>
    %cst_69 = arith.constant dense<0.000000e+00> : vector<2x128xf32>
    %494 = tpu.matmul %492, %1, %cst_69 {dimension_numbers = #tpu.dot_dimension_numbers<[1], [0], [0], [1], [0, 0, 1, 1], [], []>} : vector<2x16xf32>, vector<16x128xf32>, vector<2x128xf32> -> vector<2x128xf32>
    %495 = arith.addf %493, %494 : vector<2x128xf32>
    %496 = arith.mulf %495, %495 : vector<2x128xf32>
    %cst_70 = arith.constant dense<0.000000e+00> : vector<2x128xf32>
    %497 = tpu.matmul %496, %2, %cst_70 {dimension_numbers = #tpu.dot_dimension_numbers<[1], [0], [0], [1], [0, 0, 1, 1], [], []>} : vector<2x128xf32>, vector<128x128xf32>, vector<2x128xf32> -> vector<2x128xf32>
    %498 = vector.broadcast %3 : vector<1x128xf32> to vector<2x128xf32>
    %499 = arith.addf %497, %498 : vector<2x128xf32>
    %500 = math.tanh %499 : vector<2x128xf32>
    %501 = vector.broadcast %17 : vector<1x128xf32> to vector<2x128xf32>
    %502 = arith.mulf %500, %501 : vector<2x128xf32>
    %503 = vector.broadcast %20 : vector<1x128xf32> to vector<2x128xf32>
    %504 = arith.addf %502, %503 : vector<2x128xf32>
    %505 = vector.extract_strided_slice %504 {offsets = [0, 0], sizes = [2, 32], strides = [1, 1]} : vector<2x128xf32> to vector<2x32xf32>
    %506 = vector.extract_strided_slice %504 {offsets = [0, 32], sizes = [2, 32], strides = [1, 1]} : vector<2x128xf32> to vector<2x32xf32>
    %507 = vector.extract_strided_slice %504 {offsets = [0, 64], sizes = [2, 32], strides = [1, 1]} : vector<2x128xf32> to vector<2x32xf32>
    %508 = vector.extract_strided_slice %504 {offsets = [0, 96], sizes = [2, 32], strides = [1, 1]} : vector<2x128xf32> to vector<2x32xf32>
    %509 = arith.mulf %505, %357 : vector<2x32xf32>
    %510 = arith.mulf %506, %507 : vector<2x32xf32>
    %511 = arith.addf %509, %510 : vector<2x32xf32>
    %512 = math.tanh %511 : vector<2x32xf32>
    %513 = arith.mulf %508, %512 : vector<2x32xf32>
    %514 = vector.extract_strided_slice %49 {offsets = [6, 0], sizes = [2, 4], strides = [1, 1]} : vector<16x4xf32> to vector<2x4xf32>
    %cst_71 = arith.constant dense<0.000000e+00> : vector<2x4xf32>
    %515 = tpu.matmul %513, %6, %cst_71 {dimension_numbers = #tpu.dot_dimension_numbers<[1], [0], [0], [1], [0, 0, 1, 1], [], []>} : vector<2x32xf32>, vector<32x4xf32>, vector<2x4xf32> -> vector<2x4xf32>
    %516 = arith.addf %514, %515 : vector<2x4xf32>
    %517 = arith.mulf %516, %516 : vector<2x4xf32>
    %cst_72 = arith.constant 1.000000e+00 : f32
    %518 = vector.broadcast %cst_72 : f32 to vector<2x4xf32>
    %519 = arith.addf %518, %517 : vector<2x4xf32>
    %520 = math.rsqrt %519 : vector<2x4xf32>
    %521 = arith.mulf %516, %520 : vector<2x4xf32>
    %cst_73 = arith.constant 1.000000e+00 : f32
    %522 = vector.broadcast %cst_73 : f32 to vector<2x4xf32>
    %523 = arith.addf %522, %520 : vector<2x4xf32>
    %cst_74 = arith.constant 5.000000e-01 : f32
    %524 = vector.broadcast %cst_74 : f32 to vector<2x4xf32>
    %525 = arith.mulf %523, %524 : vector<2x4xf32>
    %526 = math.rsqrt %525 : vector<2x4xf32>
    %527 = arith.mulf %525, %526 : vector<2x4xf32>
    %cst_75 = arith.constant 5.000000e-01 : f32
    %528 = vector.broadcast %cst_75 : f32 to vector<2x4xf32>
    %529 = arith.mulf %521, %528 : vector<2x4xf32>
    %530 = arith.mulf %529, %526 : vector<2x4xf32>
    %531 = arith.subf %527, %530 : vector<2x4xf32>
    %cst_76 = arith.constant 0.707106769 : f32
    %532 = vector.broadcast %cst_76 : f32 to vector<2x4xf32>
    %533 = arith.mulf %531, %532 : vector<2x4xf32>
    %534 = arith.addf %527, %530 : vector<2x4xf32>
    %cst_77 = arith.constant 0.707106769 : f32
    %535 = vector.broadcast %cst_77 : f32 to vector<2x4xf32>
    %536 = arith.mulf %534, %535 : vector<2x4xf32>
    %537 = arith.mulf %517, %517 : vector<2x4xf32>
    %cst_78 = arith.constant 1.000000e+00 : f32
    %538 = vector.broadcast %cst_78 : f32 to vector<2x4xf32>
    %539 = arith.addf %538, %537 : vector<2x4xf32>
    %540 = math.rsqrt %539 : vector<2x4xf32>
    %541 = arith.mulf %517, %540 : vector<2x4xf32>
    %cst_79 = arith.constant 1.000000e+00 : f32
    %542 = vector.broadcast %cst_79 : f32 to vector<2x4xf32>
    %543 = arith.addf %542, %540 : vector<2x4xf32>
    %cst_80 = arith.constant 5.000000e-01 : f32
    %544 = vector.broadcast %cst_80 : f32 to vector<2x4xf32>
    %545 = arith.mulf %543, %544 : vector<2x4xf32>
    %546 = math.rsqrt %545 : vector<2x4xf32>
    %547 = arith.mulf %545, %546 : vector<2x4xf32>
    %cst_81 = arith.constant 5.000000e-01 : f32
    %548 = vector.broadcast %cst_81 : f32 to vector<2x4xf32>
    %549 = arith.mulf %541, %548 : vector<2x4xf32>
    %550 = arith.mulf %549, %546 : vector<2x4xf32>
    %551 = arith.mulf %547, %533 : vector<2x4xf32>
    %552 = arith.mulf %550, %533 : vector<2x4xf32>
    %cst_82 = arith.constant 0.000000e+00 : f32
    %553 = vector.broadcast %cst_82 : f32 to vector<2x4xf32>
    %554 = arith.subf %553, %552 : vector<2x4xf32>
    %555 = arith.mulf %547, %536 : vector<2x4xf32>
    %556 = arith.mulf %550, %536 : vector<2x4xf32>
    %557 = vector.extract_strided_slice %555 {offsets = [0, 0], sizes = [2, 1], strides = [1, 1]} : vector<2x4xf32> to vector<2x1xf32>
    %558 = vector.extract_strided_slice %551 {offsets = [0, 0], sizes = [2, 1], strides = [1, 1]} : vector<2x4xf32> to vector<2x1xf32>
    %559 = vector.shape_cast %27 : vector<1x16xi1> to vector<1x16xi1>
    %560 = vector.broadcast %559 : vector<1x16xi1> to vector<2x16xi1>
    %561 = vector.shape_cast %557 : vector<2x1xf32> to vector<2x1xf32>
    %562 = vector.broadcast %561 : vector<2x1xf32> to vector<2x16xf32>
    %563 = vector.shape_cast %558 : vector<2x1xf32> to vector<2x1xf32>
    %564 = vector.broadcast %563 : vector<2x1xf32> to vector<2x16xf32>
    %565 = arith.select %560, %562, %564 : vector<2x16xi1>, vector<2x16xf32>
    %566 = vector.extract_strided_slice %555 {offsets = [0, 1], sizes = [2, 1], strides = [1, 1]} : vector<2x4xf32> to vector<2x1xf32>
    %567 = vector.extract_strided_slice %551 {offsets = [0, 1], sizes = [2, 1], strides = [1, 1]} : vector<2x4xf32> to vector<2x1xf32>
    %568 = vector.shape_cast %33 : vector<1x16xi1> to vector<1x16xi1>
    %569 = vector.broadcast %568 : vector<1x16xi1> to vector<2x16xi1>
    %570 = vector.shape_cast %566 : vector<2x1xf32> to vector<2x1xf32>
    %571 = vector.broadcast %570 : vector<2x1xf32> to vector<2x16xf32>
    %572 = vector.shape_cast %567 : vector<2x1xf32> to vector<2x1xf32>
    %573 = vector.broadcast %572 : vector<2x1xf32> to vector<2x16xf32>
    %574 = arith.select %569, %571, %573 : vector<2x16xi1>, vector<2x16xf32>
    %575 = vector.extract_strided_slice %555 {offsets = [0, 2], sizes = [2, 1], strides = [1, 1]} : vector<2x4xf32> to vector<2x1xf32>
    %576 = vector.extract_strided_slice %551 {offsets = [0, 2], sizes = [2, 1], strides = [1, 1]} : vector<2x4xf32> to vector<2x1xf32>
    %577 = vector.shape_cast %39 : vector<1x16xi1> to vector<1x16xi1>
    %578 = vector.broadcast %577 : vector<1x16xi1> to vector<2x16xi1>
    %579 = vector.shape_cast %575 : vector<2x1xf32> to vector<2x1xf32>
    %580 = vector.broadcast %579 : vector<2x1xf32> to vector<2x16xf32>
    %581 = vector.shape_cast %576 : vector<2x1xf32> to vector<2x1xf32>
    %582 = vector.broadcast %581 : vector<2x1xf32> to vector<2x16xf32>
    %583 = arith.select %578, %580, %582 : vector<2x16xi1>, vector<2x16xf32>
    %584 = vector.extract_strided_slice %555 {offsets = [0, 3], sizes = [2, 1], strides = [1, 1]} : vector<2x4xf32> to vector<2x1xf32>
    %585 = vector.extract_strided_slice %551 {offsets = [0, 3], sizes = [2, 1], strides = [1, 1]} : vector<2x4xf32> to vector<2x1xf32>
    %586 = vector.shape_cast %45 : vector<1x16xi1> to vector<1x16xi1>
    %587 = vector.broadcast %586 : vector<1x16xi1> to vector<2x16xi1>
    %588 = vector.shape_cast %584 : vector<2x1xf32> to vector<2x1xf32>
    %589 = vector.broadcast %588 : vector<2x1xf32> to vector<2x16xf32>
    %590 = vector.shape_cast %585 : vector<2x1xf32> to vector<2x1xf32>
    %591 = vector.broadcast %590 : vector<2x1xf32> to vector<2x16xf32>
    %592 = arith.select %587, %589, %591 : vector<2x16xi1>, vector<2x16xf32>
    %593 = vector.extract_strided_slice %556 {offsets = [0, 0], sizes = [2, 1], strides = [1, 1]} : vector<2x4xf32> to vector<2x1xf32>
    %594 = vector.extract_strided_slice %554 {offsets = [0, 0], sizes = [2, 1], strides = [1, 1]} : vector<2x4xf32> to vector<2x1xf32>
    %595 = vector.shape_cast %27 : vector<1x16xi1> to vector<1x16xi1>
    %596 = vector.broadcast %595 : vector<1x16xi1> to vector<2x16xi1>
    %597 = vector.shape_cast %593 : vector<2x1xf32> to vector<2x1xf32>
    %598 = vector.broadcast %597 : vector<2x1xf32> to vector<2x16xf32>
    %599 = vector.shape_cast %594 : vector<2x1xf32> to vector<2x1xf32>
    %600 = vector.broadcast %599 : vector<2x1xf32> to vector<2x16xf32>
    %601 = arith.select %596, %598, %600 : vector<2x16xi1>, vector<2x16xf32>
    %602 = vector.extract_strided_slice %556 {offsets = [0, 1], sizes = [2, 1], strides = [1, 1]} : vector<2x4xf32> to vector<2x1xf32>
    %603 = vector.extract_strided_slice %554 {offsets = [0, 1], sizes = [2, 1], strides = [1, 1]} : vector<2x4xf32> to vector<2x1xf32>
    %604 = vector.shape_cast %33 : vector<1x16xi1> to vector<1x16xi1>
    %605 = vector.broadcast %604 : vector<1x16xi1> to vector<2x16xi1>
    %606 = vector.shape_cast %602 : vector<2x1xf32> to vector<2x1xf32>
    %607 = vector.broadcast %606 : vector<2x1xf32> to vector<2x16xf32>
    %608 = vector.shape_cast %603 : vector<2x1xf32> to vector<2x1xf32>
    %609 = vector.broadcast %608 : vector<2x1xf32> to vector<2x16xf32>
    %610 = arith.select %605, %607, %609 : vector<2x16xi1>, vector<2x16xf32>
    %611 = vector.extract_strided_slice %556 {offsets = [0, 2], sizes = [2, 1], strides = [1, 1]} : vector<2x4xf32> to vector<2x1xf32>
    %612 = vector.extract_strided_slice %554 {offsets = [0, 2], sizes = [2, 1], strides = [1, 1]} : vector<2x4xf32> to vector<2x1xf32>
    %613 = vector.shape_cast %39 : vector<1x16xi1> to vector<1x16xi1>
    %614 = vector.broadcast %613 : vector<1x16xi1> to vector<2x16xi1>
    %615 = vector.shape_cast %611 : vector<2x1xf32> to vector<2x1xf32>
    %616 = vector.broadcast %615 : vector<2x1xf32> to vector<2x16xf32>
    %617 = vector.shape_cast %612 : vector<2x1xf32> to vector<2x1xf32>
    %618 = vector.broadcast %617 : vector<2x1xf32> to vector<2x16xf32>
    %619 = arith.select %614, %616, %618 : vector<2x16xi1>, vector<2x16xf32>
    %620 = vector.extract_strided_slice %556 {offsets = [0, 3], sizes = [2, 1], strides = [1, 1]} : vector<2x4xf32> to vector<2x1xf32>
    %621 = vector.extract_strided_slice %554 {offsets = [0, 3], sizes = [2, 1], strides = [1, 1]} : vector<2x4xf32> to vector<2x1xf32>
    %622 = vector.shape_cast %45 : vector<1x16xi1> to vector<1x16xi1>
    %623 = vector.broadcast %622 : vector<1x16xi1> to vector<2x16xi1>
    %624 = vector.shape_cast %620 : vector<2x1xf32> to vector<2x1xf32>
    %625 = vector.broadcast %624 : vector<2x1xf32> to vector<2x16xf32>
    %626 = vector.shape_cast %621 : vector<2x1xf32> to vector<2x1xf32>
    %627 = vector.broadcast %626 : vector<2x1xf32> to vector<2x16xf32>
    %628 = arith.select %623, %625, %627 : vector<2x16xi1>, vector<2x16xf32>
    %629 = arith.mulf %565, %574 : vector<2x16xf32>
    %630 = arith.mulf %601, %610 : vector<2x16xf32>
    %631 = arith.subf %629, %630 : vector<2x16xf32>
    %632 = arith.mulf %565, %610 : vector<2x16xf32>
    %633 = arith.mulf %601, %574 : vector<2x16xf32>
    %634 = arith.addf %632, %633 : vector<2x16xf32>
    %635 = arith.mulf %583, %592 : vector<2x16xf32>
    %636 = arith.mulf %619, %628 : vector<2x16xf32>
    %637 = arith.subf %635, %636 : vector<2x16xf32>
    %638 = arith.mulf %583, %628 : vector<2x16xf32>
    %639 = arith.mulf %619, %592 : vector<2x16xf32>
    %640 = arith.addf %638, %639 : vector<2x16xf32>
    %641 = arith.mulf %631, %637 : vector<2x16xf32>
    %642 = arith.mulf %634, %640 : vector<2x16xf32>
    %643 = arith.subf %641, %642 : vector<2x16xf32>
    %644 = arith.mulf %631, %640 : vector<2x16xf32>
    %645 = arith.mulf %634, %637 : vector<2x16xf32>
    %646 = arith.addf %644, %645 : vector<2x16xf32>
    %cst_83 = arith.constant dense<0.000000e+00> : vector<2x128xf32>
    %647 = tpu.matmul %643, %0, %cst_83 {dimension_numbers = #tpu.dot_dimension_numbers<[1], [0], [0], [1], [0, 0, 1, 1], [], []>} : vector<2x16xf32>, vector<16x128xf32>, vector<2x128xf32> -> vector<2x128xf32>
    %cst_84 = arith.constant dense<0.000000e+00> : vector<2x128xf32>
    %648 = tpu.matmul %646, %1, %cst_84 {dimension_numbers = #tpu.dot_dimension_numbers<[1], [0], [0], [1], [0, 0, 1, 1], [], []>} : vector<2x16xf32>, vector<16x128xf32>, vector<2x128xf32> -> vector<2x128xf32>
    %649 = arith.addf %647, %648 : vector<2x128xf32>
    %650 = arith.mulf %649, %649 : vector<2x128xf32>
    %cst_85 = arith.constant dense<0.000000e+00> : vector<2x128xf32>
    %651 = tpu.matmul %650, %2, %cst_85 {dimension_numbers = #tpu.dot_dimension_numbers<[1], [0], [0], [1], [0, 0, 1, 1], [], []>} : vector<2x128xf32>, vector<128x128xf32>, vector<2x128xf32> -> vector<2x128xf32>
    %652 = vector.broadcast %3 : vector<1x128xf32> to vector<2x128xf32>
    %653 = arith.addf %651, %652 : vector<2x128xf32>
    %654 = math.tanh %653 : vector<2x128xf32>
    %655 = vector.broadcast %17 : vector<1x128xf32> to vector<2x128xf32>
    %656 = arith.mulf %654, %655 : vector<2x128xf32>
    %657 = vector.broadcast %20 : vector<1x128xf32> to vector<2x128xf32>
    %658 = arith.addf %656, %657 : vector<2x128xf32>
    %659 = vector.extract_strided_slice %658 {offsets = [0, 0], sizes = [2, 32], strides = [1, 1]} : vector<2x128xf32> to vector<2x32xf32>
    %660 = vector.extract_strided_slice %658 {offsets = [0, 32], sizes = [2, 32], strides = [1, 1]} : vector<2x128xf32> to vector<2x32xf32>
    %661 = vector.extract_strided_slice %658 {offsets = [0, 64], sizes = [2, 32], strides = [1, 1]} : vector<2x128xf32> to vector<2x32xf32>
    %662 = vector.extract_strided_slice %658 {offsets = [0, 96], sizes = [2, 32], strides = [1, 1]} : vector<2x128xf32> to vector<2x32xf32>
    %663 = arith.mulf %659, %511 : vector<2x32xf32>
    %664 = arith.mulf %660, %661 : vector<2x32xf32>
    %665 = arith.addf %663, %664 : vector<2x32xf32>
    %666 = math.tanh %665 : vector<2x32xf32>
    %667 = arith.mulf %662, %666 : vector<2x32xf32>
    %668 = vector.extract_strided_slice %49 {offsets = [8, 0], sizes = [2, 4], strides = [1, 1]} : vector<16x4xf32> to vector<2x4xf32>
    %cst_86 = arith.constant dense<0.000000e+00> : vector<2x4xf32>
    %669 = tpu.matmul %667, %6, %cst_86 {dimension_numbers = #tpu.dot_dimension_numbers<[1], [0], [0], [1], [0, 0, 1, 1], [], []>} : vector<2x32xf32>, vector<32x4xf32>, vector<2x4xf32> -> vector<2x4xf32>
    %670 = arith.addf %668, %669 : vector<2x4xf32>
    %671 = arith.mulf %670, %670 : vector<2x4xf32>
    %cst_87 = arith.constant 1.000000e+00 : f32
    %672 = vector.broadcast %cst_87 : f32 to vector<2x4xf32>
    %673 = arith.addf %672, %671 : vector<2x4xf32>
    %674 = math.rsqrt %673 : vector<2x4xf32>
    %675 = arith.mulf %670, %674 : vector<2x4xf32>
    %cst_88 = arith.constant 1.000000e+00 : f32
    %676 = vector.broadcast %cst_88 : f32 to vector<2x4xf32>
    %677 = arith.addf %676, %674 : vector<2x4xf32>
    %cst_89 = arith.constant 5.000000e-01 : f32
    %678 = vector.broadcast %cst_89 : f32 to vector<2x4xf32>
    %679 = arith.mulf %677, %678 : vector<2x4xf32>
    %680 = math.rsqrt %679 : vector<2x4xf32>
    %681 = arith.mulf %679, %680 : vector<2x4xf32>
    %cst_90 = arith.constant 5.000000e-01 : f32
    %682 = vector.broadcast %cst_90 : f32 to vector<2x4xf32>
    %683 = arith.mulf %675, %682 : vector<2x4xf32>
    %684 = arith.mulf %683, %680 : vector<2x4xf32>
    %685 = arith.subf %681, %684 : vector<2x4xf32>
    %cst_91 = arith.constant 0.707106769 : f32
    %686 = vector.broadcast %cst_91 : f32 to vector<2x4xf32>
    %687 = arith.mulf %685, %686 : vector<2x4xf32>
    %688 = arith.addf %681, %684 : vector<2x4xf32>
    %cst_92 = arith.constant 0.707106769 : f32
    %689 = vector.broadcast %cst_92 : f32 to vector<2x4xf32>
    %690 = arith.mulf %688, %689 : vector<2x4xf32>
    %691 = arith.mulf %671, %671 : vector<2x4xf32>
    %cst_93 = arith.constant 1.000000e+00 : f32
    %692 = vector.broadcast %cst_93 : f32 to vector<2x4xf32>
    %693 = arith.addf %692, %691 : vector<2x4xf32>
    %694 = math.rsqrt %693 : vector<2x4xf32>
    %695 = arith.mulf %671, %694 : vector<2x4xf32>
    %cst_94 = arith.constant 1.000000e+00 : f32
    %696 = vector.broadcast %cst_94 : f32 to vector<2x4xf32>
    %697 = arith.addf %696, %694 : vector<2x4xf32>
    %cst_95 = arith.constant 5.000000e-01 : f32
    %698 = vector.broadcast %cst_95 : f32 to vector<2x4xf32>
    %699 = arith.mulf %697, %698 : vector<2x4xf32>
    %700 = math.rsqrt %699 : vector<2x4xf32>
    %701 = arith.mulf %699, %700 : vector<2x4xf32>
    %cst_96 = arith.constant 5.000000e-01 : f32
    %702 = vector.broadcast %cst_96 : f32 to vector<2x4xf32>
    %703 = arith.mulf %695, %702 : vector<2x4xf32>
    %704 = arith.mulf %703, %700 : vector<2x4xf32>
    %705 = arith.mulf %701, %687 : vector<2x4xf32>
    %706 = arith.mulf %704, %687 : vector<2x4xf32>
    %cst_97 = arith.constant 0.000000e+00 : f32
    %707 = vector.broadcast %cst_97 : f32 to vector<2x4xf32>
    %708 = arith.subf %707, %706 : vector<2x4xf32>
    %709 = arith.mulf %701, %690 : vector<2x4xf32>
    %710 = arith.mulf %704, %690 : vector<2x4xf32>
    %711 = vector.extract_strided_slice %709 {offsets = [0, 0], sizes = [2, 1], strides = [1, 1]} : vector<2x4xf32> to vector<2x1xf32>
    %712 = vector.extract_strided_slice %705 {offsets = [0, 0], sizes = [2, 1], strides = [1, 1]} : vector<2x4xf32> to vector<2x1xf32>
    %713 = vector.shape_cast %27 : vector<1x16xi1> to vector<1x16xi1>
    %714 = vector.broadcast %713 : vector<1x16xi1> to vector<2x16xi1>
    %715 = vector.shape_cast %711 : vector<2x1xf32> to vector<2x1xf32>
    %716 = vector.broadcast %715 : vector<2x1xf32> to vector<2x16xf32>
    %717 = vector.shape_cast %712 : vector<2x1xf32> to vector<2x1xf32>
    %718 = vector.broadcast %717 : vector<2x1xf32> to vector<2x16xf32>
    %719 = arith.select %714, %716, %718 : vector<2x16xi1>, vector<2x16xf32>
    %720 = vector.extract_strided_slice %709 {offsets = [0, 1], sizes = [2, 1], strides = [1, 1]} : vector<2x4xf32> to vector<2x1xf32>
    %721 = vector.extract_strided_slice %705 {offsets = [0, 1], sizes = [2, 1], strides = [1, 1]} : vector<2x4xf32> to vector<2x1xf32>
    %722 = vector.shape_cast %33 : vector<1x16xi1> to vector<1x16xi1>
    %723 = vector.broadcast %722 : vector<1x16xi1> to vector<2x16xi1>
    %724 = vector.shape_cast %720 : vector<2x1xf32> to vector<2x1xf32>
    %725 = vector.broadcast %724 : vector<2x1xf32> to vector<2x16xf32>
    %726 = vector.shape_cast %721 : vector<2x1xf32> to vector<2x1xf32>
    %727 = vector.broadcast %726 : vector<2x1xf32> to vector<2x16xf32>
    %728 = arith.select %723, %725, %727 : vector<2x16xi1>, vector<2x16xf32>
    %729 = vector.extract_strided_slice %709 {offsets = [0, 2], sizes = [2, 1], strides = [1, 1]} : vector<2x4xf32> to vector<2x1xf32>
    %730 = vector.extract_strided_slice %705 {offsets = [0, 2], sizes = [2, 1], strides = [1, 1]} : vector<2x4xf32> to vector<2x1xf32>
    %731 = vector.shape_cast %39 : vector<1x16xi1> to vector<1x16xi1>
    %732 = vector.broadcast %731 : vector<1x16xi1> to vector<2x16xi1>
    %733 = vector.shape_cast %729 : vector<2x1xf32> to vector<2x1xf32>
    %734 = vector.broadcast %733 : vector<2x1xf32> to vector<2x16xf32>
    %735 = vector.shape_cast %730 : vector<2x1xf32> to vector<2x1xf32>
    %736 = vector.broadcast %735 : vector<2x1xf32> to vector<2x16xf32>
    %737 = arith.select %732, %734, %736 : vector<2x16xi1>, vector<2x16xf32>
    %738 = vector.extract_strided_slice %709 {offsets = [0, 3], sizes = [2, 1], strides = [1, 1]} : vector<2x4xf32> to vector<2x1xf32>
    %739 = vector.extract_strided_slice %705 {offsets = [0, 3], sizes = [2, 1], strides = [1, 1]} : vector<2x4xf32> to vector<2x1xf32>
    %740 = vector.shape_cast %45 : vector<1x16xi1> to vector<1x16xi1>
    %741 = vector.broadcast %740 : vector<1x16xi1> to vector<2x16xi1>
    %742 = vector.shape_cast %738 : vector<2x1xf32> to vector<2x1xf32>
    %743 = vector.broadcast %742 : vector<2x1xf32> to vector<2x16xf32>
    %744 = vector.shape_cast %739 : vector<2x1xf32> to vector<2x1xf32>
    %745 = vector.broadcast %744 : vector<2x1xf32> to vector<2x16xf32>
    %746 = arith.select %741, %743, %745 : vector<2x16xi1>, vector<2x16xf32>
    %747 = vector.extract_strided_slice %710 {offsets = [0, 0], sizes = [2, 1], strides = [1, 1]} : vector<2x4xf32> to vector<2x1xf32>
    %748 = vector.extract_strided_slice %708 {offsets = [0, 0], sizes = [2, 1], strides = [1, 1]} : vector<2x4xf32> to vector<2x1xf32>
    %749 = vector.shape_cast %27 : vector<1x16xi1> to vector<1x16xi1>
    %750 = vector.broadcast %749 : vector<1x16xi1> to vector<2x16xi1>
    %751 = vector.shape_cast %747 : vector<2x1xf32> to vector<2x1xf32>
    %752 = vector.broadcast %751 : vector<2x1xf32> to vector<2x16xf32>
    %753 = vector.shape_cast %748 : vector<2x1xf32> to vector<2x1xf32>
    %754 = vector.broadcast %753 : vector<2x1xf32> to vector<2x16xf32>
    %755 = arith.select %750, %752, %754 : vector<2x16xi1>, vector<2x16xf32>
    %756 = vector.extract_strided_slice %710 {offsets = [0, 1], sizes = [2, 1], strides = [1, 1]} : vector<2x4xf32> to vector<2x1xf32>
    %757 = vector.extract_strided_slice %708 {offsets = [0, 1], sizes = [2, 1], strides = [1, 1]} : vector<2x4xf32> to vector<2x1xf32>
    %758 = vector.shape_cast %33 : vector<1x16xi1> to vector<1x16xi1>
    %759 = vector.broadcast %758 : vector<1x16xi1> to vector<2x16xi1>
    %760 = vector.shape_cast %756 : vector<2x1xf32> to vector<2x1xf32>
    %761 = vector.broadcast %760 : vector<2x1xf32> to vector<2x16xf32>
    %762 = vector.shape_cast %757 : vector<2x1xf32> to vector<2x1xf32>
    %763 = vector.broadcast %762 : vector<2x1xf32> to vector<2x16xf32>
    %764 = arith.select %759, %761, %763 : vector<2x16xi1>, vector<2x16xf32>
    %765 = vector.extract_strided_slice %710 {offsets = [0, 2], sizes = [2, 1], strides = [1, 1]} : vector<2x4xf32> to vector<2x1xf32>
    %766 = vector.extract_strided_slice %708 {offsets = [0, 2], sizes = [2, 1], strides = [1, 1]} : vector<2x4xf32> to vector<2x1xf32>
    %767 = vector.shape_cast %39 : vector<1x16xi1> to vector<1x16xi1>
    %768 = vector.broadcast %767 : vector<1x16xi1> to vector<2x16xi1>
    %769 = vector.shape_cast %765 : vector<2x1xf32> to vector<2x1xf32>
    %770 = vector.broadcast %769 : vector<2x1xf32> to vector<2x16xf32>
    %771 = vector.shape_cast %766 : vector<2x1xf32> to vector<2x1xf32>
    %772 = vector.broadcast %771 : vector<2x1xf32> to vector<2x16xf32>
    %773 = arith.select %768, %770, %772 : vector<2x16xi1>, vector<2x16xf32>
    %774 = vector.extract_strided_slice %710 {offsets = [0, 3], sizes = [2, 1], strides = [1, 1]} : vector<2x4xf32> to vector<2x1xf32>
    %775 = vector.extract_strided_slice %708 {offsets = [0, 3], sizes = [2, 1], strides = [1, 1]} : vector<2x4xf32> to vector<2x1xf32>
    %776 = vector.shape_cast %45 : vector<1x16xi1> to vector<1x16xi1>
    %777 = vector.broadcast %776 : vector<1x16xi1> to vector<2x16xi1>
    %778 = vector.shape_cast %774 : vector<2x1xf32> to vector<2x1xf32>
    %779 = vector.broadcast %778 : vector<2x1xf32> to vector<2x16xf32>
    %780 = vector.shape_cast %775 : vector<2x1xf32> to vector<2x1xf32>
    %781 = vector.broadcast %780 : vector<2x1xf32> to vector<2x16xf32>
    %782 = arith.select %777, %779, %781 : vector<2x16xi1>, vector<2x16xf32>
    %783 = arith.mulf %719, %728 : vector<2x16xf32>
    %784 = arith.mulf %755, %764 : vector<2x16xf32>
    %785 = arith.subf %783, %784 : vector<2x16xf32>
    %786 = arith.mulf %719, %764 : vector<2x16xf32>
    %787 = arith.mulf %755, %728 : vector<2x16xf32>
    %788 = arith.addf %786, %787 : vector<2x16xf32>
    %789 = arith.mulf %737, %746 : vector<2x16xf32>
    %790 = arith.mulf %773, %782 : vector<2x16xf32>
    %791 = arith.subf %789, %790 : vector<2x16xf32>
    %792 = arith.mulf %737, %782 : vector<2x16xf32>
    %793 = arith.mulf %773, %746 : vector<2x16xf32>
    %794 = arith.addf %792, %793 : vector<2x16xf32>
    %795 = arith.mulf %785, %791 : vector<2x16xf32>
    %796 = arith.mulf %788, %794 : vector<2x16xf32>
    %797 = arith.subf %795, %796 : vector<2x16xf32>
    %798 = arith.mulf %785, %794 : vector<2x16xf32>
    %799 = arith.mulf %788, %791 : vector<2x16xf32>
    %800 = arith.addf %798, %799 : vector<2x16xf32>
    %cst_98 = arith.constant dense<0.000000e+00> : vector<2x128xf32>
    %801 = tpu.matmul %797, %0, %cst_98 {dimension_numbers = #tpu.dot_dimension_numbers<[1], [0], [0], [1], [0, 0, 1, 1], [], []>} : vector<2x16xf32>, vector<16x128xf32>, vector<2x128xf32> -> vector<2x128xf32>
    %cst_99 = arith.constant dense<0.000000e+00> : vector<2x128xf32>
    %802 = tpu.matmul %800, %1, %cst_99 {dimension_numbers = #tpu.dot_dimension_numbers<[1], [0], [0], [1], [0, 0, 1, 1], [], []>} : vector<2x16xf32>, vector<16x128xf32>, vector<2x128xf32> -> vector<2x128xf32>
    %803 = arith.addf %801, %802 : vector<2x128xf32>
    %804 = arith.mulf %803, %803 : vector<2x128xf32>
    %cst_100 = arith.constant dense<0.000000e+00> : vector<2x128xf32>
    %805 = tpu.matmul %804, %2, %cst_100 {dimension_numbers = #tpu.dot_dimension_numbers<[1], [0], [0], [1], [0, 0, 1, 1], [], []>} : vector<2x128xf32>, vector<128x128xf32>, vector<2x128xf32> -> vector<2x128xf32>
    %806 = vector.broadcast %3 : vector<1x128xf32> to vector<2x128xf32>
    %807 = arith.addf %805, %806 : vector<2x128xf32>
    %808 = math.tanh %807 : vector<2x128xf32>
    %809 = vector.broadcast %17 : vector<1x128xf32> to vector<2x128xf32>
    %810 = arith.mulf %808, %809 : vector<2x128xf32>
    %811 = vector.broadcast %20 : vector<1x128xf32> to vector<2x128xf32>
    %812 = arith.addf %810, %811 : vector<2x128xf32>
    %813 = vector.extract_strided_slice %812 {offsets = [0, 0], sizes = [2, 32], strides = [1, 1]} : vector<2x128xf32> to vector<2x32xf32>
    %814 = vector.extract_strided_slice %812 {offsets = [0, 32], sizes = [2, 32], strides = [1, 1]} : vector<2x128xf32> to vector<2x32xf32>
    %815 = vector.extract_strided_slice %812 {offsets = [0, 64], sizes = [2, 32], strides = [1, 1]} : vector<2x128xf32> to vector<2x32xf32>
    %816 = vector.extract_strided_slice %812 {offsets = [0, 96], sizes = [2, 32], strides = [1, 1]} : vector<2x128xf32> to vector<2x32xf32>
    %817 = arith.mulf %813, %665 : vector<2x32xf32>
    %818 = arith.mulf %814, %815 : vector<2x32xf32>
    %819 = arith.addf %817, %818 : vector<2x32xf32>
    %820 = math.tanh %819 : vector<2x32xf32>
    %821 = arith.mulf %816, %820 : vector<2x32xf32>
    %822 = vector.extract_strided_slice %49 {offsets = [10, 0], sizes = [2, 4], strides = [1, 1]} : vector<16x4xf32> to vector<2x4xf32>
    %cst_101 = arith.constant dense<0.000000e+00> : vector<2x4xf32>
    %823 = tpu.matmul %821, %6, %cst_101 {dimension_numbers = #tpu.dot_dimension_numbers<[1], [0], [0], [1], [0, 0, 1, 1], [], []>} : vector<2x32xf32>, vector<32x4xf32>, vector<2x4xf32> -> vector<2x4xf32>
    %824 = arith.addf %822, %823 : vector<2x4xf32>
    %825 = arith.mulf %824, %824 : vector<2x4xf32>
    %cst_102 = arith.constant 1.000000e+00 : f32
    %826 = vector.broadcast %cst_102 : f32 to vector<2x4xf32>
    %827 = arith.addf %826, %825 : vector<2x4xf32>
    %828 = math.rsqrt %827 : vector<2x4xf32>
    %829 = arith.mulf %824, %828 : vector<2x4xf32>
    %cst_103 = arith.constant 1.000000e+00 : f32
    %830 = vector.broadcast %cst_103 : f32 to vector<2x4xf32>
    %831 = arith.addf %830, %828 : vector<2x4xf32>
    %cst_104 = arith.constant 5.000000e-01 : f32
    %832 = vector.broadcast %cst_104 : f32 to vector<2x4xf32>
    %833 = arith.mulf %831, %832 : vector<2x4xf32>
    %834 = math.rsqrt %833 : vector<2x4xf32>
    %835 = arith.mulf %833, %834 : vector<2x4xf32>
    %cst_105 = arith.constant 5.000000e-01 : f32
    %836 = vector.broadcast %cst_105 : f32 to vector<2x4xf32>
    %837 = arith.mulf %829, %836 : vector<2x4xf32>
    %838 = arith.mulf %837, %834 : vector<2x4xf32>
    %839 = arith.subf %835, %838 : vector<2x4xf32>
    %cst_106 = arith.constant 0.707106769 : f32
    %840 = vector.broadcast %cst_106 : f32 to vector<2x4xf32>
    %841 = arith.mulf %839, %840 : vector<2x4xf32>
    %842 = arith.addf %835, %838 : vector<2x4xf32>
    %cst_107 = arith.constant 0.707106769 : f32
    %843 = vector.broadcast %cst_107 : f32 to vector<2x4xf32>
    %844 = arith.mulf %842, %843 : vector<2x4xf32>
    %845 = arith.mulf %825, %825 : vector<2x4xf32>
    %cst_108 = arith.constant 1.000000e+00 : f32
    %846 = vector.broadcast %cst_108 : f32 to vector<2x4xf32>
    %847 = arith.addf %846, %845 : vector<2x4xf32>
    %848 = math.rsqrt %847 : vector<2x4xf32>
    %849 = arith.mulf %825, %848 : vector<2x4xf32>
    %cst_109 = arith.constant 1.000000e+00 : f32
    %850 = vector.broadcast %cst_109 : f32 to vector<2x4xf32>
    %851 = arith.addf %850, %848 : vector<2x4xf32>
    %cst_110 = arith.constant 5.000000e-01 : f32
    %852 = vector.broadcast %cst_110 : f32 to vector<2x4xf32>
    %853 = arith.mulf %851, %852 : vector<2x4xf32>
    %854 = math.rsqrt %853 : vector<2x4xf32>
    %855 = arith.mulf %853, %854 : vector<2x4xf32>
    %cst_111 = arith.constant 5.000000e-01 : f32
    %856 = vector.broadcast %cst_111 : f32 to vector<2x4xf32>
    %857 = arith.mulf %849, %856 : vector<2x4xf32>
    %858 = arith.mulf %857, %854 : vector<2x4xf32>
    %859 = arith.mulf %855, %841 : vector<2x4xf32>
    %860 = arith.mulf %858, %841 : vector<2x4xf32>
    %cst_112 = arith.constant 0.000000e+00 : f32
    %861 = vector.broadcast %cst_112 : f32 to vector<2x4xf32>
    %862 = arith.subf %861, %860 : vector<2x4xf32>
    %863 = arith.mulf %855, %844 : vector<2x4xf32>
    %864 = arith.mulf %858, %844 : vector<2x4xf32>
    %865 = vector.extract_strided_slice %863 {offsets = [0, 0], sizes = [2, 1], strides = [1, 1]} : vector<2x4xf32> to vector<2x1xf32>
    %866 = vector.extract_strided_slice %859 {offsets = [0, 0], sizes = [2, 1], strides = [1, 1]} : vector<2x4xf32> to vector<2x1xf32>
    %867 = vector.shape_cast %27 : vector<1x16xi1> to vector<1x16xi1>
    %868 = vector.broadcast %867 : vector<1x16xi1> to vector<2x16xi1>
    %869 = vector.shape_cast %865 : vector<2x1xf32> to vector<2x1xf32>
    %870 = vector.broadcast %869 : vector<2x1xf32> to vector<2x16xf32>
    %871 = vector.shape_cast %866 : vector<2x1xf32> to vector<2x1xf32>
    %872 = vector.broadcast %871 : vector<2x1xf32> to vector<2x16xf32>
    %873 = arith.select %868, %870, %872 : vector<2x16xi1>, vector<2x16xf32>
    %874 = vector.extract_strided_slice %863 {offsets = [0, 1], sizes = [2, 1], strides = [1, 1]} : vector<2x4xf32> to vector<2x1xf32>
    %875 = vector.extract_strided_slice %859 {offsets = [0, 1], sizes = [2, 1], strides = [1, 1]} : vector<2x4xf32> to vector<2x1xf32>
    %876 = vector.shape_cast %33 : vector<1x16xi1> to vector<1x16xi1>
    %877 = vector.broadcast %876 : vector<1x16xi1> to vector<2x16xi1>
    %878 = vector.shape_cast %874 : vector<2x1xf32> to vector<2x1xf32>
    %879 = vector.broadcast %878 : vector<2x1xf32> to vector<2x16xf32>
    %880 = vector.shape_cast %875 : vector<2x1xf32> to vector<2x1xf32>
    %881 = vector.broadcast %880 : vector<2x1xf32> to vector<2x16xf32>
    %882 = arith.select %877, %879, %881 : vector<2x16xi1>, vector<2x16xf32>
    %883 = vector.extract_strided_slice %863 {offsets = [0, 2], sizes = [2, 1], strides = [1, 1]} : vector<2x4xf32> to vector<2x1xf32>
    %884 = vector.extract_strided_slice %859 {offsets = [0, 2], sizes = [2, 1], strides = [1, 1]} : vector<2x4xf32> to vector<2x1xf32>
    %885 = vector.shape_cast %39 : vector<1x16xi1> to vector<1x16xi1>
    %886 = vector.broadcast %885 : vector<1x16xi1> to vector<2x16xi1>
    %887 = vector.shape_cast %883 : vector<2x1xf32> to vector<2x1xf32>
    %888 = vector.broadcast %887 : vector<2x1xf32> to vector<2x16xf32>
    %889 = vector.shape_cast %884 : vector<2x1xf32> to vector<2x1xf32>
    %890 = vector.broadcast %889 : vector<2x1xf32> to vector<2x16xf32>
    %891 = arith.select %886, %888, %890 : vector<2x16xi1>, vector<2x16xf32>
    %892 = vector.extract_strided_slice %863 {offsets = [0, 3], sizes = [2, 1], strides = [1, 1]} : vector<2x4xf32> to vector<2x1xf32>
    %893 = vector.extract_strided_slice %859 {offsets = [0, 3], sizes = [2, 1], strides = [1, 1]} : vector<2x4xf32> to vector<2x1xf32>
    %894 = vector.shape_cast %45 : vector<1x16xi1> to vector<1x16xi1>
    %895 = vector.broadcast %894 : vector<1x16xi1> to vector<2x16xi1>
    %896 = vector.shape_cast %892 : vector<2x1xf32> to vector<2x1xf32>
    %897 = vector.broadcast %896 : vector<2x1xf32> to vector<2x16xf32>
    %898 = vector.shape_cast %893 : vector<2x1xf32> to vector<2x1xf32>
    %899 = vector.broadcast %898 : vector<2x1xf32> to vector<2x16xf32>
    %900 = arith.select %895, %897, %899 : vector<2x16xi1>, vector<2x16xf32>
    %901 = vector.extract_strided_slice %864 {offsets = [0, 0], sizes = [2, 1], strides = [1, 1]} : vector<2x4xf32> to vector<2x1xf32>
    %902 = vector.extract_strided_slice %862 {offsets = [0, 0], sizes = [2, 1], strides = [1, 1]} : vector<2x4xf32> to vector<2x1xf32>
    %903 = vector.shape_cast %27 : vector<1x16xi1> to vector<1x16xi1>
    %904 = vector.broadcast %903 : vector<1x16xi1> to vector<2x16xi1>
    %905 = vector.shape_cast %901 : vector<2x1xf32> to vector<2x1xf32>
    %906 = vector.broadcast %905 : vector<2x1xf32> to vector<2x16xf32>
    %907 = vector.shape_cast %902 : vector<2x1xf32> to vector<2x1xf32>
    %908 = vector.broadcast %907 : vector<2x1xf32> to vector<2x16xf32>
    %909 = arith.select %904, %906, %908 : vector<2x16xi1>, vector<2x16xf32>
    %910 = vector.extract_strided_slice %864 {offsets = [0, 1], sizes = [2, 1], strides = [1, 1]} : vector<2x4xf32> to vector<2x1xf32>
    %911 = vector.extract_strided_slice %862 {offsets = [0, 1], sizes = [2, 1], strides = [1, 1]} : vector<2x4xf32> to vector<2x1xf32>
    %912 = vector.shape_cast %33 : vector<1x16xi1> to vector<1x16xi1>
    %913 = vector.broadcast %912 : vector<1x16xi1> to vector<2x16xi1>
    %914 = vector.shape_cast %910 : vector<2x1xf32> to vector<2x1xf32>
    %915 = vector.broadcast %914 : vector<2x1xf32> to vector<2x16xf32>
    %916 = vector.shape_cast %911 : vector<2x1xf32> to vector<2x1xf32>
    %917 = vector.broadcast %916 : vector<2x1xf32> to vector<2x16xf32>
    %918 = arith.select %913, %915, %917 : vector<2x16xi1>, vector<2x16xf32>
    %919 = vector.extract_strided_slice %864 {offsets = [0, 2], sizes = [2, 1], strides = [1, 1]} : vector<2x4xf32> to vector<2x1xf32>
    %920 = vector.extract_strided_slice %862 {offsets = [0, 2], sizes = [2, 1], strides = [1, 1]} : vector<2x4xf32> to vector<2x1xf32>
    %921 = vector.shape_cast %39 : vector<1x16xi1> to vector<1x16xi1>
    %922 = vector.broadcast %921 : vector<1x16xi1> to vector<2x16xi1>
    %923 = vector.shape_cast %919 : vector<2x1xf32> to vector<2x1xf32>
    %924 = vector.broadcast %923 : vector<2x1xf32> to vector<2x16xf32>
    %925 = vector.shape_cast %920 : vector<2x1xf32> to vector<2x1xf32>
    %926 = vector.broadcast %925 : vector<2x1xf32> to vector<2x16xf32>
    %927 = arith.select %922, %924, %926 : vector<2x16xi1>, vector<2x16xf32>
    %928 = vector.extract_strided_slice %864 {offsets = [0, 3], sizes = [2, 1], strides = [1, 1]} : vector<2x4xf32> to vector<2x1xf32>
    %929 = vector.extract_strided_slice %862 {offsets = [0, 3], sizes = [2, 1], strides = [1, 1]} : vector<2x4xf32> to vector<2x1xf32>
    %930 = vector.shape_cast %45 : vector<1x16xi1> to vector<1x16xi1>
    %931 = vector.broadcast %930 : vector<1x16xi1> to vector<2x16xi1>
    %932 = vector.shape_cast %928 : vector<2x1xf32> to vector<2x1xf32>
    %933 = vector.broadcast %932 : vector<2x1xf32> to vector<2x16xf32>
    %934 = vector.shape_cast %929 : vector<2x1xf32> to vector<2x1xf32>
    %935 = vector.broadcast %934 : vector<2x1xf32> to vector<2x16xf32>
    %936 = arith.select %931, %933, %935 : vector<2x16xi1>, vector<2x16xf32>
    %937 = arith.mulf %873, %882 : vector<2x16xf32>
    %938 = arith.mulf %909, %918 : vector<2x16xf32>
    %939 = arith.subf %937, %938 : vector<2x16xf32>
    %940 = arith.mulf %873, %918 : vector<2x16xf32>
    %941 = arith.mulf %909, %882 : vector<2x16xf32>
    %942 = arith.addf %940, %941 : vector<2x16xf32>
    %943 = arith.mulf %891, %900 : vector<2x16xf32>
    %944 = arith.mulf %927, %936 : vector<2x16xf32>
    %945 = arith.subf %943, %944 : vector<2x16xf32>
    %946 = arith.mulf %891, %936 : vector<2x16xf32>
    %947 = arith.mulf %927, %900 : vector<2x16xf32>
    %948 = arith.addf %946, %947 : vector<2x16xf32>
    %949 = arith.mulf %939, %945 : vector<2x16xf32>
    %950 = arith.mulf %942, %948 : vector<2x16xf32>
    %951 = arith.subf %949, %950 : vector<2x16xf32>
    %952 = arith.mulf %939, %948 : vector<2x16xf32>
    %953 = arith.mulf %942, %945 : vector<2x16xf32>
    %954 = arith.addf %952, %953 : vector<2x16xf32>
    %cst_113 = arith.constant dense<0.000000e+00> : vector<2x128xf32>
    %955 = tpu.matmul %951, %0, %cst_113 {dimension_numbers = #tpu.dot_dimension_numbers<[1], [0], [0], [1], [0, 0, 1, 1], [], []>} : vector<2x16xf32>, vector<16x128xf32>, vector<2x128xf32> -> vector<2x128xf32>
    %cst_114 = arith.constant dense<0.000000e+00> : vector<2x128xf32>
    %956 = tpu.matmul %954, %1, %cst_114 {dimension_numbers = #tpu.dot_dimension_numbers<[1], [0], [0], [1], [0, 0, 1, 1], [], []>} : vector<2x16xf32>, vector<16x128xf32>, vector<2x128xf32> -> vector<2x128xf32>
    %957 = arith.addf %955, %956 : vector<2x128xf32>
    %958 = arith.mulf %957, %957 : vector<2x128xf32>
    %cst_115 = arith.constant dense<0.000000e+00> : vector<2x128xf32>
    %959 = tpu.matmul %958, %2, %cst_115 {dimension_numbers = #tpu.dot_dimension_numbers<[1], [0], [0], [1], [0, 0, 1, 1], [], []>} : vector<2x128xf32>, vector<128x128xf32>, vector<2x128xf32> -> vector<2x128xf32>
    %960 = vector.broadcast %3 : vector<1x128xf32> to vector<2x128xf32>
    %961 = arith.addf %959, %960 : vector<2x128xf32>
    %962 = math.tanh %961 : vector<2x128xf32>
    %963 = vector.broadcast %17 : vector<1x128xf32> to vector<2x128xf32>
    %964 = arith.mulf %962, %963 : vector<2x128xf32>
    %965 = vector.broadcast %20 : vector<1x128xf32> to vector<2x128xf32>
    %966 = arith.addf %964, %965 : vector<2x128xf32>
    %967 = vector.extract_strided_slice %966 {offsets = [0, 0], sizes = [2, 32], strides = [1, 1]} : vector<2x128xf32> to vector<2x32xf32>
    %968 = vector.extract_strided_slice %966 {offsets = [0, 32], sizes = [2, 32], strides = [1, 1]} : vector<2x128xf32> to vector<2x32xf32>
    %969 = vector.extract_strided_slice %966 {offsets = [0, 64], sizes = [2, 32], strides = [1, 1]} : vector<2x128xf32> to vector<2x32xf32>
    %970 = vector.extract_strided_slice %966 {offsets = [0, 96], sizes = [2, 32], strides = [1, 1]} : vector<2x128xf32> to vector<2x32xf32>
    %971 = arith.mulf %967, %819 : vector<2x32xf32>
    %972 = arith.mulf %968, %969 : vector<2x32xf32>
    %973 = arith.addf %971, %972 : vector<2x32xf32>
    %974 = math.tanh %973 : vector<2x32xf32>
    %975 = arith.mulf %970, %974 : vector<2x32xf32>
    %976 = vector.extract_strided_slice %49 {offsets = [12, 0], sizes = [2, 4], strides = [1, 1]} : vector<16x4xf32> to vector<2x4xf32>
    %cst_116 = arith.constant dense<0.000000e+00> : vector<2x4xf32>
    %977 = tpu.matmul %975, %6, %cst_116 {dimension_numbers = #tpu.dot_dimension_numbers<[1], [0], [0], [1], [0, 0, 1, 1], [], []>} : vector<2x32xf32>, vector<32x4xf32>, vector<2x4xf32> -> vector<2x4xf32>
    %978 = arith.addf %976, %977 : vector<2x4xf32>
    %979 = arith.mulf %978, %978 : vector<2x4xf32>
    %cst_117 = arith.constant 1.000000e+00 : f32
    %980 = vector.broadcast %cst_117 : f32 to vector<2x4xf32>
    %981 = arith.addf %980, %979 : vector<2x4xf32>
    %982 = math.rsqrt %981 : vector<2x4xf32>
    %983 = arith.mulf %978, %982 : vector<2x4xf32>
    %cst_118 = arith.constant 1.000000e+00 : f32
    %984 = vector.broadcast %cst_118 : f32 to vector<2x4xf32>
    %985 = arith.addf %984, %982 : vector<2x4xf32>
    %cst_119 = arith.constant 5.000000e-01 : f32
    %986 = vector.broadcast %cst_119 : f32 to vector<2x4xf32>
    %987 = arith.mulf %985, %986 : vector<2x4xf32>
    %988 = math.rsqrt %987 : vector<2x4xf32>
    %989 = arith.mulf %987, %988 : vector<2x4xf32>
    %cst_120 = arith.constant 5.000000e-01 : f32
    %990 = vector.broadcast %cst_120 : f32 to vector<2x4xf32>
    %991 = arith.mulf %983, %990 : vector<2x4xf32>
    %992 = arith.mulf %991, %988 : vector<2x4xf32>
    %993 = arith.subf %989, %992 : vector<2x4xf32>
    %cst_121 = arith.constant 0.707106769 : f32
    %994 = vector.broadcast %cst_121 : f32 to vector<2x4xf32>
    %995 = arith.mulf %993, %994 : vector<2x4xf32>
    %996 = arith.addf %989, %992 : vector<2x4xf32>
    %cst_122 = arith.constant 0.707106769 : f32
    %997 = vector.broadcast %cst_122 : f32 to vector<2x4xf32>
    %998 = arith.mulf %996, %997 : vector<2x4xf32>
    %999 = arith.mulf %979, %979 : vector<2x4xf32>
    %cst_123 = arith.constant 1.000000e+00 : f32
    %1000 = vector.broadcast %cst_123 : f32 to vector<2x4xf32>
    %1001 = arith.addf %1000, %999 : vector<2x4xf32>
    %1002 = math.rsqrt %1001 : vector<2x4xf32>
    %1003 = arith.mulf %979, %1002 : vector<2x4xf32>
    %cst_124 = arith.constant 1.000000e+00 : f32
    %1004 = vector.broadcast %cst_124 : f32 to vector<2x4xf32>
    %1005 = arith.addf %1004, %1002 : vector<2x4xf32>
    %cst_125 = arith.constant 5.000000e-01 : f32
    %1006 = vector.broadcast %cst_125 : f32 to vector<2x4xf32>
    %1007 = arith.mulf %1005, %1006 : vector<2x4xf32>
    %1008 = math.rsqrt %1007 : vector<2x4xf32>
    %1009 = arith.mulf %1007, %1008 : vector<2x4xf32>
    %cst_126 = arith.constant 5.000000e-01 : f32
    %1010 = vector.broadcast %cst_126 : f32 to vector<2x4xf32>
    %1011 = arith.mulf %1003, %1010 : vector<2x4xf32>
    %1012 = arith.mulf %1011, %1008 : vector<2x4xf32>
    %1013 = arith.mulf %1009, %995 : vector<2x4xf32>
    %1014 = arith.mulf %1012, %995 : vector<2x4xf32>
    %cst_127 = arith.constant 0.000000e+00 : f32
    %1015 = vector.broadcast %cst_127 : f32 to vector<2x4xf32>
    %1016 = arith.subf %1015, %1014 : vector<2x4xf32>
    %1017 = arith.mulf %1009, %998 : vector<2x4xf32>
    %1018 = arith.mulf %1012, %998 : vector<2x4xf32>
    %1019 = vector.extract_strided_slice %1017 {offsets = [0, 0], sizes = [2, 1], strides = [1, 1]} : vector<2x4xf32> to vector<2x1xf32>
    %1020 = vector.extract_strided_slice %1013 {offsets = [0, 0], sizes = [2, 1], strides = [1, 1]} : vector<2x4xf32> to vector<2x1xf32>
    %1021 = vector.shape_cast %27 : vector<1x16xi1> to vector<1x16xi1>
    %1022 = vector.broadcast %1021 : vector<1x16xi1> to vector<2x16xi1>
    %1023 = vector.shape_cast %1019 : vector<2x1xf32> to vector<2x1xf32>
    %1024 = vector.broadcast %1023 : vector<2x1xf32> to vector<2x16xf32>
    %1025 = vector.shape_cast %1020 : vector<2x1xf32> to vector<2x1xf32>
    %1026 = vector.broadcast %1025 : vector<2x1xf32> to vector<2x16xf32>
    %1027 = arith.select %1022, %1024, %1026 : vector<2x16xi1>, vector<2x16xf32>
    %1028 = vector.extract_strided_slice %1017 {offsets = [0, 1], sizes = [2, 1], strides = [1, 1]} : vector<2x4xf32> to vector<2x1xf32>
    %1029 = vector.extract_strided_slice %1013 {offsets = [0, 1], sizes = [2, 1], strides = [1, 1]} : vector<2x4xf32> to vector<2x1xf32>
    %1030 = vector.shape_cast %33 : vector<1x16xi1> to vector<1x16xi1>
    %1031 = vector.broadcast %1030 : vector<1x16xi1> to vector<2x16xi1>
    %1032 = vector.shape_cast %1028 : vector<2x1xf32> to vector<2x1xf32>
    %1033 = vector.broadcast %1032 : vector<2x1xf32> to vector<2x16xf32>
    %1034 = vector.shape_cast %1029 : vector<2x1xf32> to vector<2x1xf32>
    %1035 = vector.broadcast %1034 : vector<2x1xf32> to vector<2x16xf32>
    %1036 = arith.select %1031, %1033, %1035 : vector<2x16xi1>, vector<2x16xf32>
    %1037 = vector.extract_strided_slice %1017 {offsets = [0, 2], sizes = [2, 1], strides = [1, 1]} : vector<2x4xf32> to vector<2x1xf32>
    %1038 = vector.extract_strided_slice %1013 {offsets = [0, 2], sizes = [2, 1], strides = [1, 1]} : vector<2x4xf32> to vector<2x1xf32>
    %1039 = vector.shape_cast %39 : vector<1x16xi1> to vector<1x16xi1>
    %1040 = vector.broadcast %1039 : vector<1x16xi1> to vector<2x16xi1>
    %1041 = vector.shape_cast %1037 : vector<2x1xf32> to vector<2x1xf32>
    %1042 = vector.broadcast %1041 : vector<2x1xf32> to vector<2x16xf32>
    %1043 = vector.shape_cast %1038 : vector<2x1xf32> to vector<2x1xf32>
    %1044 = vector.broadcast %1043 : vector<2x1xf32> to vector<2x16xf32>
    %1045 = arith.select %1040, %1042, %1044 : vector<2x16xi1>, vector<2x16xf32>
    %1046 = vector.extract_strided_slice %1017 {offsets = [0, 3], sizes = [2, 1], strides = [1, 1]} : vector<2x4xf32> to vector<2x1xf32>
    %1047 = vector.extract_strided_slice %1013 {offsets = [0, 3], sizes = [2, 1], strides = [1, 1]} : vector<2x4xf32> to vector<2x1xf32>
    %1048 = vector.shape_cast %45 : vector<1x16xi1> to vector<1x16xi1>
    %1049 = vector.broadcast %1048 : vector<1x16xi1> to vector<2x16xi1>
    %1050 = vector.shape_cast %1046 : vector<2x1xf32> to vector<2x1xf32>
    %1051 = vector.broadcast %1050 : vector<2x1xf32> to vector<2x16xf32>
    %1052 = vector.shape_cast %1047 : vector<2x1xf32> to vector<2x1xf32>
    %1053 = vector.broadcast %1052 : vector<2x1xf32> to vector<2x16xf32>
    %1054 = arith.select %1049, %1051, %1053 : vector<2x16xi1>, vector<2x16xf32>
    %1055 = vector.extract_strided_slice %1018 {offsets = [0, 0], sizes = [2, 1], strides = [1, 1]} : vector<2x4xf32> to vector<2x1xf32>
    %1056 = vector.extract_strided_slice %1016 {offsets = [0, 0], sizes = [2, 1], strides = [1, 1]} : vector<2x4xf32> to vector<2x1xf32>
    %1057 = vector.shape_cast %27 : vector<1x16xi1> to vector<1x16xi1>
    %1058 = vector.broadcast %1057 : vector<1x16xi1> to vector<2x16xi1>
    %1059 = vector.shape_cast %1055 : vector<2x1xf32> to vector<2x1xf32>
    %1060 = vector.broadcast %1059 : vector<2x1xf32> to vector<2x16xf32>
    %1061 = vector.shape_cast %1056 : vector<2x1xf32> to vector<2x1xf32>
    %1062 = vector.broadcast %1061 : vector<2x1xf32> to vector<2x16xf32>
    %1063 = arith.select %1058, %1060, %1062 : vector<2x16xi1>, vector<2x16xf32>
    %1064 = vector.extract_strided_slice %1018 {offsets = [0, 1], sizes = [2, 1], strides = [1, 1]} : vector<2x4xf32> to vector<2x1xf32>
    %1065 = vector.extract_strided_slice %1016 {offsets = [0, 1], sizes = [2, 1], strides = [1, 1]} : vector<2x4xf32> to vector<2x1xf32>
    %1066 = vector.shape_cast %33 : vector<1x16xi1> to vector<1x16xi1>
    %1067 = vector.broadcast %1066 : vector<1x16xi1> to vector<2x16xi1>
    %1068 = vector.shape_cast %1064 : vector<2x1xf32> to vector<2x1xf32>
    %1069 = vector.broadcast %1068 : vector<2x1xf32> to vector<2x16xf32>
    %1070 = vector.shape_cast %1065 : vector<2x1xf32> to vector<2x1xf32>
    %1071 = vector.broadcast %1070 : vector<2x1xf32> to vector<2x16xf32>
    %1072 = arith.select %1067, %1069, %1071 : vector<2x16xi1>, vector<2x16xf32>
    %1073 = vector.extract_strided_slice %1018 {offsets = [0, 2], sizes = [2, 1], strides = [1, 1]} : vector<2x4xf32> to vector<2x1xf32>
    %1074 = vector.extract_strided_slice %1016 {offsets = [0, 2], sizes = [2, 1], strides = [1, 1]} : vector<2x4xf32> to vector<2x1xf32>
    %1075 = vector.shape_cast %39 : vector<1x16xi1> to vector<1x16xi1>
    %1076 = vector.broadcast %1075 : vector<1x16xi1> to vector<2x16xi1>
    %1077 = vector.shape_cast %1073 : vector<2x1xf32> to vector<2x1xf32>
    %1078 = vector.broadcast %1077 : vector<2x1xf32> to vector<2x16xf32>
    %1079 = vector.shape_cast %1074 : vector<2x1xf32> to vector<2x1xf32>
    %1080 = vector.broadcast %1079 : vector<2x1xf32> to vector<2x16xf32>
    %1081 = arith.select %1076, %1078, %1080 : vector<2x16xi1>, vector<2x16xf32>
    %1082 = vector.extract_strided_slice %1018 {offsets = [0, 3], sizes = [2, 1], strides = [1, 1]} : vector<2x4xf32> to vector<2x1xf32>
    %1083 = vector.extract_strided_slice %1016 {offsets = [0, 3], sizes = [2, 1], strides = [1, 1]} : vector<2x4xf32> to vector<2x1xf32>
    %1084 = vector.shape_cast %45 : vector<1x16xi1> to vector<1x16xi1>
    %1085 = vector.broadcast %1084 : vector<1x16xi1> to vector<2x16xi1>
    %1086 = vector.shape_cast %1082 : vector<2x1xf32> to vector<2x1xf32>
    %1087 = vector.broadcast %1086 : vector<2x1xf32> to vector<2x16xf32>
    %1088 = vector.shape_cast %1083 : vector<2x1xf32> to vector<2x1xf32>
    %1089 = vector.broadcast %1088 : vector<2x1xf32> to vector<2x16xf32>
    %1090 = arith.select %1085, %1087, %1089 : vector<2x16xi1>, vector<2x16xf32>
    %1091 = arith.mulf %1027, %1036 : vector<2x16xf32>
    %1092 = arith.mulf %1063, %1072 : vector<2x16xf32>
    %1093 = arith.subf %1091, %1092 : vector<2x16xf32>
    %1094 = arith.mulf %1027, %1072 : vector<2x16xf32>
    %1095 = arith.mulf %1063, %1036 : vector<2x16xf32>
    %1096 = arith.addf %1094, %1095 : vector<2x16xf32>
    %1097 = arith.mulf %1045, %1054 : vector<2x16xf32>
    %1098 = arith.mulf %1081, %1090 : vector<2x16xf32>
    %1099 = arith.subf %1097, %1098 : vector<2x16xf32>
    %1100 = arith.mulf %1045, %1090 : vector<2x16xf32>
    %1101 = arith.mulf %1081, %1054 : vector<2x16xf32>
    %1102 = arith.addf %1100, %1101 : vector<2x16xf32>
    %1103 = arith.mulf %1093, %1099 : vector<2x16xf32>
    %1104 = arith.mulf %1096, %1102 : vector<2x16xf32>
    %1105 = arith.subf %1103, %1104 : vector<2x16xf32>
    %1106 = arith.mulf %1093, %1102 : vector<2x16xf32>
    %1107 = arith.mulf %1096, %1099 : vector<2x16xf32>
    %1108 = arith.addf %1106, %1107 : vector<2x16xf32>
    %cst_128 = arith.constant dense<0.000000e+00> : vector<2x128xf32>
    %1109 = tpu.matmul %1105, %0, %cst_128 {dimension_numbers = #tpu.dot_dimension_numbers<[1], [0], [0], [1], [0, 0, 1, 1], [], []>} : vector<2x16xf32>, vector<16x128xf32>, vector<2x128xf32> -> vector<2x128xf32>
    %cst_129 = arith.constant dense<0.000000e+00> : vector<2x128xf32>
    %1110 = tpu.matmul %1108, %1, %cst_129 {dimension_numbers = #tpu.dot_dimension_numbers<[1], [0], [0], [1], [0, 0, 1, 1], [], []>} : vector<2x16xf32>, vector<16x128xf32>, vector<2x128xf32> -> vector<2x128xf32>
    %1111 = arith.addf %1109, %1110 : vector<2x128xf32>
    %1112 = arith.mulf %1111, %1111 : vector<2x128xf32>
    %cst_130 = arith.constant dense<0.000000e+00> : vector<2x128xf32>
    %1113 = tpu.matmul %1112, %2, %cst_130 {dimension_numbers = #tpu.dot_dimension_numbers<[1], [0], [0], [1], [0, 0, 1, 1], [], []>} : vector<2x128xf32>, vector<128x128xf32>, vector<2x128xf32> -> vector<2x128xf32>
    %1114 = vector.broadcast %3 : vector<1x128xf32> to vector<2x128xf32>
    %1115 = arith.addf %1113, %1114 : vector<2x128xf32>
    %1116 = math.tanh %1115 : vector<2x128xf32>
    %1117 = vector.broadcast %17 : vector<1x128xf32> to vector<2x128xf32>
    %1118 = arith.mulf %1116, %1117 : vector<2x128xf32>
    %1119 = vector.broadcast %20 : vector<1x128xf32> to vector<2x128xf32>
    %1120 = arith.addf %1118, %1119 : vector<2x128xf32>
    %1121 = vector.extract_strided_slice %1120 {offsets = [0, 0], sizes = [2, 32], strides = [1, 1]} : vector<2x128xf32> to vector<2x32xf32>
    %1122 = vector.extract_strided_slice %1120 {offsets = [0, 32], sizes = [2, 32], strides = [1, 1]} : vector<2x128xf32> to vector<2x32xf32>
    %1123 = vector.extract_strided_slice %1120 {offsets = [0, 64], sizes = [2, 32], strides = [1, 1]} : vector<2x128xf32> to vector<2x32xf32>
    %1124 = vector.extract_strided_slice %1120 {offsets = [0, 96], sizes = [2, 32], strides = [1, 1]} : vector<2x128xf32> to vector<2x32xf32>
    %1125 = arith.mulf %1121, %973 : vector<2x32xf32>
    %1126 = arith.mulf %1122, %1123 : vector<2x32xf32>
    %1127 = arith.addf %1125, %1126 : vector<2x32xf32>
    %1128 = math.tanh %1127 : vector<2x32xf32>
    %1129 = arith.mulf %1124, %1128 : vector<2x32xf32>
    %1130 = vector.extract_strided_slice %49 {offsets = [14, 0], sizes = [2, 4], strides = [1, 1]} : vector<16x4xf32> to vector<2x4xf32>
    %cst_131 = arith.constant dense<0.000000e+00> : vector<2x4xf32>
    %1131 = tpu.matmul %1129, %6, %cst_131 {dimension_numbers = #tpu.dot_dimension_numbers<[1], [0], [0], [1], [0, 0, 1, 1], [], []>} : vector<2x32xf32>, vector<32x4xf32>, vector<2x4xf32> -> vector<2x4xf32>
    %1132 = arith.addf %1130, %1131 : vector<2x4xf32>
    %1133 = arith.mulf %1132, %1132 : vector<2x4xf32>
    %cst_132 = arith.constant 1.000000e+00 : f32
    %1134 = vector.broadcast %cst_132 : f32 to vector<2x4xf32>
    %1135 = arith.addf %1134, %1133 : vector<2x4xf32>
    %1136 = math.rsqrt %1135 : vector<2x4xf32>
    %1137 = arith.mulf %1132, %1136 : vector<2x4xf32>
    %cst_133 = arith.constant 1.000000e+00 : f32
    %1138 = vector.broadcast %cst_133 : f32 to vector<2x4xf32>
    %1139 = arith.addf %1138, %1136 : vector<2x4xf32>
    %cst_134 = arith.constant 5.000000e-01 : f32
    %1140 = vector.broadcast %cst_134 : f32 to vector<2x4xf32>
    %1141 = arith.mulf %1139, %1140 : vector<2x4xf32>
    %1142 = math.rsqrt %1141 : vector<2x4xf32>
    %1143 = arith.mulf %1141, %1142 : vector<2x4xf32>
    %cst_135 = arith.constant 5.000000e-01 : f32
    %1144 = vector.broadcast %cst_135 : f32 to vector<2x4xf32>
    %1145 = arith.mulf %1137, %1144 : vector<2x4xf32>
    %1146 = arith.mulf %1145, %1142 : vector<2x4xf32>
    %1147 = arith.subf %1143, %1146 : vector<2x4xf32>
    %cst_136 = arith.constant 0.707106769 : f32
    %1148 = vector.broadcast %cst_136 : f32 to vector<2x4xf32>
    %1149 = arith.mulf %1147, %1148 : vector<2x4xf32>
    %1150 = arith.addf %1143, %1146 : vector<2x4xf32>
    %cst_137 = arith.constant 0.707106769 : f32
    %1151 = vector.broadcast %cst_137 : f32 to vector<2x4xf32>
    %1152 = arith.mulf %1150, %1151 : vector<2x4xf32>
    %1153 = arith.mulf %1133, %1133 : vector<2x4xf32>
    %cst_138 = arith.constant 1.000000e+00 : f32
    %1154 = vector.broadcast %cst_138 : f32 to vector<2x4xf32>
    %1155 = arith.addf %1154, %1153 : vector<2x4xf32>
    %1156 = math.rsqrt %1155 : vector<2x4xf32>
    %1157 = arith.mulf %1133, %1156 : vector<2x4xf32>
    %cst_139 = arith.constant 1.000000e+00 : f32
    %1158 = vector.broadcast %cst_139 : f32 to vector<2x4xf32>
    %1159 = arith.addf %1158, %1156 : vector<2x4xf32>
    %cst_140 = arith.constant 5.000000e-01 : f32
    %1160 = vector.broadcast %cst_140 : f32 to vector<2x4xf32>
    %1161 = arith.mulf %1159, %1160 : vector<2x4xf32>
    %1162 = math.rsqrt %1161 : vector<2x4xf32>
    %1163 = arith.mulf %1161, %1162 : vector<2x4xf32>
    %cst_141 = arith.constant 5.000000e-01 : f32
    %1164 = vector.broadcast %cst_141 : f32 to vector<2x4xf32>
    %1165 = arith.mulf %1157, %1164 : vector<2x4xf32>
    %1166 = arith.mulf %1165, %1162 : vector<2x4xf32>
    %1167 = arith.mulf %1163, %1149 : vector<2x4xf32>
    %1168 = arith.mulf %1166, %1149 : vector<2x4xf32>
    %cst_142 = arith.constant 0.000000e+00 : f32
    %1169 = vector.broadcast %cst_142 : f32 to vector<2x4xf32>
    %1170 = arith.subf %1169, %1168 : vector<2x4xf32>
    %1171 = arith.mulf %1163, %1152 : vector<2x4xf32>
    %1172 = arith.mulf %1166, %1152 : vector<2x4xf32>
    %1173 = vector.extract_strided_slice %1171 {offsets = [0, 0], sizes = [2, 1], strides = [1, 1]} : vector<2x4xf32> to vector<2x1xf32>
    %1174 = vector.extract_strided_slice %1167 {offsets = [0, 0], sizes = [2, 1], strides = [1, 1]} : vector<2x4xf32> to vector<2x1xf32>
    %1175 = vector.shape_cast %27 : vector<1x16xi1> to vector<1x16xi1>
    %1176 = vector.broadcast %1175 : vector<1x16xi1> to vector<2x16xi1>
    %1177 = vector.shape_cast %1173 : vector<2x1xf32> to vector<2x1xf32>
    %1178 = vector.broadcast %1177 : vector<2x1xf32> to vector<2x16xf32>
    %1179 = vector.shape_cast %1174 : vector<2x1xf32> to vector<2x1xf32>
    %1180 = vector.broadcast %1179 : vector<2x1xf32> to vector<2x16xf32>
    %1181 = arith.select %1176, %1178, %1180 : vector<2x16xi1>, vector<2x16xf32>
    %1182 = vector.extract_strided_slice %1171 {offsets = [0, 1], sizes = [2, 1], strides = [1, 1]} : vector<2x4xf32> to vector<2x1xf32>
    %1183 = vector.extract_strided_slice %1167 {offsets = [0, 1], sizes = [2, 1], strides = [1, 1]} : vector<2x4xf32> to vector<2x1xf32>
    %1184 = vector.shape_cast %33 : vector<1x16xi1> to vector<1x16xi1>
    %1185 = vector.broadcast %1184 : vector<1x16xi1> to vector<2x16xi1>
    %1186 = vector.shape_cast %1182 : vector<2x1xf32> to vector<2x1xf32>
    %1187 = vector.broadcast %1186 : vector<2x1xf32> to vector<2x16xf32>
    %1188 = vector.shape_cast %1183 : vector<2x1xf32> to vector<2x1xf32>
    %1189 = vector.broadcast %1188 : vector<2x1xf32> to vector<2x16xf32>
    %1190 = arith.select %1185, %1187, %1189 : vector<2x16xi1>, vector<2x16xf32>
    %1191 = vector.extract_strided_slice %1171 {offsets = [0, 2], sizes = [2, 1], strides = [1, 1]} : vector<2x4xf32> to vector<2x1xf32>
    %1192 = vector.extract_strided_slice %1167 {offsets = [0, 2], sizes = [2, 1], strides = [1, 1]} : vector<2x4xf32> to vector<2x1xf32>
    %1193 = vector.shape_cast %39 : vector<1x16xi1> to vector<1x16xi1>
    %1194 = vector.broadcast %1193 : vector<1x16xi1> to vector<2x16xi1>
    %1195 = vector.shape_cast %1191 : vector<2x1xf32> to vector<2x1xf32>
    %1196 = vector.broadcast %1195 : vector<2x1xf32> to vector<2x16xf32>
    %1197 = vector.shape_cast %1192 : vector<2x1xf32> to vector<2x1xf32>
    %1198 = vector.broadcast %1197 : vector<2x1xf32> to vector<2x16xf32>
    %1199 = arith.select %1194, %1196, %1198 : vector<2x16xi1>, vector<2x16xf32>
    %1200 = vector.extract_strided_slice %1171 {offsets = [0, 3], sizes = [2, 1], strides = [1, 1]} : vector<2x4xf32> to vector<2x1xf32>
    %1201 = vector.extract_strided_slice %1167 {offsets = [0, 3], sizes = [2, 1], strides = [1, 1]} : vector<2x4xf32> to vector<2x1xf32>
    %1202 = vector.shape_cast %45 : vector<1x16xi1> to vector<1x16xi1>
    %1203 = vector.broadcast %1202 : vector<1x16xi1> to vector<2x16xi1>
    %1204 = vector.shape_cast %1200 : vector<2x1xf32> to vector<2x1xf32>
    %1205 = vector.broadcast %1204 : vector<2x1xf32> to vector<2x16xf32>
    %1206 = vector.shape_cast %1201 : vector<2x1xf32> to vector<2x1xf32>
    %1207 = vector.broadcast %1206 : vector<2x1xf32> to vector<2x16xf32>
    %1208 = arith.select %1203, %1205, %1207 : vector<2x16xi1>, vector<2x16xf32>
    %1209 = vector.extract_strided_slice %1172 {offsets = [0, 0], sizes = [2, 1], strides = [1, 1]} : vector<2x4xf32> to vector<2x1xf32>
    %1210 = vector.extract_strided_slice %1170 {offsets = [0, 0], sizes = [2, 1], strides = [1, 1]} : vector<2x4xf32> to vector<2x1xf32>
    %1211 = vector.shape_cast %27 : vector<1x16xi1> to vector<1x16xi1>
    %1212 = vector.broadcast %1211 : vector<1x16xi1> to vector<2x16xi1>
    %1213 = vector.shape_cast %1209 : vector<2x1xf32> to vector<2x1xf32>
    %1214 = vector.broadcast %1213 : vector<2x1xf32> to vector<2x16xf32>
    %1215 = vector.shape_cast %1210 : vector<2x1xf32> to vector<2x1xf32>
    %1216 = vector.broadcast %1215 : vector<2x1xf32> to vector<2x16xf32>
    %1217 = arith.select %1212, %1214, %1216 : vector<2x16xi1>, vector<2x16xf32>
    %1218 = vector.extract_strided_slice %1172 {offsets = [0, 1], sizes = [2, 1], strides = [1, 1]} : vector<2x4xf32> to vector<2x1xf32>
    %1219 = vector.extract_strided_slice %1170 {offsets = [0, 1], sizes = [2, 1], strides = [1, 1]} : vector<2x4xf32> to vector<2x1xf32>
    %1220 = vector.shape_cast %33 : vector<1x16xi1> to vector<1x16xi1>
    %1221 = vector.broadcast %1220 : vector<1x16xi1> to vector<2x16xi1>
    %1222 = vector.shape_cast %1218 : vector<2x1xf32> to vector<2x1xf32>
    %1223 = vector.broadcast %1222 : vector<2x1xf32> to vector<2x16xf32>
    %1224 = vector.shape_cast %1219 : vector<2x1xf32> to vector<2x1xf32>
    %1225 = vector.broadcast %1224 : vector<2x1xf32> to vector<2x16xf32>
    %1226 = arith.select %1221, %1223, %1225 : vector<2x16xi1>, vector<2x16xf32>
    %1227 = vector.extract_strided_slice %1172 {offsets = [0, 2], sizes = [2, 1], strides = [1, 1]} : vector<2x4xf32> to vector<2x1xf32>
    %1228 = vector.extract_strided_slice %1170 {offsets = [0, 2], sizes = [2, 1], strides = [1, 1]} : vector<2x4xf32> to vector<2x1xf32>
    %1229 = vector.shape_cast %39 : vector<1x16xi1> to vector<1x16xi1>
    %1230 = vector.broadcast %1229 : vector<1x16xi1> to vector<2x16xi1>
    %1231 = vector.shape_cast %1227 : vector<2x1xf32> to vector<2x1xf32>
    %1232 = vector.broadcast %1231 : vector<2x1xf32> to vector<2x16xf32>
    %1233 = vector.shape_cast %1228 : vector<2x1xf32> to vector<2x1xf32>
    %1234 = vector.broadcast %1233 : vector<2x1xf32> to vector<2x16xf32>
    %1235 = arith.select %1230, %1232, %1234 : vector<2x16xi1>, vector<2x16xf32>
    %1236 = vector.extract_strided_slice %1172 {offsets = [0, 3], sizes = [2, 1], strides = [1, 1]} : vector<2x4xf32> to vector<2x1xf32>
    %1237 = vector.extract_strided_slice %1170 {offsets = [0, 3], sizes = [2, 1], strides = [1, 1]} : vector<2x4xf32> to vector<2x1xf32>
    %1238 = vector.shape_cast %45 : vector<1x16xi1> to vector<1x16xi1>
    %1239 = vector.broadcast %1238 : vector<1x16xi1> to vector<2x16xi1>
    %1240 = vector.shape_cast %1236 : vector<2x1xf32> to vector<2x1xf32>
    %1241 = vector.broadcast %1240 : vector<2x1xf32> to vector<2x16xf32>
    %1242 = vector.shape_cast %1237 : vector<2x1xf32> to vector<2x1xf32>
    %1243 = vector.broadcast %1242 : vector<2x1xf32> to vector<2x16xf32>
    %1244 = arith.select %1239, %1241, %1243 : vector<2x16xi1>, vector<2x16xf32>
    %1245 = arith.mulf %1181, %1190 : vector<2x16xf32>
    %1246 = arith.mulf %1217, %1226 : vector<2x16xf32>
    %1247 = arith.subf %1245, %1246 : vector<2x16xf32>
    %1248 = arith.mulf %1181, %1226 : vector<2x16xf32>
    %1249 = arith.mulf %1217, %1190 : vector<2x16xf32>
    %1250 = arith.addf %1248, %1249 : vector<2x16xf32>
    %1251 = arith.mulf %1199, %1208 : vector<2x16xf32>
    %1252 = arith.mulf %1235, %1244 : vector<2x16xf32>
    %1253 = arith.subf %1251, %1252 : vector<2x16xf32>
    %1254 = arith.mulf %1199, %1244 : vector<2x16xf32>
    %1255 = arith.mulf %1235, %1208 : vector<2x16xf32>
    %1256 = arith.addf %1254, %1255 : vector<2x16xf32>
    %1257 = arith.mulf %1247, %1253 : vector<2x16xf32>
    %1258 = arith.mulf %1250, %1256 : vector<2x16xf32>
    %1259 = arith.subf %1257, %1258 : vector<2x16xf32>
    %1260 = arith.mulf %1247, %1256 : vector<2x16xf32>
    %1261 = arith.mulf %1250, %1253 : vector<2x16xf32>
    %1262 = arith.addf %1260, %1261 : vector<2x16xf32>
    %cst_143 = arith.constant dense<0.000000e+00> : vector<2x128xf32>
    %1263 = tpu.matmul %1259, %0, %cst_143 {dimension_numbers = #tpu.dot_dimension_numbers<[1], [0], [0], [1], [0, 0, 1, 1], [], []>} : vector<2x16xf32>, vector<16x128xf32>, vector<2x128xf32> -> vector<2x128xf32>
    %cst_144 = arith.constant dense<0.000000e+00> : vector<2x128xf32>
    %1264 = tpu.matmul %1262, %1, %cst_144 {dimension_numbers = #tpu.dot_dimension_numbers<[1], [0], [0], [1], [0, 0, 1, 1], [], []>} : vector<2x16xf32>, vector<16x128xf32>, vector<2x128xf32> -> vector<2x128xf32>
    %1265 = arith.addf %1263, %1264 : vector<2x128xf32>
    %1266 = arith.mulf %1265, %1265 : vector<2x128xf32>
    %cst_145 = arith.constant dense<0.000000e+00> : vector<2x128xf32>
    %1267 = tpu.matmul %1266, %2, %cst_145 {dimension_numbers = #tpu.dot_dimension_numbers<[1], [0], [0], [1], [0, 0, 1, 1], [], []>} : vector<2x128xf32>, vector<128x128xf32>, vector<2x128xf32> -> vector<2x128xf32>
    %1268 = vector.broadcast %3 : vector<1x128xf32> to vector<2x128xf32>
    %1269 = arith.addf %1267, %1268 : vector<2x128xf32>
    %1270 = math.tanh %1269 : vector<2x128xf32>
    %1271 = vector.broadcast %17 : vector<1x128xf32> to vector<2x128xf32>
    %1272 = arith.mulf %1270, %1271 : vector<2x128xf32>
    %1273 = vector.broadcast %20 : vector<1x128xf32> to vector<2x128xf32>
    %1274 = arith.addf %1272, %1273 : vector<2x128xf32>
    %1275 = vector.extract_strided_slice %1274 {offsets = [0, 0], sizes = [2, 32], strides = [1, 1]} : vector<2x128xf32> to vector<2x32xf32>
    %1276 = vector.extract_strided_slice %1274 {offsets = [0, 32], sizes = [2, 32], strides = [1, 1]} : vector<2x128xf32> to vector<2x32xf32>
    %1277 = vector.extract_strided_slice %1274 {offsets = [0, 64], sizes = [2, 32], strides = [1, 1]} : vector<2x128xf32> to vector<2x32xf32>
    %1278 = vector.extract_strided_slice %1274 {offsets = [0, 96], sizes = [2, 32], strides = [1, 1]} : vector<2x128xf32> to vector<2x32xf32>
    %1279 = arith.mulf %1275, %1127 : vector<2x32xf32>
    %1280 = arith.mulf %1276, %1277 : vector<2x32xf32>
    %1281 = arith.addf %1279, %1280 : vector<2x32xf32>
    %1282 = math.tanh %1281 : vector<2x32xf32>
    %1283 = arith.mulf %1278, %1282 : vector<2x32xf32>
    %1284 = vector.broadcast %4 : vector<1x32xf32> to vector<2x32xf32>
    %1285 = arith.mulf %1283, %1284 : vector<2x32xf32>
    %cst_146 = arith.constant dense<0.000000e+00> : vector<2xf32>
    %1286 = vector.multi_reduction <add>, %1285, %cst_146 [1] : vector<2x32xf32> to vector<2xf32>
    %1287 = vector.shape_cast %1286 : vector<2xf32> to vector<2x1xf32>
    %1288 = vector.broadcast %5 : vector<1x1xf32> to vector<2x1xf32>
    %1289 = arith.addf %1287, %1288 : vector<2x1xf32>
    %c0_147 = arith.constant 0 : index
    %c0_148 = arith.constant 0 : index
    %1290 = vector.load %arg2[%c0_147, %c0_148] : memref<2x1xf32, #tpu.memory_space<vmem>>, vector<2x1xf32>
    tpu.vector_store %arg2[%c0_147, %c0_148], %1289 {strides = array<i32>} : memref<2x1xf32, #tpu.memory_space<vmem>>, vector<2x1xf32>,
    return
  }
}

</mosaic_0001>

<bundles_post_ra>
// kernel: tpu_custom_call.1
= control target key start
LH: loop header
LB: loop body
LE: loop exit
PB: predicated region body
PF: predicated region fallthrough
CT: control target
= control target key end

     0   :  { %7 = vsyncpa [#allocation3], 0  ;;  %s5008_s9 = smov [#allocation2]   ;;  %s5726_s0 = inlined_call_operand.vmem [shape: f32[16,8], index: 0, kind: input, shape index: {}]   ;;  %s5727_s1 = inlined_call_operand.hbm [shape: f32[208,128], index: 1, kind: input, shape index: {}]   ;;  %s5728_s2 = inlined_call_operand.vmem [shape: f32[2,1], index: 2, kind: output, shape index: {}]  }
   0x1   :  { %s15_s10 = sshll.u32 %s5008_s9, 4  ;;  %s4984_s13 = scalar_lea.hbm %s5727_s1, 3328  ;;  %s16_s10 = int_to_ptr.vmem [resolvable:$true] %s15_s10 }
   0x2   :  { %p4985_p0 = scmp.ne.s32.totalorder %s5727_s1, %s4984_s13  ;;  %p4988_p1 = scmp.lt.u32.totalorder %s4984_s13, %s5727_s1 }
   0x4   :  { %p4990_p2 = pnand %p4988_p1, %p4985_p0 }
   0x6   :  { %4993 = shalt.err (!%p4990_p2)
}
   0x7   :  { %s4994_s18 = scalar_lea.vmem %s16_s10, 3328  ;;  %p4999_p4 = scmp.lt.s32.totalorder %s16_s10, %s16_s10 }
   0x8   :  { %p4995_p3 = scmp.ne.s32.totalorder %s16_s10, %s4994_s18  ;;  %p5000_p5 = scmp.lt.s32.totalorder %s4994_s18, %s4994_s18 }
   0xa   :  { %p5001_p6 = por %p5000_p5, %p4999_p4 }
   0xc   :  { %p5002_p7 = pnand %p5001_p6, %p4995_p3 }
   0xe   :  { %5005 = shalt.err (!%p5002_p7)
}
   0xf   :  { %s5009_s19 = smov 128   ;;  %s5010_s20 = smov 8  }
  0x10   :  { %21 = dma.hbm_to_vmem [thread:$0]  %s5727_s1, 3328, %s16_s10, [#allocation3], %s5009_s19, %s5009_s19, %s5010_s20  }
  0x11   :  { %5006 = dma.done.wait [#allocation3], 3328  }
  0x12   :  { %5007 = vsyncadd [#allocation3], 4294963968  ;;  %v5011_v0 = vmov 0.0|0.0   ;;  %vm5012_vm0 = vmmov 0   ;;  %v5013_v1 = vmov 0.0   ;;  %vm77_vm1 = vcmask 64512  }
  0x13   :  { %4458 = vmatprep.subr.bf16.mxu1 %v5011_v0  ;;  %3986 = vmatprep.mubr.msk.f32.mxu1 %vm5012_vm0, %v5013_v1  ;;  %v47_v2 = vld [vmem:[#allocation2 + $0xa2] sm:$0xff]  ;;  %v48_v3 = vld [vmem:[#allocation2 + $0xaa] sm:$0xff]  ;;  %v49_v8 = vld [vmem:[#allocation2 + $0xb2] sm:$0xff]  ;;  %v5014_v11 = vmov 1   ;;  %v5015_v12 = vmov 0   ;;  %v5016_v44 = vmov 2  }
  0x14   :  { %v51_v4 = vld [vmem:[#allocation2 + $0xc2] sm:$0xff]  ;;  %v5051_v5 = vpack.c.bf16 %v48_v3, %v47_v2  ;;  %v50_v9 = vld [vmem:[#allocation2 + $0xba] sm:$0xff]  ;;  %4776 = vset.pattern.permute.xlu1 %v5014_v11  ;;  %4775 = vset.pattern.permute.xlu0 %v5015_v12  ;;  %v3718_v13 = vld [vmem:[#allocation2 + $0xca] ss:$0 sm:$0xff]  ;;  %v5017_v47 = vmov 3   ;;  %vm365_vm6 = vcmask 130048  }
  0x15   :  { %3973 = vmatprep.subr.mxu0 %v51_v4  ;;  %v71_v6 = vld [vmem:[%s5726_s0] sm:$0xff]  ;;  %v72_v7 = vld [vmem:[%s5726_s0 + $0x8] sm:$0xff]  ;;  %v5060_v10 = vpack.c.bf16 %v50_v9, %v49_v8  ;;  %v27_v52 = vld [vmem:[#allocation2 + $0x10] sm:$0xff]  ;;  %s5019_s0 = smov 96   ;;  %s5020_s26 = smov 32   ;;  %vm159_vm10 = vcmask 261120  }
  0x16   :  { %3974 = vmatpush3.msra.mxu0 %v51_v4  ;;  %3975 = vmatprep.mubr.msk.f32.mxu0 %vm77_vm1, %v71_v6  ;;  %v28_v53 = vld [vmem:[#allocation2 + $0x18] sm:$0xff]  ;;  %v29_v55 = vld [vmem:[#allocation2 + $0x20] sm:$0xff]  ;;  %v30_v56 = vld [vmem:[#allocation2 + $0x28] sm:$0xff]  ;;  %vm3702_vm11 = vcmask 254976   ;;  %vm3711_vm12 = vcmask 1024  }
  0x17   :  { %4460 = vmatpush3.bf16.msra.mxu1 %v5051_v5  ;;  %3976 = vmatmul.mubr.msk.f32.vlgmr.msra.gmra.mrb[0].mxu0 %vm77_vm1, %v72_v7  ;;  %v5090_v54 = vpack.c.bf16 %v28_v53, %v27_v52  ;;  %v31_v57 = vld [vmem:[#allocation2 + $0x30] sm:$0xff]  ;;  %v5095_v58 = vpack.c.bf16 %v30_v56, %v29_v55  ;;  %v32_v59 = vld [vmem:[#allocation2 + $0x38] sm:$0xff]  ;;  %v33_v61 = vld [vmem:[#allocation2 + $0x40] sm:$0xff] }
  0x18   :  { %4461 = vmatprep.subr.bf16.mxu1 %v5011_v0  ;;  %4464 = vmatprep.subr.bf16.mxu0 %v5011_v0  ;;  %v5098_v60 = vpack.c.bf16 %v32_v59, %v31_v57  ;;  %v34_v62 = vld [vmem:[#allocation2 + $0x48] sm:$0xff]  ;;  %v35_v2 = vld [vmem:[#allocation2 + $0x50] sm:$0xff]  ;;  %v36_v3 = vld [vmem:[#allocation2 + $0x58] sm:$0xff] }
  0x19   :  { %3993 = vmatprep.mubr.msk.f32.mxu0 %vm5012_vm0, %v5013_v1  ;;  %4466 = vmatpush3.bf16.msra.mxu0 %v5090_v54  ;;  %v5102_v63 = vpack.c.bf16 %v34_v62, %v33_v61  ;;  %v5106_v4 = vpack.c.bf16 %v36_v3, %v35_v2  ;;  %v37_v6 = vld [vmem:[#allocation2 + $0x60] sm:$0xff]  ;;  %v38_v7 = vld [vmem:[#allocation2 + $0x68] sm:$0xff]  ;;  %v39_v9 = vld [vmem:[#allocation2 + $0x70] sm:$0xff] }
  0x1a   :  { %4467 = vmatprep.subr.bf16.mxu0 %v5011_v0  ;;  %v5110_v8 = vpack.c.bf16 %v38_v7, %v37_v6 }
  0x1b   :  { %4463 = vmatpush3.bf16.msra.mxu1 %v5060_v10 }
  0x1c   :  { %4470 = vmatprep.subr.bf16.mxu1 %v5011_v0 }
  0x1e   :  { %3987 = vmatmul.mubr.f32.vlgmr.msra.gmra.mrb[0].mxu1 %v5013_v1 }
  0x1f   :  { %4035 = vmatprep.mubr.msk.f32.mxu1 %vm5012_vm0, %v5013_v1  ;;  %4472 = vmatpush3.bf16.msra.mxu1 %v5095_v58 }
  0x20   :  { %4473 = vmatprep.subr.bf16.mxu1 %v5011_v0 }
  0x23   :  { %4475 = vmatpush3.bf16.msra.mxu1 %v5098_v60 }
  0x24   :  { %4476 = vmatprep.subr.bf16.mxu1 %v5011_v0 }
  0x27   :  { %4478 = vmatpush3.bf16.msra.mxu1 %v5102_v63 }
  0x28   :  { %4479 = vmatprep.subr.bf16.mxu1 %v5011_v0 }
  0x2b   :  { %4481 = vmatpush3.bf16.msra.mxu1 %v5106_v4 }
  0x2c   :  { %4482 = vmatprep.subr.bf16.mxu1 %v5011_v0 }
  0x2f   :  { %4484 = vmatpush3.bf16.msra.mxu1 %v5110_v8 }
  0x30   :  { %4485 = vmatprep.subr.bf16.mxu1 %v5011_v0 }
  0xea   :  { %v3977_v14 = vpop.f32.mrb[0].mxu0 }
  0xeb   :  { %v5073_v15 = vadd.f32 %v3977_v14, %v3718_v13  ;;  %v150_v16 = vpop.f32.mrb[1].mxu0 }
  0xec   :  { %v5075_v17 = vadd.f32 %v3718_v13, %v150_v16  ;;  %v40_v13 = vld [vmem:[#allocation2 + $0x78] sm:$0xff]  ;;  %v41_v16 = vld [vmem:[#allocation2 + $0x80] sm:$0xff] }
  0xed   :  { %v5114_v14 = vpack.c.bf16 %v40_v13, %v39_v9 }
  0xef   :  { %4487 = vmatpush3.bf16.msra.mxu1 %v5114_v14 }
  0xf0   :  { %4488 = vmatprep.subr.bf16.mxu1 %v5011_v0 }
  0xf1   :  { %v229_v18 = vpop.f32.mrb[0].mxu1 }
  0xf2   :  { %v233_v19 = vadd.f32 %v229_v18, %v5075_v17  ;;  %v3988_v20 = vpop.f32.mrb[1].mxu1  ;;  %v42_v18 = vld [vmem:[#allocation2 + $0x88] sm:$0xff] }
  0xf4   :  { %v234_v21 = vmul.f32 %v233_v19, %v233_v19 }
  0xf6   :  { %v235_v22 = vadd.f32 1.0, %v234_v21  ;;  %v248_v23 = vmul.f32 %v234_v21, %v234_v21 }
  0xf8   :  { %4886 = vrsqrt.f32 %v235_v22  ;;  %v249_v24 = vadd.f32 1.0, %v248_v23 }
  0xfa   :  { %4888 = vrsqrt.f32 %v249_v24 }
 0x102   :  { %v4887_v25 = vpop.eup %4886 }
 0x103   :  { %v238_v26 = vadd.f32 1.0, %v4887_v25  ;;  %v237_v31 = vmul.f32 %v4887_v25, %v233_v19  ;;  %v5118_v19 = vpack.c.bf16 %v42_v18, %v41_v16 }
 0x104   :  { %v4889_v27 = vpop.eup %4888 }
 0x105   :  { %v239_v28 = vmul.f32 0.5, %v238_v26  ;;  %v252_v29 = vadd.f32 1.0, %v4889_v27  ;;  %v242_v32 = vmul.f32 0.5, %v237_v31  ;;  %v251_v45 = vmul.f32 %v4889_v27, %v234_v21  ;;  %4490 = vmatpush3.bf16.msra.mxu1 %v5118_v19 }
 0x106   :  { %4491 = vmatprep.subr.bf16.mxu1 %v5011_v0 }
 0x107   :  { %4890 = vrsqrt.f32 %v239_v28  ;;  %v253_v30 = vmul.f32 0.5, %v252_v29  ;;  %v256_v46 = vmul.f32 0.5, %v251_v45 }
 0x109   :  { %4892 = vrsqrt.f32 %v253_v30 }
 0x111   :  { %v4891_v33 = vpop.eup %4890 }
 0x112   :  { %v241_v34 = vmul.f32 %v4891_v33, %v239_v28  ;;  %v243_v35 = vmul.f32 %v4891_v33, %v242_v32  ;;  %v53_v28 = vlaneseq }
 0x113   :  { %v4893_v36 = vpop.eup %4892 }
 0x114   :  { %v244_v37 = vsub.f32 %v241_v34, %v243_v35  ;;  %v246_v38 = vadd.f32 %v243_v35, %v241_v34  ;;  %v255_v40 = vmul.f32 %v4893_v36, %v253_v30  ;;  %v257_v48 = vmul.f32 %v4893_v36, %v256_v46 }
 0x115   :  { %v5123_v30 = vand.u32 127, %v53_v28 }
 0x116   :  { %v247_v39 = vmul.f32 0.70710677, %v246_v38  ;;  %v245_v41 = vmul.f32 0.70710677, %v244_v37 }
 0x117   :  { %v63_v33 = vshra.s32 %v5123_v30, 2  ;;  %v60_v34 = vshra.s32 %v5123_v30, 3  ;;  %v66_v35 = vshra.s32 %v5123_v30, 1  ;;  %vm55_vm7 = vcmp.ge.s32.totalorder %v5123_v30, 64 }
 0x118   :  { %v261_v42 = vmul.f32 %v255_v40, %v247_v39  ;;  %v258_v43 = vmul.f32 %v255_v40, %v245_v41  ;;  %v262_v49 = vmul.f32 %v257_v48, %v247_v39  ;;  %v259_v50 = vmul.f32 %v257_v48, %v245_v41 }
 0x119   :  { %v5128_v37 = vand.u32 1, %v63_v33  ;;  %v5130_v38 = vand.u32 1, %v60_v34  ;;  %v69_v39 = vand.u32 1, %v5123_v30  ;;  %v5133_v41 = vand.u32 1, %v66_v35 }
 0x11a   :  { %279 = vperm.xlu1 %4776, %v261_v42   ;;  %267 = vperm.xlu0 %4775, %v261_v42   ;;  %v260_v51 = vsub.f32 0.0, %v259_v50  ;;  %vm56_vm8 = vcmp.lt.s32.totalorder %v5123_v30, 96 }
 0x11b   :  { %vm65_vm2 = vcmp.eq.s32.totalorder %v5128_v37, 1  ;;  %vm62_vm3 = vcmp.eq.s32.totalorder %v5130_v38, 1  ;;  %vm5137_vm4 = vcmp.eq.s32.totalorder %v69_v39, 1  ;;  %vm68_vm5 = vcmp.eq.s32.totalorder %v5133_v41, 1  ;;  %vm57_vm9 = vmand %vm55_vm7, %vm56_vm8 }
 0x11e   :  { %283 = vperm.xlu1 %4776, %v258_v43   ;;  %272 = vperm.xlu0 %4775, %v258_v43  }
 0x122   :  { %4778 = vset.pattern.permute.xlu1 %v5016_v44  ;;  %4777 = vset.pattern.permute.xlu0 %v5016_v44 }
 0x123   :  { %294 = vperm.xlu1 %4778, %v258_v43   ;;  %290 = vperm.xlu0 %4777, %v261_v42  }
 0x127   :  { %4779 = vset.pattern.permute.xlu1 %v5017_v47  ;;  %4780 = vset.pattern.permute.xlu0 %v5017_v47 }
 0x128   :  { %301 = vperm.xlu1 %4779, %v261_v42   ;;  %305 = vperm.xlu0 %4780, %v258_v43  }
 0x12c   :  { %4781 = vset.pattern.permute.xlu1 %v5015_v12  ;;  %4782 = vset.pattern.permute.xlu0 %v5014_v11 }
 0x12d   :  { %311 = vperm.xlu1 %4781, %v262_v49   ;;  %321 = vperm.xlu0 %4782, %v262_v49  }
 0x131   :  { %4783 = vset.pattern.permute.xlu1 %v5016_v44  ;;  %4786 = vset.pattern.permute.xlu0 %v5016_v44 }
 0x132   :  { %330 = vperm.xlu1 %4783, %v262_v49   ;;  %334 = vperm.xlu0 %4786, %v260_v51  }
 0x136   :  { %4784 = vset.pattern.permute.xlu1 %v5015_v12  ;;  %4788 = vset.pattern.permute.xlu0 %v5015_v12 }
 0x137   :  { %316 = vperm.xlu1 %4784, %v260_v51  }
 0x13b   :  { %4785 = vset.pattern.permute.xlu1 %v5014_v11 }
 0x13c   :  { %325 = vperm.xlu1 %4785, %v260_v51  }
 0x140   :  { %4787 = vset.pattern.permute.xlu1 %v5017_v47 }
 0x141   :  { %339 = vperm.xlu1 %4787, %v262_v49  }
 0x145   :  { %343 = vperm.xlu1 %4787, %v260_v51  }
 0x149   :  { %4789 = vset.pattern.permute.xlu1 %v5015_v12 }
 0x199   :  { %v280_v20 = vpop.permute.xlu1 %279  ;;  %v268_v22 = vpop.permute.xlu0 %267 }
 0x19d   :  { %v284_v21 = vpop.permute.xlu1 %283  ;;  %v273_v25 = vpop.permute.xlu0 %272 }
 0x19e   :  { %v286_v48 = vsel %vm65_vm2, %v280_v20, %v284_v21  ;;  %v275_v49 = vsel %vm62_vm3, %v268_v22, %v273_v25  ;;  %v25_v20 = vld [vmem:[#allocation2] sm:$0xff]  ;;  %v26_v21 = vld [vmem:[#allocation2 + $0x8] sm:$0xff] }
 0x19f   :  { %v347_v59 = vmul.f32 %v286_v48, %v275_v49 }
 0x1a2   :  { %v295_v23 = vpop.permute.xlu1 %294  ;;  %v291_v27 = vpop.permute.xlu0 %290 }
 0x1a3   :  { %v297_v53 = vsel %vm68_vm5, %v291_v27, %v295_v23 }
 0x1a7   :  { %v302_v24 = vpop.permute.xlu1 %301  ;;  %v306_v31 = vpop.permute.xlu0 %305 }
 0x1a8   :  { %v308_v50 = vsel %vm5137_vm4, %v302_v24, %v306_v31  ;;  %v5158_v24 = vpack.c.bf16 %v26_v21, %v25_v20  ;;  %v44_v31 = vld [vmem:[#allocation2 + $0x98] sm:$0xff] }
 0x1a9   :  { %v353_v61 = vmul.f32 %v308_v50, %v297_v53 }
 0x1ac   :  { %v312_v26 = vpop.permute.xlu1 %311  ;;  %v322_v36 = vpop.permute.xlu0 %321 }
 0x1b1   :  { %v331_v29 = vpop.permute.xlu1 %330  ;;  %v335_v43 = vpop.permute.xlu0 %334 }
 0x1b2   :  { %v337_v51 = vsel %vm68_vm5, %v331_v29, %v335_v43  ;;  %v43_v29 = vld [vmem:[#allocation2 + $0x90] sm:$0xff] }
 0x1b3   :  { %v357_v2 = vmul.f32 %v337_v51, %v308_v50 }
 0x1b6   :  { %v317_v32 = vpop.permute.xlu1 %316 }
 0x1b7   :  { %v319_v52 = vsel %vm62_vm3, %v312_v26, %v317_v32  ;;  %v5170_v32 = vpack.c.bf16 %v44_v31, %v43_v29 }
 0x1b8   :  { %v351_v3 = vmul.f32 %v319_v52, %v286_v48 }
 0x1b9   :  { %4493 = vmatpush3.bf16.msra.mxu1 %v5170_v32 }
 0x1ba   :  { %4494 = vmatprep.subr.bf16.mxu1 %v5011_v0 }
 0x1bb   :  { %v326_v40 = vpop.permute.xlu1 %325 }
 0x1bc   :  { %v328_v46 = vsel %vm65_vm2, %v322_v36, %v326_v40  ;;  %v5180_v36 = vld [vmem:[#allocation2 + $0xa0] ss:$0 sm:$0xff] }
 0x1bd   :  { %v348_v55 = vmul.f32 %v328_v46, %v319_v52  ;;  %v350_v56 = vmul.f32 %v328_v46, %v275_v49 }
 0x1bf   :  { %v349_v9 = vsub.f32 %v347_v59, %v348_v55  ;;  %v352_v13 = vadd.f32 %v351_v3, %v350_v56 }
 0x1c0   :  { %v340_v45 = vpop.permute.xlu1 %339 }
 0x1c4   :  { %v344_v57 = vpop.permute.xlu1 %343 }
 0x1c5   :  { %v346_v62 = vsel %vm5137_vm4, %v340_v45, %v344_v57  ;;  %v5018_v45 = vmov 0.5  }
 0x1c6   :  { %v354_v6 = vmul.f32 %v346_v62, %v337_v51  ;;  %v356_v7 = vmul.f32 %v346_v62, %v297_v53  ;;  %v5185_v46 = vsel %vm57_vm9, 1.0, %v5018_v45  ;;  %v5187_v49 = vsel %vm57_vm9, 0.0, %v5018_v45 }
 0x1c8   :  { %v355_v16 = vsub.f32 %v353_v61, %v354_v6  ;;  %v358_v18 = vadd.f32 %v357_v2, %v356_v7 }
 0x1ca   :  { %v362_v22 = vmul.f32 %v358_v18, %v349_v9  ;;  %v363_v23 = vmul.f32 %v355_v16, %v352_v13  ;;  %v359_v26 = vmul.f32 %v355_v16, %v349_v9  ;;  %v360_v27 = vmul.f32 %v358_v18, %v352_v13 }
 0x1cc   :  { %v364_v25 = vadd.f32 %v363_v23, %v362_v22  ;;  %v361_v28 = vsub.f32 %v359_v26, %v360_v27 }
 0x1ce   :  { %3994 = vmatmul.mubr.msk.f32.vlgmr.msra.gmra.mrb[2].mxu0 %vm365_vm6, %v364_v25 }
 0x1cf   :  { %4469 = vmatpush3.bf16.msra.mxu0 %v5158_v24  ;;  %4000 = vmatprep.mubr.msk.f32.mxu0 %vm5012_vm0, %v5013_v1 }
 0x1d0   :  { %4500 = vmatprep.subr.bf16.mxu0 %v5011_v0 }
 0x1d6   :  { %4001 = vmatmul.mubr.msk.f32.vlgmr.msra.gmra.mrb[2].mxu0 %vm365_vm6, %v361_v28 }
 0x1d7   :  { %4502 = vmatpush3.bf16.msra.mxu0 %v5090_v54  ;;  %4053 = vmatprep.mubr.msk.f32.mxu0 %vm5012_vm0, %v5013_v1 }
 0x1d8   :  { %4503 = vmatprep.subr.bf16.mxu0 %v5011_v0 }
 0x2a9   :  { %v508_v33 = vpop.f32.mrb[2].mxu0 }
 0x2aa   :  { %v512_v34 = vmul.f32 %v508_v33, %v508_v33  ;;  %v4002_v35 = vpop.f32.mrb[3].mxu0 }
 0x2ac   :  { %4036 = vmatmul.mubr.f32.vlgmr.msra.gmra.mrb[2].mxu1 %v512_v34 }
 0x2ad   :  { %4496 = vmatpush3.bf16.msra.mxu1 %v5051_v5  ;;  %4046 = vmatprep.mubr.msk.f32.mxu1 %vm5012_vm0, %v5013_v1 }
 0x2ae   :  { %4497 = vmatprep.subr.bf16.mxu1 %v5011_v0 }
 0x2b1   :  { %4499 = vmatpush3.bf16.msra.mxu1 %v5060_v10 }
 0x2b2   :  { %4530 = vmatprep.subr.bf16.mxu1 %v5011_v0 }
 0x37f   :  { %v583_v39 = vpop.f32.mrb[2].mxu1 }
 0x380   :  { %v584_v40 = vadd.f32 %v5180_v36, %v583_v39  ;;  %v4037_v43 = vpop.f32.mrb[3].mxu1 }
 0x382   :  { %4894 = vtanh.f32 %v584_v40 }
 0x38c   :  { %v4895_v48 = vpop.eup %4894 }
 0x38d   :  { %v588_v50 = vmul.f32 %v4895_v48, %v5185_v46 }
 0x38f   :  { %v589_v51 = vadd.f32 %v588_v50, %v5187_v49 }
 0x391   :  { %592 = vrot.lane.b32.xlu0 %v589_v51, %s5019_s0  ;;  %v590_v55 = vmul.f32 0.0, %v589_v51 }
 0x403   :  { %v593_v52 = vpop.permute.xlu0 %592 }
 0x404   :  { %v595_v53 = vmul.f32 %v593_v52, %v589_v51 }
 0x406   :  { %597 = vrot.lane.b32.xlu1 %v595_v53, %s5019_s0 }
 0x478   :  { %v598_v30 = vpop.permute.xlu1 %597 }
 0x479   :  { %v5193_v56 = vadd.f32 %v598_v30, %v590_v55 }
 0x47b   :  { %4896 = vtanh.f32 %v5193_v56 }
 0x485   :  { %v4897_v57 = vpop.eup %4896 }
 0x486   :  { %603 = vrot.lane.b32.xlu0 %v4897_v57, %s5019_s0 }
 0x4f8   :  { %v604_v59 = vpop.permute.xlu0 %603 }
 0x4f9   :  { %v606_v61 = vmul.f32 %v604_v59, %v589_v51 }
 0x4fb   :  { %608 = vrot.lane.b32.xlu1 %v606_v61, %s5020_s26 }
 0x56d   :  { %v609_v62 = vpop.permute.xlu1 %608 }
 0x56e   :  { %4047 = vmatmul.mubr.msk.f32.vlgmr.msra.gmra.mrb[4].mxu1 %vm159_vm10, %v609_v62 }
 0x56f   :  { %4532 = vmatpush3.bf16.msra.mxu1 %v5051_v5  ;;  %4106 = vmatprep.mubr.msk.f32.mxu1 %vm5012_vm0, %v5013_v1 }
 0x570   :  { %4533 = vmatprep.subr.bf16.mxu1 %v5011_v0 }
 0x573   :  { %4535 = vmatpush3.bf16.msra.mxu1 %v5060_v10 }
 0x574   :  { %4536 = vmatprep.subr.bf16.mxu1 %v5011_v0 }
 0x641   :  { %v678_v2 = vpop.f32.mrb[4].mxu1 }
 0x642   :  { %v683_v3 = vrot.slane %v678_v2, 6  ;;  %v4048_v6 = vpop.f32.mrb[5].mxu1 }
 0x644   :  { %v685_v7 = vadd.f32 %v683_v3, %v5075_v17 }
 0x646   :  { %v686_v9 = vmul.f32 %v685_v7, %v685_v7 }
 0x648   :  { %v687_v13 = vadd.f32 1.0, %v686_v9  ;;  %v700_v16 = vmul.f32 %v686_v9, %v686_v9 }
 0x64a   :  { %4898 = vrsqrt.f32 %v687_v13  ;;  %v701_v18 = vadd.f32 1.0, %v700_v16 }
 0x64c   :  { %4900 = vrsqrt.f32 %v701_v18 }
 0x654   :  { %v4899_v20 = vpop.eup %4898 }
 0x655   :  { %v690_v21 = vadd.f32 1.0, %v4899_v20  ;;  %v689_v27 = vmul.f32 %v4899_v20, %v685_v7 }
 0x656   :  { %v4901_v22 = vpop.eup %4900 }
 0x657   :  { %v691_v23 = vmul.f32 0.5, %v690_v21  ;;  %v704_v25 = vadd.f32 1.0, %v4901_v22  ;;  %v694_v28 = vmul.f32 0.5, %v689_v27  ;;  %v703_v51 = vmul.f32 %v4901_v22, %v686_v9 }
 0x659   :  { %4902 = vrsqrt.f32 %v691_v23  ;;  %v705_v26 = vmul.f32 0.5, %v704_v25  ;;  %v708_v52 = vmul.f32 0.5, %v703_v51 }
 0x65b   :  { %4904 = vrsqrt.f32 %v705_v26 }
 0x663   :  { %v4903_v29 = vpop.eup %4902 }
 0x664   :  { %v693_v31 = vmul.f32 %v4903_v29, %v691_v23  ;;  %v695_v33 = vmul.f32 %v4903_v29, %v694_v28 }
 0x665   :  { %v4905_v34 = vpop.eup %4904 }
 0x666   :  { %v696_v35 = vsub.f32 %v693_v31, %v695_v33  ;;  %v698_v39 = vadd.f32 %v695_v33, %v693_v31  ;;  %v707_v43 = vmul.f32 %v4905_v34, %v705_v26  ;;  %v709_v53 = vmul.f32 %v4905_v34, %v708_v52 }
 0x668   :  { %v699_v40 = vmul.f32 0.70710677, %v698_v39  ;;  %v697_v45 = vmul.f32 0.70710677, %v696_v35 }
 0x66a   :  { %v713_v48 = vmul.f32 %v707_v43, %v699_v40  ;;  %v710_v50 = vmul.f32 %v707_v43, %v697_v45  ;;  %v714_v55 = vmul.f32 %v709_v53, %v699_v40  ;;  %v711_v30 = vmul.f32 %v709_v53, %v697_v45 }
 0x66c   :  { %717 = vperm.xlu0 %4788, %v713_v48   ;;  %722 = vperm.xlu1 %4789, %v710_v50   ;;  %v712_v57 = vsub.f32 0.0, %v711_v30 }
 0x670   :  { %4791 = vset.pattern.permute.xlu0 %v5014_v11  ;;  %4790 = vset.pattern.permute.xlu1 %v5014_v11 }
 0x671   :  { %731 = vperm.xlu0 %4791, %v710_v50   ;;  %727 = vperm.xlu1 %4790, %v713_v48  }
 0x675   :  { %4793 = vset.pattern.permute.xlu0 %v5017_v47  ;;  %4792 = vset.pattern.permute.xlu1 %v5016_v44 }
 0x676   :  { %745 = vperm.xlu0 %4793, %v713_v48   ;;  %736 = vperm.xlu1 %4792, %v713_v48  }
 0x67a   :  { %4797 = vset.pattern.permute.xlu0 %v5016_v44  ;;  %740 = vperm.xlu1 %4792, %v710_v50  }
 0x67b   :  { %774 = vperm.xlu0 %4797, %v714_v55  }
 0x67e   :  { %4794 = vset.pattern.permute.xlu1 %v5017_v47 }
 0x67f   :  { %4798 = vset.pattern.permute.xlu0 %v5015_v12  ;;  %749 = vperm.xlu1 %4794, %v710_v50  }
 0x680   :  { %760 = vperm.xlu0 %4798, %v712_v57  }
 0x683   :  { %4795 = vset.pattern.permute.xlu1 %v5015_v12 }
 0x684   :  { %4801 = vset.pattern.permute.xlu0 %v5017_v47  ;;  %755 = vperm.xlu1 %4795, %v714_v55  }
 0x685   :  { %787 = vperm.xlu0 %4801, %v712_v57  }
 0x688   :  { %4796 = vset.pattern.permute.xlu1 %v5014_v11 }
 0x689   :  { %765 = vperm.xlu1 %4796, %v714_v55   ;;  %4802 = vset.pattern.permute.xlu0 %v5015_v12 }
 0x68d   :  { %769 = vperm.xlu1 %4796, %v712_v57  }
 0x691   :  { %4799 = vset.pattern.permute.xlu1 %v5016_v44 }
 0x692   :  { %778 = vperm.xlu1 %4799, %v712_v57  }
 0x696   :  { %4800 = vset.pattern.permute.xlu1 %v5017_v47 }
 0x697   :  { %783 = vperm.xlu1 %4800, %v714_v55  }
 0x69b   :  { %4803 = vset.pattern.permute.xlu1 %v5015_v12 }
 0x6eb   :  { %v723_v59 = vpop.permute.xlu1 %722  ;;  %v718_v2 = vpop.permute.xlu0 %717 }
 0x6ec   :  { %v725_v27 = vsel %vm62_vm3, %v718_v2, %v723_v59 }
 0x6f0   :  { %v728_v61 = vpop.permute.xlu1 %727  ;;  %v732_v6 = vpop.permute.xlu0 %731 }
 0x6f1   :  { %v734_v25 = vsel %vm65_vm2, %v728_v61, %v732_v6 }
 0x6f2   :  { %v791_v40 = vmul.f32 %v734_v25, %v725_v27 }
 0x6f5   :  { %v737_v62 = vpop.permute.xlu1 %736  ;;  %v746_v13 = vpop.permute.xlu0 %745 }
 0x6f9   :  { %v741_v3 = vpop.permute.xlu1 %740 }
 0x6fa   :  { %v775_v18 = vpop.permute.xlu0 %774  ;;  %v743_v31 = vsel %vm68_vm5, %v737_v62, %v741_v3 }
 0x6fe   :  { %v750_v7 = vpop.permute.xlu1 %749 }
 0x6ff   :  { %v761_v21 = vpop.permute.xlu0 %760  ;;  %v752_v26 = vsel %vm5137_vm4, %v746_v13, %v750_v7 }
 0x700   :  { %v797_v43 = vmul.f32 %v752_v26, %v743_v31 }
 0x703   :  { %v756_v9 = vpop.permute.xlu1 %755 }
 0x704   :  { %v763_v28 = vsel %vm62_vm3, %v756_v9, %v761_v21  ;;  %v788_v33 = vpop.permute.xlu0 %787 }
 0x705   :  { %v795_v48 = vmul.f32 %v763_v28, %v734_v25 }
 0x708   :  { %v766_v16 = vpop.permute.xlu1 %765 }
 0x70c   :  { %v770_v20 = vpop.permute.xlu1 %769 }
 0x70d   :  { %v772_v23 = vsel %vm65_vm2, %v766_v16, %v770_v20 }
 0x70e   :  { %v792_v34 = vmul.f32 %v772_v23, %v763_v28  ;;  %v794_v35 = vmul.f32 %v772_v23, %v725_v27 }
 0x710   :  { %v793_v53 = vsub.f32 %v791_v40, %v792_v34  ;;  %v796_v55 = vadd.f32 %v795_v48, %v794_v35 }
 0x711   :  { %v779_v22 = vpop.permute.xlu1 %778 }
 0x712   :  { %v781_v29 = vsel %vm68_vm5, %v775_v18, %v779_v22 }
 0x713   :  { %v801_v50 = vmul.f32 %v781_v29, %v752_v26 }
 0x716   :  { %v784_v39 = vpop.permute.xlu1 %783 }
 0x717   :  { %v790_v45 = vsel %vm5137_vm4, %v784_v39, %v788_v33 }
 0x718   :  { %v798_v51 = vmul.f32 %v790_v45, %v781_v29  ;;  %v800_v52 = vmul.f32 %v790_v45, %v743_v31 }
 0x71a   :  { %v799_v30 = vsub.f32 %v797_v43, %v798_v51  ;;  %v802_v57 = vadd.f32 %v801_v50, %v800_v52 }
 0x71c   :  { %v806_v59 = vmul.f32 %v802_v57, %v793_v53  ;;  %v807_v61 = vmul.f32 %v799_v30, %v796_v55  ;;  %v803_v2 = vmul.f32 %v799_v30, %v793_v53  ;;  %v804_v3 = vmul.f32 %v802_v57, %v796_v55 }
 0x71e   :  { %v808_v62 = vadd.f32 %v807_v61, %v806_v59  ;;  %v805_v7 = vsub.f32 %v803_v2, %v804_v3 }
 0x720   :  { %v810_v6 = vrot.slane %v808_v62, 2  ;;  %v884_v9 = vrot.slane %v805_v7, 2 }
 0x722   :  { %4054 = vmatmul.mubr.msk.f32.vlgmr.msra.gmra.mrb[4].mxu0 %vm365_vm6, %v810_v6 }
 0x723   :  { %4505 = vmatpush3.bf16.msra.mxu0 %v5158_v24  ;;  %4060 = vmatprep.mubr.msk.f32.mxu0 %vm5012_vm0, %v5013_v1 }
 0x724   :  { %4506 = vmatprep.subr.bf16.mxu0 %v5011_v0 }
 0x72a   :  { %4061 = vmatmul.mubr.msk.f32.vlgmr.msra.gmra.mrb[4].mxu0 %vm365_vm6, %v884_v9 }
 0x72b   :  { %4508 = vmatpush3.bf16.msra.mxu0 %v5095_v58  ;;  %4095 = vmatprep.mubr.msk.f32.mxu0 %vm5012_vm0, %v5013_v1 }
 0x72c   :  { %4509 = vmatprep.subr.bf16.mxu0 %v5011_v0 }
 0x72f   :  { %4511 = vmatpush3.bf16.msra.mxu0 %v5098_v60 }
 0x730   :  { %4512 = vmatprep.subr.bf16.mxu0 %v5011_v0 }
 0x733   :  { %4514 = vmatpush3.bf16.msra.mxu0 %v5102_v63 }
 0x734   :  { %4515 = vmatprep.subr.bf16.mxu0 %v5011_v0 }
 0x737   :  { %4517 = vmatpush3.bf16.msra.mxu0 %v5106_v4 }
 0x738   :  { %4518 = vmatprep.subr.bf16.mxu0 %v5011_v0 }
 0x73b   :  { %4520 = vmatpush3.bf16.msra.mxu0 %v5110_v8 }
 0x73c   :  { %4521 = vmatprep.subr.bf16.mxu0 %v5011_v0 }
 0x73f   :  { %4523 = vmatpush3.bf16.msra.mxu0 %v5114_v14 }
 0x740   :  { %4524 = vmatprep.subr.bf16.mxu0 %v5011_v0 }
 0x743   :  { %4526 = vmatpush3.bf16.msra.mxu0 %v5118_v19 }
 0x744   :  { %4527 = vmatprep.subr.bf16.mxu0 %v5011_v0 }
 0x747   :  { %4529 = vmatpush3.bf16.msra.mxu0 %v5170_v32 }
 0x748   :  { %4566 = vmatprep.subr.bf16.mxu0 %v5011_v0 }
 0x7fd   :  { %v953_v13 = vpop.f32.mrb[4].mxu0 }
 0x7fe   :  { %v957_v16 = vmul.f32 %v953_v13, %v953_v13  ;;  %v4062_v18 = vpop.f32.mrb[5].mxu0 }
 0x800   :  { %4096 = vmatmul.mubr.f32.vlgmr.msra.gmra.mrb[6].mxu0 %v957_v16 }
 0x801   :  { %4568 = vmatpush3.bf16.msra.mxu0 %v5051_v5  ;;  %4166 = vmatprep.mubr.msk.f32.mxu0 %vm5012_vm0, %v5013_v1 }
 0x802   :  { %4569 = vmatprep.subr.bf16.mxu0 %v5011_v0 }
 0x805   :  { %4571 = vmatpush3.bf16.msra.mxu0 %v5060_v10 }
 0x806   :  { %4572 = vmatprep.subr.bf16.mxu0 %v5011_v0 }
 0x8d3   :  { %v1024_v20 = vpop.f32.mrb[6].mxu0 }
 0x8d4   :  { %v1025_v21 = vadd.f32 %v5180_v36, %v1024_v20  ;;  %v4097_v22 = vpop.f32.mrb[7].mxu0 }
 0x8d6   :  { %4906 = vtanh.f32 %v1025_v21 }
 0x8e0   :  { %v4907_v23 = vpop.eup %4906 }
 0x8e1   :  { %v1029_v25 = vmul.f32 %v4907_v23, %v5185_v46 }
 0x8e3   :  { %v1030_v26 = vadd.f32 %v1029_v25, %v5187_v49 }
 0x8e5   :  { %1033 = vrot.lane.b32.xlu1 %v1030_v26, %s5019_s0  ;;  %v1031_v29 = vmul.f32 %v1030_v26, %v5193_v56 }
 0x957   :  { %v1034_v27 = vpop.permute.xlu1 %1033 }
 0x958   :  { %v1036_v28 = vmul.f32 %v1034_v27, %v1030_v26 }
 0x95a   :  { %1038 = vrot.lane.b32.xlu1 %v1036_v28, %s5019_s0 }
 0x9cc   :  { %v1039_v31 = vpop.permute.xlu1 %1038 }
 0x9cd   :  { %v5272_v33 = vadd.f32 %v1039_v31, %v1031_v29 }
 0x9cf   :  { %4908 = vtanh.f32 %v5272_v33 }
 0x9d9   :  { %v4909_v34 = vpop.eup %4908 }
 0x9da   :  { %1044 = vrot.lane.b32.xlu0 %v4909_v34, %s5019_s0 }
 0xa4c   :  { %v1045_v35 = vpop.permute.xlu0 %1044 }
 0xa4d   :  { %v1047_v39 = vmul.f32 %v1045_v35, %v1030_v26 }
 0xa4f   :  { %1049 = vrot.lane.b32.xlu1 %v1047_v39, %s5020_s26 }
 0xac1   :  { %v1050_v40 = vpop.permute.xlu1 %1049 }
 0xac2   :  { %4107 = vmatmul.mubr.msk.f32.vlgmr.msra.gmra.mrb[6].mxu1 %vm159_vm10, %v1050_v40 }
 0xac3   :  { %4538 = vmatpush3.bf16.msra.mxu1 %v5090_v54  ;;  %4113 = vmatprep.mubr.msk.f32.mxu1 %vm5012_vm0, %v5013_v1 }
 0xac4   :  { %4539 = vmatprep.subr.bf16.mxu1 %v5011_v0 }
 0xb95   :  { %v1119_v56 = vpop.f32.mrb[6].mxu1 }
 0xb96   :  { %v1124_v43 = vrot.slane %v1119_v56, 4  ;;  %v4108_v45 = vpop.f32.mrb[7].mxu1 }
 0xb98   :  { %v1126_v48 = vadd.f32 %v1124_v43, %v5075_v17 }
 0xb9a   :  { %v1127_v50 = vmul.f32 %v1126_v48, %v1126_v48 }
 0xb9c   :  { %v1128_v51 = vadd.f32 1.0, %v1127_v50  ;;  %v1141_v52 = vmul.f32 %v1127_v50, %v1127_v50 }
 0xb9e   :  { %4910 = vrsqrt.f32 %v1128_v51  ;;  %v1142_v53 = vadd.f32 1.0, %v1141_v52 }
 0xba0   :  { %4912 = vrsqrt.f32 %v1142_v53 }
 0xba8   :  { %v4911_v55 = vpop.eup %4910 }
 0xba9   :  { %v1131_v30 = vadd.f32 1.0, %v4911_v55  ;;  %v1130_v2 = vmul.f32 %v4911_v55, %v1126_v48 }
 0xbaa   :  { %v4913_v57 = vpop.eup %4912 }
 0xbab   :  { %v1132_v59 = vmul.f32 0.5, %v1131_v30  ;;  %v1145_v61 = vadd.f32 1.0, %v4913_v57  ;;  %v1135_v3 = vmul.f32 0.5, %v1130_v2  ;;  %v1144_v26 = vmul.f32 %v4913_v57, %v1127_v50 }
 0xbad   :  { %4914 = vrsqrt.f32 %v1132_v59  ;;  %v1146_v62 = vmul.f32 0.5, %v1145_v61  ;;  %v1149_v27 = vmul.f32 0.5, %v1144_v26 }
 0xbaf   :  { %4916 = vrsqrt.f32 %v1146_v62 }
 0xbb7   :  { %v4915_v6 = vpop.eup %4914 }
 0xbb8   :  { %v1134_v7 = vmul.f32 %v4915_v6, %v1132_v59  ;;  %v1136_v9 = vmul.f32 %v4915_v6, %v1135_v3 }
 0xbb9   :  { %v4917_v13 = vpop.eup %4916 }
 0xbba   :  { %v1137_v16 = vsub.f32 %v1134_v7, %v1136_v9  ;;  %v1139_v18 = vadd.f32 %v1136_v9, %v1134_v7  ;;  %v1148_v21 = vmul.f32 %v4917_v13, %v1146_v62  ;;  %v1150_v28 = vmul.f32 %v4917_v13, %v1149_v27 }
 0xbbc   :  { %v1140_v20 = vmul.f32 0.70710677, %v1139_v18  ;;  %v1138_v22 = vmul.f32 0.70710677, %v1137_v16 }
 0xbbe   :  { %v1154_v23 = vmul.f32 %v1148_v21, %v1140_v20  ;;  %v1151_v25 = vmul.f32 %v1148_v21, %v1138_v22  ;;  %v1155_v29 = vmul.f32 %v1150_v28, %v1140_v20  ;;  %v1152_v31 = vmul.f32 %v1150_v28, %v1138_v22 }
 0xbc0   :  { %1158 = vperm.xlu0 %4802, %v1154_v23   ;;  %1163 = vperm.xlu1 %4803, %v1151_v25   ;;  %v1153_v34 = vsub.f32 0.0, %v1152_v31 }
 0xbc4   :  { %4805 = vset.pattern.permute.xlu0 %v5014_v11  ;;  %4804 = vset.pattern.permute.xlu1 %v5014_v11 }
 0xbc5   :  { %1172 = vperm.xlu0 %4805, %v1151_v25   ;;  %1168 = vperm.xlu1 %4804, %v1154_v23  }
 0xbc9   :  { %4807 = vset.pattern.permute.xlu0 %v5017_v47  ;;  %4806 = vset.pattern.permute.xlu1 %v5016_v44 }
 0xbca   :  { %1186 = vperm.xlu0 %4807, %v1154_v23   ;;  %1177 = vperm.xlu1 %4806, %v1154_v23  }
 0xbce   :  { %4811 = vset.pattern.permute.xlu0 %v5016_v44  ;;  %1181 = vperm.xlu1 %4806, %v1151_v25  }
 0xbcf   :  { %1215 = vperm.xlu0 %4811, %v1155_v29  }
 0xbd2   :  { %4808 = vset.pattern.permute.xlu1 %v5017_v47 }
 0xbd3   :  { %4812 = vset.pattern.permute.xlu0 %v5015_v12  ;;  %1190 = vperm.xlu1 %4808, %v1151_v25  }
 0xbd4   :  { %1201 = vperm.xlu0 %4812, %v1153_v34  }
 0xbd7   :  { %4809 = vset.pattern.permute.xlu1 %v5015_v12 }
 0xbd8   :  { %4815 = vset.pattern.permute.xlu0 %v5017_v47  ;;  %1196 = vperm.xlu1 %4809, %v1155_v29  }
 0xbd9   :  { %1228 = vperm.xlu0 %4815, %v1153_v34  }
 0xbdc   :  { %4810 = vset.pattern.permute.xlu1 %v5014_v11 }
 0xbdd   :  { %1206 = vperm.xlu1 %4810, %v1155_v29   ;;  %4816 = vset.pattern.permute.xlu0 %v5015_v12 }
 0xbe1   :  { %1210 = vperm.xlu1 %4810, %v1153_v34  }
 0xbe5   :  { %4813 = vset.pattern.permute.xlu1 %v5016_v44 }
 0xbe6   :  { %1219 = vperm.xlu1 %4813, %v1153_v34  }
 0xbea   :  { %4814 = vset.pattern.permute.xlu1 %v5017_v47 }
 0xbeb   :  { %1224 = vperm.xlu1 %4814, %v1155_v29  }
 0xbef   :  { %4817 = vset.pattern.permute.xlu1 %v5015_v12 }
 0xc3f   :  { %v1164_v35 = vpop.permute.xlu1 %1163  ;;  %v1159_v56 = vpop.permute.xlu0 %1158 }
 0xc40   :  { %v1166_v2 = vsel %vm62_vm3, %v1159_v56, %v1164_v35 }
 0xc44   :  { %v1169_v39 = vpop.permute.xlu1 %1168  ;;  %v1173_v45 = vpop.permute.xlu0 %1172 }
 0xc45   :  { %v1175_v61 = vsel %vm65_vm2, %v1169_v39, %v1173_v45 }
 0xc46   :  { %v1232_v20 = vmul.f32 %v1175_v61, %v1166_v2 }
 0xc49   :  { %v1178_v40 = vpop.permute.xlu1 %1177  ;;  %v1187_v51 = vpop.permute.xlu0 %1186 }
 0xc4d   :  { %v1182_v43 = vpop.permute.xlu1 %1181 }
 0xc4e   :  { %v1216_v53 = vpop.permute.xlu0 %1215  ;;  %v1184_v7 = vsel %vm68_vm5, %v1178_v40, %v1182_v43 }
 0xc52   :  { %v1191_v48 = vpop.permute.xlu1 %1190 }
 0xc53   :  { %v1202_v30 = vpop.permute.xlu0 %1201  ;;  %v1193_v62 = vsel %vm5137_vm4, %v1187_v51, %v1191_v48 }
 0xc54   :  { %v1238_v21 = vmul.f32 %v1193_v62, %v1184_v7 }
 0xc57   :  { %v1197_v50 = vpop.permute.xlu1 %1196 }
 0xc58   :  { %v1204_v3 = vsel %vm62_vm3, %v1197_v50, %v1202_v30  ;;  %v1229_v9 = vpop.permute.xlu0 %1228 }
 0xc59   :  { %v1236_v23 = vmul.f32 %v1204_v3, %v1175_v61 }
 0xc5c   :  { %v1207_v52 = vpop.permute.xlu1 %1206 }
 0xc60   :  { %v1211_v55 = vpop.permute.xlu1 %1210 }
 0xc61   :  { %v1213_v59 = vsel %vm65_vm2, %v1207_v52, %v1211_v55 }
 0xc62   :  { %v1233_v13 = vmul.f32 %v1213_v59, %v1204_v3  ;;  %v1235_v16 = vmul.f32 %v1213_v59, %v1166_v2 }
 0xc64   :  { %v1234_v28 = vsub.f32 %v1232_v20, %v1233_v13  ;;  %v1237_v29 = vadd.f32 %v1236_v23, %v1235_v16 }
 0xc65   :  { %v1220_v57 = vpop.permute.xlu1 %1219 }
 0xc66   :  { %v1222_v6 = vsel %vm68_vm5, %v1216_v53, %v1220_v57 }
 0xc67   :  { %v1242_v25 = vmul.f32 %v1222_v6, %v1193_v62 }
 0xc6a   :  { %v1225_v18 = vpop.permute.xlu1 %1224 }
 0xc6b   :  { %v1231_v22 = vsel %vm5137_vm4, %v1225_v18, %v1229_v9 }
 0xc6c   :  { %v1239_v26 = vmul.f32 %v1231_v22, %v1222_v6  ;;  %v1241_v27 = vmul.f32 %v1231_v22, %v1184_v7 }
 0xc6e   :  { %v1240_v31 = vsub.f32 %v1238_v21, %v1239_v26  ;;  %v1243_v34 = vadd.f32 %v1242_v25, %v1241_v27 }
 0xc70   :  { %v1247_v35 = vmul.f32 %v1243_v34, %v1234_v28  ;;  %v1248_v39 = vmul.f32 %v1240_v31, %v1237_v29  ;;  %v1244_v56 = vmul.f32 %v1240_v31, %v1234_v28  ;;  %v1245_v43 = vmul.f32 %v1243_v34, %v1237_v29 }
 0xc72   :  { %v1249_v40 = vadd.f32 %v1248_v39, %v1247_v35  ;;  %v1246_v48 = vsub.f32 %v1244_v56, %v1245_v43 }
 0xc74   :  { %v1251_v45 = vrot.slane %v1249_v40, 4  ;;  %v1325_v50 = vrot.slane %v1246_v48, 4 }
 0xc76   :  { %4114 = vmatmul.mubr.msk.f32.vlgmr.msra.gmra.mrb[8].mxu1 %vm365_vm6, %v1251_v45 }
 0xc77   :  { %4541 = vmatpush3.bf16.msra.mxu1 %v5158_v24  ;;  %4120 = vmatprep.mubr.msk.f32.mxu1 %vm5012_vm0, %v5013_v1 }
 0xc78   :  { %4542 = vmatprep.subr.bf16.mxu1 %v5011_v0 }
 0xc7e   :  { %4121 = vmatmul.mubr.msk.f32.vlgmr.msra.gmra.mrb[8].mxu1 %vm365_vm6, %v1325_v50 }
 0xc7f   :  { %4544 = vmatpush3.bf16.msra.mxu1 %v5095_v58  ;;  %4155 = vmatprep.mubr.msk.f32.mxu1 %vm5012_vm0, %v5013_v1 }
 0xc80   :  { %4545 = vmatprep.subr.bf16.mxu1 %v5011_v0 }
 0xc83   :  { %4547 = vmatpush3.bf16.msra.mxu1 %v5098_v60 }
 0xc84   :  { %4548 = vmatprep.subr.bf16.mxu1 %v5011_v0 }
 0xc87   :  { %4550 = vmatpush3.bf16.msra.mxu1 %v5102_v63 }
 0xc88   :  { %4551 = vmatprep.subr.bf16.mxu1 %v5011_v0 }
 0xc8b   :  { %4553 = vmatpush3.bf16.msra.mxu1 %v5106_v4 }
 0xc8c   :  { %4554 = vmatprep.subr.bf16.mxu1 %v5011_v0 }
 0xc8f   :  { %4556 = vmatpush3.bf16.msra.mxu1 %v5110_v8 }
 0xc90   :  { %4557 = vmatprep.subr.bf16.mxu1 %v5011_v0 }
 0xc93   :  { %4559 = vmatpush3.bf16.msra.mxu1 %v5114_v14 }
 0xc94   :  { %4560 = vmatprep.subr.bf16.mxu1 %v5011_v0 }
 0xc97   :  { %4562 = vmatpush3.bf16.msra.mxu1 %v5118_v19 }
 0xc98   :  { %4563 = vmatprep.subr.bf16.mxu1 %v5011_v0 }
 0xc9b   :  { %4565 = vmatpush3.bf16.msra.mxu1 %v5170_v32 }
 0xc9c   :  { %4602 = vmatprep.subr.bf16.mxu1 %v5011_v0 }
 0xd51   :  { %v1394_v51 = vpop.f32.mrb[8].mxu1 }
 0xd52   :  { %v1398_v52 = vmul.f32 %v1394_v51, %v1394_v51  ;;  %v4122_v53 = vpop.f32.mrb[9].mxu1 }
 0xd54   :  { %4156 = vmatmul.mubr.f32.vlgmr.msra.gmra.mrb[10].mxu1 %v1398_v52 }
 0xd55   :  { %4604 = vmatpush3.bf16.msra.mxu1 %v5051_v5  ;;  %4226 = vmatprep.mubr.msk.f32.mxu1 %vm5012_vm0, %v5013_v1 }
 0xd56   :  { %4605 = vmatprep.subr.bf16.mxu1 %v5011_v0 }
 0xd59   :  { %4607 = vmatpush3.bf16.msra.mxu1 %v5060_v10 }
 0xd5a   :  { %4608 = vmatprep.subr.bf16.mxu1 %v5011_v0 }
 0xe27   :  { %v1465_v55 = vpop.f32.mrb[10].mxu1 }
 0xe28   :  { %v1466_v30 = vadd.f32 %v5180_v36, %v1465_v55  ;;  %v4157_v57 = vpop.f32.mrb[11].mxu1 }
 0xe2a   :  { %4918 = vtanh.f32 %v1466_v30 }
 0xe34   :  { %v4919_v59 = vpop.eup %4918 }
 0xe35   :  { %v1470_v61 = vmul.f32 %v4919_v59, %v5185_v46 }
 0xe37   :  { %v1471_v62 = vadd.f32 %v1470_v61, %v5187_v49 }
 0xe39   :  { %1474 = vrot.lane.b32.xlu1 %v1471_v62, %s5019_s0  ;;  %v1472_v6 = vmul.f32 %v1471_v62, %v5272_v33 }
 0xeab   :  { %v1475_v2 = vpop.permute.xlu1 %1474 }
 0xeac   :  { %v1477_v3 = vmul.f32 %v1475_v2, %v1471_v62 }
 0xeae   :  { %1479 = vrot.lane.b32.xlu1 %v1477_v3, %s5019_s0 }
 0xf20   :  { %v1480_v7 = vpop.permute.xlu1 %1479 }
 0xf21   :  { %v5349_v9 = vadd.f32 %v1480_v7, %v1472_v6 }
 0xf23   :  { %4920 = vtanh.f32 %v5349_v9 }
 0xf2d   :  { %v4921_v36 = vpop.eup %4920 }
 0xf2e   :  { %1485 = vrot.lane.b32.xlu0 %v4921_v36, %s5019_s0 }
 0xfa0   :  { %v1486_v13 = vpop.permute.xlu0 %1485 }
 0xfa1   :  { %v1488_v16 = vmul.f32 %v1486_v13, %v1471_v62 }
 0xfa3   :  { %1490 = vrot.lane.b32.xlu1 %v1488_v16, %s5020_s26 }
0x1015   :  { %v1491_v18 = vpop.permute.xlu1 %1490 }
0x1016   :  { %4167 = vmatmul.mubr.msk.f32.vlgmr.msra.gmra.mrb[8].mxu0 %vm159_vm10, %v1491_v18 }
0x1017   :  { %4574 = vmatpush3.bf16.msra.mxu0 %v5090_v54  ;;  %4173 = vmatprep.mubr.msk.f32.mxu0 %vm5012_vm0, %v5013_v1 }
0x1018   :  { %4575 = vmatprep.subr.bf16.mxu0 %v5011_v0 }
0x10e9   :  { %v1560_v33 = vpop.f32.mrb[8].mxu0 }
0x10ea   :  { %v1565_v20 = vrot.slane %v1560_v33, 2  ;;  %v4168_v21 = vpop.f32.mrb[9].mxu0 }
0x10ec   :  { %v1567_v22 = vadd.f32 %v1565_v20, %v5075_v17 }
0x10ee   :  { %v1568_v23 = vmul.f32 %v1567_v22, %v1567_v22 }
0x10f0   :  { %v1569_v25 = vadd.f32 1.0, %v1568_v23  ;;  %v1582_v26 = vmul.f32 %v1568_v23, %v1568_v23 }
0x10f2   :  { %4922 = vrsqrt.f32 %v1569_v25  ;;  %v1583_v27 = vadd.f32 1.0, %v1582_v26 }
0x10f4   :  { %4924 = vrsqrt.f32 %v1583_v27 }
0x10fc   :  { %v4923_v28 = vpop.eup %4922 }
0x10fd   :  { %v1572_v29 = vadd.f32 1.0, %v4923_v28  ;;  %v1571_v40 = vmul.f32 %v4923_v28, %v1567_v22 }
0x10fe   :  { %v4925_v31 = vpop.eup %4924 }
0x10ff   :  { %v1573_v34 = vmul.f32 0.5, %v1572_v29  ;;  %v1586_v35 = vadd.f32 1.0, %v4925_v31  ;;  %v1576_v56 = vmul.f32 0.5, %v1571_v40  ;;  %v1585_v59 = vmul.f32 %v4925_v31, %v1568_v23 }
0x1101   :  { %4926 = vrsqrt.f32 %v1573_v34  ;;  %v1587_v39 = vmul.f32 0.5, %v1586_v35  ;;  %v1590_v61 = vmul.f32 0.5, %v1585_v59 }
0x1103   :  { %4928 = vrsqrt.f32 %v1587_v39 }
0x110b   :  { %v4927_v43 = vpop.eup %4926 }
0x110c   :  { %v1575_v45 = vmul.f32 %v4927_v43, %v1573_v34  ;;  %v1577_v48 = vmul.f32 %v4927_v43, %v1576_v56 }
0x110d   :  { %v4929_v17 = vpop.eup %4928 }
0x110e   :  { %v1578_v50 = vsub.f32 %v1575_v45, %v1577_v48  ;;  %v1580_v51 = vadd.f32 %v1577_v48, %v1575_v45  ;;  %v1589_v53 = vmul.f32 %v4929_v17, %v1587_v39  ;;  %v1591_v62 = vmul.f32 %v4929_v17, %v1590_v61 }
0x1110   :  { %v1581_v52 = vmul.f32 0.70710677, %v1580_v51  ;;  %v1579_v55 = vmul.f32 0.70710677, %v1578_v50 }
0x1112   :  { %v1595_v30 = vmul.f32 %v1589_v53, %v1581_v52  ;;  %v1592_v57 = vmul.f32 %v1589_v53, %v1579_v55  ;;  %v1596_v2 = vmul.f32 %v1591_v62, %v1581_v52  ;;  %v1593_v3 = vmul.f32 %v1591_v62, %v1579_v55 }
0x1114   :  { %1599 = vperm.xlu0 %4816, %v1595_v30   ;;  %1604 = vperm.xlu1 %4817, %v1592_v57   ;;  %v1594_v6 = vsub.f32 0.0, %v1593_v3 }
0x1118   :  { %4819 = vset.pattern.permute.xlu0 %v5014_v11  ;;  %4818 = vset.pattern.permute.xlu1 %v5014_v11 }
0x1119   :  { %1613 = vperm.xlu0 %4819, %v1592_v57   ;;  %1609 = vperm.xlu1 %4818, %v1595_v30  }
0x111d   :  { %4821 = vset.pattern.permute.xlu0 %v5017_v47  ;;  %4820 = vset.pattern.permute.xlu1 %v5016_v44 }
0x111e   :  { %1627 = vperm.xlu0 %4821, %v1595_v30   ;;  %1618 = vperm.xlu1 %4820, %v1595_v30  }
0x1122   :  { %4825 = vset.pattern.permute.xlu0 %v5016_v44  ;;  %1622 = vperm.xlu1 %4820, %v1592_v57  }
0x1123   :  { %1656 = vperm.xlu0 %4825, %v1596_v2  }
0x1126   :  { %4822 = vset.pattern.permute.xlu1 %v5017_v47 }
0x1127   :  { %4826 = vset.pattern.permute.xlu0 %v5015_v12  ;;  %1631 = vperm.xlu1 %4822, %v1592_v57  }
0x1128   :  { %1642 = vperm.xlu0 %4826, %v1594_v6  }
0x112b   :  { %4823 = vset.pattern.permute.xlu1 %v5015_v12 }
0x112c   :  { %4829 = vset.pattern.permute.xlu0 %v5017_v47  ;;  %1637 = vperm.xlu1 %4823, %v1596_v2  }
0x112d   :  { %1669 = vperm.xlu0 %4829, %v1594_v6  }
0x1130   :  { %4824 = vset.pattern.permute.xlu1 %v5014_v11 }
0x1131   :  { %1647 = vperm.xlu1 %4824, %v1596_v2   ;;  %4830 = vset.pattern.permute.xlu0 %v5015_v12 }
0x1135   :  { %1651 = vperm.xlu1 %4824, %v1594_v6  }
0x1139   :  { %4827 = vset.pattern.permute.xlu1 %v5016_v44 }
0x113a   :  { %1660 = vperm.xlu1 %4827, %v1594_v6  }
0x113e   :  { %4828 = vset.pattern.permute.xlu1 %v5017_v47 }
0x113f   :  { %1665 = vperm.xlu1 %4828, %v1596_v2  }
0x1143   :  { %4831 = vset.pattern.permute.xlu1 %v5015_v12 }
0x1193   :  { %v1605_v7 = vpop.permute.xlu1 %1604  ;;  %v1600_v16 = vpop.permute.xlu0 %1599 }
0x1194   :  { %v1607_v35 = vsel %vm62_vm3, %v1600_v16, %v1605_v7 }
0x1198   :  { %v1610_v36 = vpop.permute.xlu1 %1609  ;;  %v1614_v33 = vpop.permute.xlu0 %1613 }
0x1199   :  { %v1616_v31 = vsel %vm65_vm2, %v1610_v36, %v1614_v33 }
0x119a   :  { %v1673_v50 = vmul.f32 %v1616_v31, %v1607_v35 }
0x119d   :  { %v1619_v13 = vpop.permute.xlu1 %1618  ;;  %v1628_v22 = vpop.permute.xlu0 %1627 }
0x11a1   :  { %v1623_v18 = vpop.permute.xlu1 %1622 }
0x11a2   :  { %v1657_v25 = vpop.permute.xlu0 %1656  ;;  %v1625_v56 = vsel %vm68_vm5, %v1619_v13, %v1623_v18 }
0x11a6   :  { %v1632_v20 = vpop.permute.xlu1 %1631 }
0x11a7   :  { %v1643_v27 = vpop.permute.xlu0 %1642  ;;  %v1634_v34 = vsel %vm5137_vm4, %v1628_v22, %v1632_v20 }
0x11a8   :  { %v1679_v51 = vmul.f32 %v1634_v34, %v1625_v56 }
0x11ab   :  { %v1638_v21 = vpop.permute.xlu1 %1637 }
0x11ac   :  { %v1645_v39 = vsel %vm62_vm3, %v1638_v21, %v1643_v27  ;;  %v1670_v43 = vpop.permute.xlu0 %1669 }
0x11ad   :  { %v1677_v53 = vmul.f32 %v1645_v39, %v1616_v31 }
0x11b0   :  { %v1648_v23 = vpop.permute.xlu1 %1647 }
0x11b4   :  { %v1652_v26 = vpop.permute.xlu1 %1651 }
0x11b5   :  { %v1654_v29 = vsel %vm65_vm2, %v1648_v23, %v1652_v26 }
0x11b6   :  { %v1674_v45 = vmul.f32 %v1654_v29, %v1645_v39  ;;  %v1676_v48 = vmul.f32 %v1654_v29, %v1607_v35 }
0x11b8   :  { %v1675_v59 = vsub.f32 %v1673_v50, %v1674_v45  ;;  %v1678_v61 = vadd.f32 %v1677_v53, %v1676_v48 }
0x11b9   :  { %v1661_v28 = vpop.permute.xlu1 %1660 }
0x11ba   :  { %v1663_v40 = vsel %vm68_vm5, %v1657_v25, %v1661_v28  ;;  %v5420_v25 = vld [vmem:[#allocation2 + $0xa0] ss:$0 sm:$0xff] }
0x11bb   :  { %v1683_v55 = vmul.f32 %v1663_v40, %v1634_v34 }
0x11be   :  { %v1666_v17 = vpop.permute.xlu1 %1665 }
0x11bf   :  { %v1672_v52 = vsel %vm5137_vm4, %v1666_v17, %v1670_v43 }
0x11c0   :  { %v1680_v30 = vmul.f32 %v1672_v52, %v1663_v40  ;;  %v1682_v57 = vmul.f32 %v1672_v52, %v1625_v56 }
0x11c2   :  { %v1681_v62 = vsub.f32 %v1679_v51, %v1680_v30  ;;  %v1684_v2 = vadd.f32 %v1683_v55, %v1682_v57 }
0x11c4   :  { %v1688_v3 = vmul.f32 %v1684_v2, %v1675_v59  ;;  %v1689_v6 = vmul.f32 %v1681_v62, %v1678_v61  ;;  %v1685_v36 = vmul.f32 %v1681_v62, %v1675_v59  ;;  %v1686_v13 = vmul.f32 %v1684_v2, %v1678_v61 }
0x11c6   :  { %v1690_v7 = vadd.f32 %v1689_v6, %v1688_v3  ;;  %v1687_v18 = vsub.f32 %v1685_v36, %v1686_v13 }
0x11c8   :  { %v1692_v16 = vrot.slane %v1690_v7, 6  ;;  %v1766_v33 = vrot.slane %v1687_v18, 6 }
0x11ca   :  { %4174 = vmatmul.mubr.msk.f32.vlgmr.msra.gmra.mrb[10].mxu0 %vm365_vm6, %v1692_v16 }
0x11cb   :  { %4577 = vmatpush3.bf16.msra.mxu0 %v5158_v24  ;;  %4180 = vmatprep.mubr.msk.f32.mxu0 %vm5012_vm0, %v5013_v1 }
0x11cc   :  { %4578 = vmatprep.subr.bf16.mxu0 %v5011_v0 }
0x11d2   :  { %4181 = vmatmul.mubr.msk.f32.vlgmr.msra.gmra.mrb[10].mxu0 %vm365_vm6, %v1766_v33 }
0x11d3   :  { %4580 = vmatpush3.bf16.msra.mxu0 %v5095_v58  ;;  %4215 = vmatprep.mubr.msk.f32.mxu0 %vm5012_vm0, %v5013_v1 }
0x11d4   :  { %4581 = vmatprep.subr.bf16.mxu0 %v5011_v0 }
0x11d7   :  { %4583 = vmatpush3.bf16.msra.mxu0 %v5098_v60 }
0x11d8   :  { %4584 = vmatprep.subr.bf16.mxu0 %v5011_v0 }
0x11db   :  { %4586 = vmatpush3.bf16.msra.mxu0 %v5102_v63 }
0x11dc   :  { %4587 = vmatprep.subr.bf16.mxu0 %v5011_v0 }
0x11df   :  { %4589 = vmatpush3.bf16.msra.mxu0 %v5106_v4 }
0x11e0   :  { %4590 = vmatprep.subr.bf16.mxu0 %v5011_v0 }
0x11e3   :  { %4592 = vmatpush3.bf16.msra.mxu0 %v5110_v8 }
0x11e4   :  { %4593 = vmatprep.subr.bf16.mxu0 %v5011_v0 }
0x11e7   :  { %4595 = vmatpush3.bf16.msra.mxu0 %v5114_v14 }
0x11e8   :  { %4596 = vmatprep.subr.bf16.mxu0 %v5011_v0 }
0x11eb   :  { %4598 = vmatpush3.bf16.msra.mxu0 %v5118_v19 }
0x11ec   :  { %4599 = vmatprep.subr.bf16.mxu0 %v5011_v0 }
0x11ef   :  { %4601 = vmatpush3.bf16.msra.mxu0 %v5170_v32 }
0x11f0   :  { %4638 = vmatprep.subr.bf16.mxu0 %v5011_v0 }
0x12a5   :  { %v1835_v20 = vpop.f32.mrb[10].mxu0 }
0x12a6   :  { %v1839_v21 = vmul.f32 %v1835_v20, %v1835_v20  ;;  %v4182_v22 = vpop.f32.mrb[11].mxu0 }
0x12a8   :  { %4216 = vmatmul.mubr.f32.vlgmr.msra.gmra.mrb[12].mxu0 %v1839_v21 }
0x12a9   :  { %4640 = vmatpush3.bf16.msra.mxu0 %v5051_v5  ;;  %4286 = vmatprep.mubr.msk.f32.mxu0 %vm5012_vm0, %v5013_v1 }
0x12aa   :  { %4641 = vmatprep.subr.bf16.mxu0 %v5011_v0 }
0x12ad   :  { %4643 = vmatpush3.bf16.msra.mxu0 %v5060_v10 }
0x12ae   :  { %4644 = vmatprep.subr.bf16.mxu0 %v5011_v0 }
0x137b   :  { %v1906_v23 = vpop.f32.mrb[12].mxu0 }
0x137c   :  { %v1907_v26 = vadd.f32 %v5420_v25, %v1906_v23  ;;  %v4217_v27 = vpop.f32.mrb[13].mxu0 }
0x137e   :  { %4930 = vtanh.f32 %v1907_v26 }
0x1388   :  { %v4931_v28 = vpop.eup %4930 }
0x1389   :  { %v1911_v29 = vmul.f32 %v4931_v28, %v5185_v46 }
0x138b   :  { %v1912_v31 = vadd.f32 %v1911_v29, %v5187_v49 }
0x138d   :  { %1915 = vrot.lane.b32.xlu1 %v1912_v31, %s5019_s0  ;;  %v1913_v39 = vmul.f32 %v1912_v31, %v5349_v9 }
0x13ff   :  { %v1916_v34 = vpop.permute.xlu1 %1915 }
0x1400   :  { %v1918_v35 = vmul.f32 %v1916_v34, %v1912_v31 }
0x1402   :  { %1920 = vrot.lane.b32.xlu1 %v1918_v35, %s5019_s0 }
0x1474   :  { %v1921_v40 = vpop.permute.xlu1 %1920 }
0x1475   :  { %v5428_v56 = vadd.f32 %v1921_v40, %v1913_v39 }
0x1477   :  { %4932 = vtanh.f32 %v5428_v56 }
0x1481   :  { %v4933_v43 = vpop.eup %4932 }
0x1482   :  { %1926 = vrot.lane.b32.xlu0 %v4933_v43, %s5019_s0 }
0x14f4   :  { %v1927_v45 = vpop.permute.xlu0 %1926 }
0x14f5   :  { %v1929_v48 = vmul.f32 %v1927_v45, %v1912_v31 }
0x14f7   :  { %1931 = vrot.lane.b32.xlu1 %v1929_v48, %s5020_s26 }
0x1569   :  { %v1932_v17 = vpop.permute.xlu1 %1931 }
0x156a   :  { %4227 = vmatmul.mubr.msk.f32.vlgmr.msra.gmra.mrb[12].mxu1 %vm159_vm10, %v1932_v17 }
0x156b   :  { %4610 = vmatpush3.bf16.msra.mxu1 %v5090_v54  ;;  %4233 = vmatprep.mubr.msk.f32.mxu1 %vm5012_vm0, %v5013_v1 }
0x156c   :  { %4611 = vmatprep.subr.bf16.mxu1 %v5011_v0 }
0x163d   :  { %v2001_v9 = vpop.f32.mrb[12].mxu1 }
0x163e   :  { %v2005_v50 = vadd.f32 %v2001_v9, %v5073_v15  ;;  %v4228_v51 = vpop.f32.mrb[13].mxu1 }
0x1640   :  { %v2006_v52 = vmul.f32 %v2005_v50, %v2005_v50 }
0x1642   :  { %v2007_v53 = vadd.f32 1.0, %v2006_v52  ;;  %v2020_v55 = vmul.f32 %v2006_v52, %v2006_v52 }
0x1644   :  { %4934 = vrsqrt.f32 %v2007_v53  ;;  %v2021_v30 = vadd.f32 1.0, %v2020_v55 }
0x1646   :  { %4936 = vrsqrt.f32 %v2021_v30 }
0x164e   :  { %v4935_v57 = vpop.eup %4934 }
0x164f   :  { %v2010_v59 = vadd.f32 1.0, %v4935_v57  ;;  %v2009_v6 = vmul.f32 %v4935_v57, %v2005_v50 }
0x1650   :  { %v4937_v61 = vpop.eup %4936 }
0x1651   :  { %v2011_v62 = vmul.f32 0.5, %v2010_v59  ;;  %v2024_v2 = vadd.f32 1.0, %v4937_v61  ;;  %v2014_v7 = vmul.f32 0.5, %v2009_v6  ;;  %v2023_v28 = vmul.f32 %v4937_v61, %v2006_v52 }
0x1653   :  { %4938 = vrsqrt.f32 %v2011_v62  ;;  %v2025_v3 = vmul.f32 0.5, %v2024_v2  ;;  %v2028_v29 = vmul.f32 0.5, %v2023_v28 }
0x1655   :  { %4940 = vrsqrt.f32 %v2025_v3 }
0x165d   :  { %v4939_v36 = vpop.eup %4938 }
0x165e   :  { %v2013_v13 = vmul.f32 %v4939_v36, %v2011_v62  ;;  %v2015_v16 = vmul.f32 %v4939_v36, %v2014_v7 }
0x165f   :  { %v4941_v18 = vpop.eup %4940 }
0x1660   :  { %v2016_v33 = vsub.f32 %v2013_v13, %v2015_v16  ;;  %v2018_v20 = vadd.f32 %v2015_v16, %v2013_v13  ;;  %v2027_v23 = vmul.f32 %v4941_v18, %v2025_v3  ;;  %v2029_v31 = vmul.f32 %v4941_v18, %v2028_v29 }
0x1662   :  { %v2017_v21 = vmul.f32 0.70710677, %v2016_v33  ;;  %v2019_v22 = vmul.f32 0.70710677, %v2018_v20 }
0x1664   :  { %v2033_v26 = vmul.f32 %v2027_v23, %v2019_v22  ;;  %v2030_v27 = vmul.f32 %v2027_v23, %v2017_v21  ;;  %v2034_v34 = vmul.f32 %v2029_v31, %v2019_v22  ;;  %v2031_v35 = vmul.f32 %v2029_v31, %v2017_v21 }
0x1666   :  { %2037 = vperm.xlu0 %4830, %v2033_v26   ;;  %2042 = vperm.xlu1 %4831, %v2030_v27   ;;  %v2032_v39 = vsub.f32 0.0, %v2031_v35 }
0x166a   :  { %4833 = vset.pattern.permute.xlu0 %v5014_v11  ;;  %4832 = vset.pattern.permute.xlu1 %v5014_v11 }
0x166b   :  { %2051 = vperm.xlu0 %4833, %v2030_v27   ;;  %2047 = vperm.xlu1 %4832, %v2033_v26  }
0x166f   :  { %4835 = vset.pattern.permute.xlu0 %v5017_v47  ;;  %4834 = vset.pattern.permute.xlu1 %v5016_v44 }
0x1670   :  { %2065 = vperm.xlu0 %4835, %v2033_v26   ;;  %2056 = vperm.xlu1 %4834, %v2033_v26  }
0x1674   :  { %4839 = vset.pattern.permute.xlu0 %v5016_v44  ;;  %2060 = vperm.xlu1 %4834, %v2030_v27  }
0x1675   :  { %2094 = vperm.xlu0 %4839, %v2034_v34  }
0x1678   :  { %4836 = vset.pattern.permute.xlu1 %v5017_v47 }
0x1679   :  { %4840 = vset.pattern.permute.xlu0 %v5015_v12  ;;  %2069 = vperm.xlu1 %4836, %v2030_v27  }
0x167a   :  { %2080 = vperm.xlu0 %4840, %v2032_v39  }
0x167d   :  { %4837 = vset.pattern.permute.xlu1 %v5015_v12 }
0x167e   :  { %4843 = vset.pattern.permute.xlu0 %v5017_v47  ;;  %2075 = vperm.xlu1 %4837, %v2034_v34  }
0x167f   :  { %2107 = vperm.xlu0 %4843, %v2032_v39  }
0x1682   :  { %4838 = vset.pattern.permute.xlu1 %v5014_v11 }
0x1683   :  { %2085 = vperm.xlu1 %4838, %v2034_v34   ;;  %4844 = vset.pattern.permute.xlu0 %v5015_v12 }
0x1687   :  { %2089 = vperm.xlu1 %4838, %v2032_v39  }
0x168b   :  { %4841 = vset.pattern.permute.xlu1 %v5016_v44 }
0x168c   :  { %2098 = vperm.xlu1 %4841, %v2032_v39  }
0x1690   :  { %4842 = vset.pattern.permute.xlu1 %v5017_v47 }
0x1691   :  { %2103 = vperm.xlu1 %4842, %v2034_v34  }
0x1695   :  { %4845 = vset.pattern.permute.xlu1 %v5015_v12 }
0x16e5   :  { %v2043_v40 = vpop.permute.xlu1 %2042  ;;  %v2038_v48 = vpop.permute.xlu0 %2037 }
0x16e6   :  { %v2045_v3 = vsel %vm62_vm3, %v2038_v48, %v2043_v40 }
0x16ea   :  { %v2048_v43 = vpop.permute.xlu1 %2047  ;;  %v2052_v9 = vpop.permute.xlu0 %2051 }
0x16eb   :  { %v2054_v62 = vsel %vm65_vm2, %v2048_v43, %v2052_v9 }
0x16ec   :  { %v2111_v20 = vmul.f32 %v2054_v62, %v2045_v3 }
0x16ef   :  { %v2057_v45 = vpop.permute.xlu1 %2056  ;;  %v2066_v52 = vpop.permute.xlu0 %2065 }
0x16f3   :  { %v2061_v17 = vpop.permute.xlu1 %2060 }
0x16f4   :  { %v2095_v55 = vpop.permute.xlu0 %2094  ;;  %v2063_v36 = vsel %vm68_vm5, %v2057_v45, %v2061_v17 }
0x16f8   :  { %v2070_v50 = vpop.permute.xlu1 %2069 }
0x16f9   :  { %v2081_v57 = vpop.permute.xlu0 %2080  ;;  %v2072_v2 = vsel %vm5137_vm4, %v2066_v52, %v2070_v50 }
0x16fa   :  { %v2117_v21 = vmul.f32 %v2072_v2, %v2063_v36 }
0x16fd   :  { %v2076_v51 = vpop.permute.xlu1 %2075 }
0x16fe   :  { %v2083_v6 = vsel %vm62_vm3, %v2076_v51, %v2081_v57  ;;  %v2108_v13 = vpop.permute.xlu0 %2107 }
0x16ff   :  { %v2115_v23 = vmul.f32 %v2083_v6, %v2054_v62 }
0x1702   :  { %v2086_v53 = vpop.permute.xlu1 %2085 }
0x1706   :  { %v2090_v30 = vpop.permute.xlu1 %2089 }
0x1707   :  { %v2092_v61 = vsel %vm65_vm2, %v2086_v53, %v2090_v30 }
0x1708   :  { %v2112_v16 = vmul.f32 %v2092_v61, %v2083_v6  ;;  %v2114_v18 = vmul.f32 %v2092_v61, %v2045_v3 }
0x170a   :  { %v2113_v29 = vsub.f32 %v2111_v20, %v2112_v16  ;;  %v2116_v31 = vadd.f32 %v2115_v23, %v2114_v18 }
0x170b   :  { %v2099_v59 = vpop.permute.xlu1 %2098 }
0x170c   :  { %v2101_v7 = vsel %vm68_vm5, %v2095_v55, %v2099_v59 }
0x170d   :  { %v2121_v26 = vmul.f32 %v2101_v7, %v2072_v2 }
0x1710   :  { %v2104_v33 = vpop.permute.xlu1 %2103 }
0x1711   :  { %v2110_v22 = vsel %vm5137_vm4, %v2104_v33, %v2108_v13 }
0x1712   :  { %v2118_v27 = vmul.f32 %v2110_v22, %v2101_v7  ;;  %v2120_v28 = vmul.f32 %v2110_v22, %v2063_v36 }
0x1714   :  { %v2119_v34 = vsub.f32 %v2117_v21, %v2118_v27  ;;  %v2122_v35 = vadd.f32 %v2121_v26, %v2120_v28 }
0x1716   :  { %v2126_v39 = vmul.f32 %v2122_v35, %v2113_v29  ;;  %v2127_v40 = vmul.f32 %v2119_v34, %v2116_v31  ;;  %v2123_v45 = vmul.f32 %v2119_v34, %v2113_v29  ;;  %v2124_v48 = vmul.f32 %v2122_v35, %v2116_v31 }
0x1718   :  { %v2128_v43 = vadd.f32 %v2127_v40, %v2126_v39  ;;  %v2125_v17 = vsub.f32 %v2123_v45, %v2124_v48 }
0x171a   :  { %4234 = vmatmul.mubr.msk.f32.vlgmr.msra.gmra.mrb[14].mxu1 %vm365_vm6, %v2128_v43 }
0x171b   :  { %4613 = vmatpush3.bf16.msra.mxu1 %v5158_v24  ;;  %4240 = vmatprep.mubr.msk.f32.mxu1 %vm5012_vm0, %v5013_v1 }
0x171c   :  { %4614 = vmatprep.subr.bf16.mxu1 %v5011_v0 }
0x1722   :  { %4241 = vmatmul.mubr.msk.f32.vlgmr.msra.gmra.mrb[14].mxu1 %vm365_vm6, %v2125_v17 }
0x1723   :  { %4616 = vmatpush3.bf16.msra.mxu1 %v5095_v58  ;;  %4275 = vmatprep.mubr.msk.f32.mxu1 %vm5012_vm0, %v5013_v1 }
0x1724   :  { %4617 = vmatprep.subr.bf16.mxu1 %v5011_v0 }
0x1727   :  { %4619 = vmatpush3.bf16.msra.mxu1 %v5098_v60 }
0x1728   :  { %4620 = vmatprep.subr.bf16.mxu1 %v5011_v0 }
0x172b   :  { %4622 = vmatpush3.bf16.msra.mxu1 %v5102_v63 }
0x172c   :  { %4623 = vmatprep.subr.bf16.mxu1 %v5011_v0 }
0x172f   :  { %4625 = vmatpush3.bf16.msra.mxu1 %v5106_v4 }
0x1730   :  { %4626 = vmatprep.subr.bf16.mxu1 %v5011_v0 }
0x1733   :  { %4628 = vmatpush3.bf16.msra.mxu1 %v5110_v8 }
0x1734   :  { %4629 = vmatprep.subr.bf16.mxu1 %v5011_v0 }
0x1737   :  { %4631 = vmatpush3.bf16.msra.mxu1 %v5114_v14 }
0x1738   :  { %4632 = vmatprep.subr.bf16.mxu1 %v5011_v0 }
0x173b   :  { %4634 = vmatpush3.bf16.msra.mxu1 %v5118_v19 }
0x173c   :  { %4635 = vmatprep.subr.bf16.mxu1 %v5011_v0 }
0x173f   :  { %4637 = vmatpush3.bf16.msra.mxu1 %v5170_v32 }
0x1740   :  { %4674 = vmatprep.subr.bf16.mxu1 %v5011_v0 }
0x17f5   :  { %v2271_v9 = vpop.f32.mrb[14].mxu1 }
0x17f6   :  { %v2275_v50 = vmul.f32 %v2271_v9, %v2271_v9  ;;  %v4242_v51 = vpop.f32.mrb[15].mxu1 }
0x17f8   :  { %4276 = vmatmul.mubr.f32.vlgmr.msra.gmra.mrb[16].mxu1 %v2275_v50 }
0x17f9   :  { %4676 = vmatpush3.bf16.msra.mxu1 %v5051_v5  ;;  %4346 = vmatprep.mubr.msk.f32.mxu1 %vm5012_vm0, %v5013_v1 }
0x17fa   :  { %4677 = vmatprep.subr.bf16.mxu1 %v5011_v0 }
0x17fd   :  { %4679 = vmatpush3.bf16.msra.mxu1 %v5060_v10 }
0x17fe   :  { %4680 = vmatprep.subr.bf16.mxu1 %v5011_v0 }
0x18cb   :  { %v2342_v52 = vpop.f32.mrb[16].mxu1 }
0x18cc   :  { %v2343_v53 = vadd.f32 %v5420_v25, %v2342_v52  ;;  %v4277_v55 = vpop.f32.mrb[17].mxu1 }
0x18ce   :  { %4942 = vtanh.f32 %v2343_v53 }
0x18d8   :  { %v4943_v30 = vpop.eup %4942 }
0x18d9   :  { %v2347_v57 = vmul.f32 %v4943_v30, %v5185_v46 }
0x18db   :  { %v2348_v59 = vadd.f32 %v2347_v57, %v5187_v49 }
0x18dd   :  { %2351 = vrot.lane.b32.xlu1 %v2348_v59, %s5019_s0  ;;  %v2349_v2 = vmul.f32 %v2348_v59, %v5428_v56 }
0x194f   :  { %v2352_v61 = vpop.permute.xlu1 %2351 }
0x1950   :  { %v2354_v62 = vmul.f32 %v2352_v61, %v2348_v59 }
0x1952   :  { %2356 = vrot.lane.b32.xlu1 %v2354_v62, %s5019_s0 }
0x19c4   :  { %v2357_v3 = vpop.permute.xlu1 %2356 }
0x19c5   :  { %v5505_v6 = vadd.f32 %v2357_v3, %v2349_v2 }
0x19c7   :  { %4944 = vtanh.f32 %v5505_v6 }
0x19d1   :  { %v4945_v7 = vpop.eup %4944 }
0x19d2   :  { %2362 = vrot.lane.b32.xlu0 %v4945_v7, %s5019_s0 }
0x1a44   :  { %v2363_v36 = vpop.permute.xlu0 %2362 }
0x1a45   :  { %v2365_v13 = vmul.f32 %v2363_v36, %v2348_v59 }
0x1a47   :  { %2367 = vrot.lane.b32.xlu1 %v2365_v13, %s5020_s26 }
0x1ab9   :  { %v2368_v16 = vpop.permute.xlu1 %2367 }
0x1aba   :  { %4287 = vmatmul.mubr.msk.f32.vlgmr.msra.gmra.mrb[14].mxu0 %vm159_vm10, %v2368_v16 }
0x1abb   :  { %4646 = vmatpush3.bf16.msra.mxu0 %v5090_v54  ;;  %4293 = vmatprep.mubr.msk.f32.mxu0 %vm5012_vm0, %v5013_v1 }
0x1abc   :  { %4647 = vmatprep.subr.bf16.mxu0 %v5011_v0 }
0x1b8d   :  { %v2437_v56 = vpop.f32.mrb[14].mxu0 }
0x1b8e   :  { %v2442_v18 = vrot.slane %v2437_v56, 6  ;;  %v4288_v33 = vpop.f32.mrb[15].mxu0 }
0x1b90   :  { %v2444_v20 = vadd.f32 %v2442_v18, %v5073_v15 }
0x1b92   :  { %v2445_v21 = vmul.f32 %v2444_v20, %v2444_v20 }
0x1b94   :  { %v2446_v22 = vadd.f32 1.0, %v2445_v21  ;;  %v2459_v23 = vmul.f32 %v2445_v21, %v2445_v21 }
0x1b96   :  { %4946 = vrsqrt.f32 %v2446_v22  ;;  %v2460_v26 = vadd.f32 1.0, %v2459_v23 }
0x1b98   :  { %4948 = vrsqrt.f32 %v2460_v26 }
0x1ba0   :  { %v4947_v27 = vpop.eup %4946 }
0x1ba1   :  { %v2449_v28 = vadd.f32 1.0, %v4947_v27  ;;  %v2448_v39 = vmul.f32 %v4947_v27, %v2444_v20 }
0x1ba2   :  { %v4949_v29 = vpop.eup %4948 }
0x1ba3   :  { %v2450_v31 = vmul.f32 0.5, %v2449_v28  ;;  %v2463_v34 = vadd.f32 1.0, %v4949_v29  ;;  %v2453_v40 = vmul.f32 0.5, %v2448_v39  ;;  %v2462_v57 = vmul.f32 %v4949_v29, %v2445_v21 }
0x1ba5   :  { %4950 = vrsqrt.f32 %v2450_v31  ;;  %v2464_v35 = vmul.f32 0.5, %v2463_v34  ;;  %v2467_v59 = vmul.f32 0.5, %v2462_v57 }
0x1ba7   :  { %4952 = vrsqrt.f32 %v2464_v35 }
0x1baf   :  { %v4951_v43 = vpop.eup %4950 }
0x1bb0   :  { %v2452_v45 = vmul.f32 %v4951_v43, %v2450_v31  ;;  %v2454_v48 = vmul.f32 %v4951_v43, %v2453_v40 }
0x1bb1   :  { %v4953_v17 = vpop.eup %4952 }
0x1bb2   :  { %v2455_v9 = vsub.f32 %v2452_v45, %v2454_v48  ;;  %v2457_v50 = vadd.f32 %v2454_v48, %v2452_v45  ;;  %v2466_v52 = vmul.f32 %v4953_v17, %v2464_v35  ;;  %v2468_v61 = vmul.f32 %v4953_v17, %v2467_v59 }
0x1bb4   :  { %v2458_v51 = vmul.f32 0.70710677, %v2457_v50  ;;  %v2456_v53 = vmul.f32 0.70710677, %v2455_v9 }
0x1bb6   :  { %v2472_v55 = vmul.f32 %v2466_v52, %v2458_v51  ;;  %v2469_v30 = vmul.f32 %v2466_v52, %v2456_v53  ;;  %v2473_v62 = vmul.f32 %v2468_v61, %v2458_v51  ;;  %v2470_v2 = vmul.f32 %v2468_v61, %v2456_v53 }
0x1bb8   :  { %2476 = vperm.xlu0 %4844, %v2472_v55   ;;  %2481 = vperm.xlu1 %4845, %v2469_v30   ;;  %v2471_v3 = vsub.f32 0.0, %v2470_v2 }
0x1bbc   :  { %4847 = vset.pattern.permute.xlu0 %v5014_v11  ;;  %4846 = vset.pattern.permute.xlu1 %v5014_v11 }
0x1bbd   :  { %2490 = vperm.xlu0 %4847, %v2469_v30   ;;  %2486 = vperm.xlu1 %4846, %v2472_v55  }
0x1bc1   :  { %4849 = vset.pattern.permute.xlu0 %v5017_v47  ;;  %4848 = vset.pattern.permute.xlu1 %v5016_v44 }
0x1bc2   :  { %2504 = vperm.xlu0 %4849, %v2472_v55   ;;  %2495 = vperm.xlu1 %4848, %v2472_v55  }
0x1bc6   :  { %4853 = vset.pattern.permute.xlu0 %v5016_v44  ;;  %2499 = vperm.xlu1 %4848, %v2469_v30  }
0x1bc7   :  { %2533 = vperm.xlu0 %4853, %v2473_v62  }
0x1bca   :  { %4850 = vset.pattern.permute.xlu1 %v5017_v47 }
0x1bcb   :  { %4854 = vset.pattern.permute.xlu0 %v5015_v12  ;;  %2508 = vperm.xlu1 %4850, %v2469_v30  }
0x1bcc   :  { %2519 = vperm.xlu0 %4854, %v2471_v3  }
0x1bcf   :  { %4851 = vset.pattern.permute.xlu1 %v5015_v12 }
0x1bd0   :  { %4857 = vset.pattern.permute.xlu0 %v5017_v47  ;;  %2514 = vperm.xlu1 %4851, %v2473_v62  }
0x1bd1   :  { %2546 = vperm.xlu0 %4857, %v2471_v3  }
0x1bd4   :  { %4852 = vset.pattern.permute.xlu1 %v5014_v11 }
0x1bd5   :  { %2524 = vperm.xlu1 %4852, %v2473_v62   ;;  %4858 = vset.pattern.permute.xlu0 %v5015_v12 }
0x1bd9   :  { %2528 = vperm.xlu1 %4852, %v2471_v3  }
0x1bdd   :  { %4855 = vset.pattern.permute.xlu1 %v5016_v44 }
0x1bde   :  { %2537 = vperm.xlu1 %4855, %v2471_v3  }
0x1be2   :  { %4856 = vset.pattern.permute.xlu1 %v5017_v47 }
0x1be3   :  { %2542 = vperm.xlu1 %4856, %v2473_v62  }
0x1be7   :  { %4859 = vset.pattern.permute.xlu1 %v5015_v12 }
0x1c37   :  { %v2482_v7 = vpop.permute.xlu1 %2481  ;;  %v2477_v16 = vpop.permute.xlu0 %2476 }
0x1c38   :  { %v2484_v35 = vsel %vm62_vm3, %v2477_v16, %v2482_v7 }
0x1c3c   :  { %v2487_v36 = vpop.permute.xlu1 %2486  ;;  %v2491_v18 = vpop.permute.xlu0 %2490 }
0x1c3d   :  { %v2493_v31 = vsel %vm65_vm2, %v2487_v36, %v2491_v18 }
0x1c3e   :  { %v2550_v50 = vmul.f32 %v2493_v31, %v2484_v35 }
0x1c41   :  { %v2496_v13 = vpop.permute.xlu1 %2495  ;;  %v2505_v21 = vpop.permute.xlu0 %2504 }
0x1c45   :  { %v2500_v56 = vpop.permute.xlu1 %2499 }
0x1c46   :  { %v2534_v23 = vpop.permute.xlu0 %2533  ;;  %v2502_v43 = vsel %vm68_vm5, %v2496_v13, %v2500_v56 }
0x1c4a   :  { %v2509_v33 = vpop.permute.xlu1 %2508 }
0x1c4b   :  { %v2520_v27 = vpop.permute.xlu0 %2519  ;;  %v2511_v34 = vsel %vm5137_vm4, %v2505_v21, %v2509_v33 }
0x1c4c   :  { %v2556_v51 = vmul.f32 %v2511_v34, %v2502_v43 }
0x1c4f   :  { %v2515_v20 = vpop.permute.xlu1 %2514 }
0x1c50   :  { %v2522_v39 = vsel %vm62_vm3, %v2515_v20, %v2520_v27  ;;  %v2547_v45 = vpop.permute.xlu0 %2546 }
0x1c51   :  { %v2554_v53 = vmul.f32 %v2522_v39, %v2493_v31 }
0x1c54   :  { %v2525_v22 = vpop.permute.xlu1 %2524 }
0x1c58   :  { %v2529_v26 = vpop.permute.xlu1 %2528 }
0x1c59   :  { %v2531_v29 = vsel %vm65_vm2, %v2525_v22, %v2529_v26 }
0x1c5a   :  { %v2551_v48 = vmul.f32 %v2531_v29, %v2522_v39  ;;  %v2553_v17 = vmul.f32 %v2531_v29, %v2484_v35 }
0x1c5c   :  { %v2552_v59 = vsub.f32 %v2550_v50, %v2551_v48  ;;  %v2555_v61 = vadd.f32 %v2554_v53, %v2553_v17 }
0x1c5d   :  { %v2538_v28 = vpop.permute.xlu1 %2537 }
0x1c5e   :  { %v2540_v40 = vsel %vm68_vm5, %v2534_v23, %v2538_v28 }
0x1c5f   :  { %v2560_v55 = vmul.f32 %v2540_v40, %v2511_v34 }
0x1c62   :  { %v2543_v9 = vpop.permute.xlu1 %2542 }
0x1c63   :  { %v2549_v52 = vsel %vm5137_vm4, %v2543_v9, %v2547_v45 }
0x1c64   :  { %v2557_v30 = vmul.f32 %v2549_v52, %v2540_v40  ;;  %v2559_v57 = vmul.f32 %v2549_v52, %v2502_v43 }
0x1c66   :  { %v2558_v62 = vsub.f32 %v2556_v51, %v2557_v30  ;;  %v2561_v2 = vadd.f32 %v2560_v55, %v2559_v57 }
0x1c68   :  { %v2565_v3 = vmul.f32 %v2561_v2, %v2552_v59  ;;  %v2566_v7 = vmul.f32 %v2558_v62, %v2555_v61  ;;  %v2562_v13 = vmul.f32 %v2558_v62, %v2552_v59  ;;  %v2563_v16 = vmul.f32 %v2561_v2, %v2555_v61 }
0x1c6a   :  { %v2567_v36 = vadd.f32 %v2566_v7, %v2565_v3  ;;  %v2564_v18 = vsub.f32 %v2562_v13, %v2563_v16 }
0x1c6c   :  { %v2569_v56 = vrot.slane %v2567_v36, 2  ;;  %v2643_v33 = vrot.slane %v2564_v18, 2 }
0x1c6e   :  { %4294 = vmatmul.mubr.msk.f32.vlgmr.msra.gmra.mrb[16].mxu0 %vm365_vm6, %v2569_v56 }
0x1c6f   :  { %4649 = vmatpush3.bf16.msra.mxu0 %v5158_v24  ;;  %4300 = vmatprep.mubr.msk.f32.mxu0 %vm5012_vm0, %v5013_v1 }
0x1c70   :  { %4650 = vmatprep.subr.bf16.mxu0 %v5011_v0 }
0x1c76   :  { %4301 = vmatmul.mubr.msk.f32.vlgmr.msra.gmra.mrb[16].mxu0 %vm365_vm6, %v2643_v33 }
0x1c77   :  { %4652 = vmatpush3.bf16.msra.mxu0 %v5095_v58  ;;  %4335 = vmatprep.mubr.msk.f32.mxu0 %vm5012_vm0, %v5013_v1 }
0x1c78   :  { %4653 = vmatprep.subr.bf16.mxu0 %v5011_v0 }
0x1c7b   :  { %4655 = vmatpush3.bf16.msra.mxu0 %v5098_v60 }
0x1c7c   :  { %4656 = vmatprep.subr.bf16.mxu0 %v5011_v0 }
0x1c7f   :  { %4658 = vmatpush3.bf16.msra.mxu0 %v5102_v63 }
0x1c80   :  { %4659 = vmatprep.subr.bf16.mxu0 %v5011_v0 }
0x1c83   :  { %4661 = vmatpush3.bf16.msra.mxu0 %v5106_v4 }
0x1c84   :  { %4662 = vmatprep.subr.bf16.mxu0 %v5011_v0 }
0x1c87   :  { %4664 = vmatpush3.bf16.msra.mxu0 %v5110_v8 }
0x1c88   :  { %4665 = vmatprep.subr.bf16.mxu0 %v5011_v0 }
0x1c8b   :  { %4667 = vmatpush3.bf16.msra.mxu0 %v5114_v14 }
0x1c8c   :  { %4668 = vmatprep.subr.bf16.mxu0 %v5011_v0 }
0x1c8f   :  { %4670 = vmatpush3.bf16.msra.mxu0 %v5118_v19 }
0x1c90   :  { %4671 = vmatprep.subr.bf16.mxu0 %v5011_v0 }
0x1c93   :  { %4673 = vmatpush3.bf16.msra.mxu0 %v5170_v32 }
0x1c94   :  { %4710 = vmatprep.subr.bf16.mxu0 %v5011_v0 }
0x1d49   :  { %v2712_v20 = vpop.f32.mrb[16].mxu0 }
0x1d4a   :  { %v2716_v21 = vmul.f32 %v2712_v20, %v2712_v20  ;;  %v4302_v22 = vpop.f32.mrb[17].mxu0 }
0x1d4c   :  { %4336 = vmatmul.mubr.f32.vlgmr.msra.gmra.mrb[18].mxu0 %v2716_v21 }
0x1d4d   :  { %4712 = vmatpush3.bf16.msra.mxu0 %v5051_v5  ;;  %4406 = vmatprep.mubr.msk.f32.mxu0 %vm5012_vm0, %v5013_v1 }
0x1d4e   :  { %4713 = vmatprep.subr.bf16.mxu0 %v5011_v0 }
0x1d51   :  { %4715 = vmatpush3.bf16.msra.mxu0 %v5060_v10 }
0x1d52   :  { %4716 = vmatprep.subr.bf16.mxu0 %v5011_v0 }
0x1e1f   :  { %v2783_v23 = vpop.f32.mrb[18].mxu0 }
0x1e20   :  { %v2784_v26 = vadd.f32 %v5420_v25, %v2783_v23  ;;  %v4337_v27 = vpop.f32.mrb[19].mxu0 }
0x1e22   :  { %4954 = vtanh.f32 %v2784_v26 }
0x1e2c   :  { %v4955_v28 = vpop.eup %4954 }
0x1e2d   :  { %v2788_v29 = vmul.f32 %v4955_v28, %v5185_v46 }
0x1e2f   :  { %v2789_v31 = vadd.f32 %v2788_v29, %v5187_v49 }
0x1e31   :  { %2792 = vrot.lane.b32.xlu1 %v2789_v31, %s5019_s0  ;;  %v2790_v10 = vmul.f32 %v2789_v31, %v5505_v6 }
0x1ea3   :  { %v2793_v5 = vpop.permute.xlu1 %2792 }
0x1ea4   :  { %v2795_v34 = vmul.f32 %v2793_v5, %v2789_v31 }
0x1ea6   :  { %2797 = vrot.lane.b32.xlu1 %v2795_v34, %s5019_s0 }
0x1f18   :  { %v2798_v35 = vpop.permute.xlu1 %2797 }
0x1f19   :  { %v5582_v39 = vadd.f32 %v2798_v35, %v2790_v10 }
0x1f1b   :  { %4956 = vtanh.f32 %v5582_v39 }
0x1f25   :  { %v4957_v40 = vpop.eup %4956 }
0x1f26   :  { %2803 = vrot.lane.b32.xlu0 %v4957_v40, %s5019_s0 }
0x1f98   :  { %v2804_v43 = vpop.permute.xlu0 %2803 }
0x1f99   :  { %v2806_v45 = vmul.f32 %v2804_v43, %v2789_v31 }
0x1f9b   :  { %2808 = vrot.lane.b32.xlu1 %v2806_v45, %s5020_s26 }
0x200d   :  { %v2809_v48 = vpop.permute.xlu1 %2808 }
0x200e   :  { %4347 = vmatmul.mubr.msk.f32.vlgmr.msra.gmra.mrb[18].mxu1 %vm159_vm10, %v2809_v48 }
0x200f   :  { %4682 = vmatpush3.bf16.msra.mxu1 %v5090_v54  ;;  %4353 = vmatprep.mubr.msk.f32.mxu1 %vm5012_vm0, %v5013_v1 }
0x2010   :  { %4683 = vmatprep.subr.bf16.mxu1 %v5011_v0 }
0x20e1   :  { %v2878_v6 = vpop.f32.mrb[18].mxu1 }
0x20e2   :  { %v2883_v17 = vrot.slane %v2878_v6, 4  ;;  %v4348_v9 = vpop.f32.mrb[19].mxu1 }
0x20e4   :  { %v2885_v50 = vadd.f32 %v2883_v17, %v5073_v15 }
0x20e6   :  { %v2886_v51 = vmul.f32 %v2885_v50, %v2885_v50 }
0x20e8   :  { %v2887_v52 = vadd.f32 1.0, %v2886_v51  ;;  %v2900_v53 = vmul.f32 %v2886_v51, %v2886_v51 }
0x20ea   :  { %4958 = vrsqrt.f32 %v2887_v52  ;;  %v2901_v55 = vadd.f32 1.0, %v2900_v53 }
0x20ec   :  { %4960 = vrsqrt.f32 %v2901_v55 }
0x20f4   :  { %v4959_v30 = vpop.eup %4958 }
0x20f5   :  { %v2890_v57 = vadd.f32 1.0, %v4959_v30  ;;  %v2889_v3 = vmul.f32 %v4959_v30, %v2885_v50 }
0x20f6   :  { %v4961_v59 = vpop.eup %4960 }
0x20f7   :  { %v2891_v61 = vmul.f32 0.5, %v2890_v57  ;;  %v2904_v62 = vadd.f32 1.0, %v4961_v59  ;;  %v2894_v7 = vmul.f32 0.5, %v2889_v3  ;;  %v2903_v27 = vmul.f32 %v4961_v59, %v2886_v51 }
0x20f9   :  { %4962 = vrsqrt.f32 %v2891_v61  ;;  %v2905_v2 = vmul.f32 0.5, %v2904_v62  ;;  %v2908_v28 = vmul.f32 0.5, %v2903_v27 }
0x20fb   :  { %4964 = vrsqrt.f32 %v2905_v2 }
0x2103   :  { %v4963_v36 = vpop.eup %4962 }
0x2104   :  { %v2893_v13 = vmul.f32 %v4963_v36, %v2891_v61  ;;  %v2895_v16 = vmul.f32 %v4963_v36, %v2894_v7 }
0x2105   :  { %v4965_v56 = vpop.eup %4964 }
0x2106   :  { %v2896_v18 = vsub.f32 %v2893_v13, %v2895_v16  ;;  %v2898_v33 = vadd.f32 %v2895_v16, %v2893_v13  ;;  %v2907_v21 = vmul.f32 %v4965_v56, %v2905_v2  ;;  %v2909_v29 = vmul.f32 %v4965_v56, %v2908_v28 }
0x2108   :  { %v2899_v20 = vmul.f32 0.70710677, %v2898_v33  ;;  %v2897_v22 = vmul.f32 0.70710677, %v2896_v18 }
0x210a   :  { %v2913_v23 = vmul.f32 %v2907_v21, %v2899_v20  ;;  %v2910_v26 = vmul.f32 %v2907_v21, %v2897_v22  ;;  %v2914_v31 = vmul.f32 %v2909_v29, %v2899_v20  ;;  %v2911_v5 = vmul.f32 %v2909_v29, %v2897_v22 }
0x210c   :  { %2917 = vperm.xlu0 %4858, %v2913_v23   ;;  %2922 = vperm.xlu1 %4859, %v2910_v26   ;;  %v2912_v34 = vsub.f32 0.0, %v2911_v5 }
0x2110   :  { %4861 = vset.pattern.permute.xlu0 %v5014_v11  ;;  %4860 = vset.pattern.permute.xlu1 %v5014_v11 }
0x2111   :  { %2931 = vperm.xlu0 %4861, %v2910_v26   ;;  %2927 = vperm.xlu1 %4860, %v2913_v23  }
0x2115   :  { %4863 = vset.pattern.permute.xlu0 %v5017_v47  ;;  %4862 = vset.pattern.permute.xlu1 %v5016_v44 }
0x2116   :  { %2945 = vperm.xlu0 %4863, %v2913_v23   ;;  %2936 = vperm.xlu1 %4862, %v2913_v23  }
0x211a   :  { %4867 = vset.pattern.permute.xlu0 %v5016_v44  ;;  %2940 = vperm.xlu1 %4862, %v2910_v26  }
0x211b   :  { %2974 = vperm.xlu0 %4867, %v2914_v31  }
0x211e   :  { %4864 = vset.pattern.permute.xlu1 %v5017_v47 }
0x211f   :  { %4868 = vset.pattern.permute.xlu0 %v5015_v12  ;;  %2949 = vperm.xlu1 %4864, %v2910_v26  }
0x2120   :  { %2960 = vperm.xlu0 %4868, %v2912_v34  }
0x2123   :  { %4865 = vset.pattern.permute.xlu1 %v5015_v12 }
0x2124   :  { %4871 = vset.pattern.permute.xlu0 %v5017_v47  ;;  %2955 = vperm.xlu1 %4865, %v2914_v31  }
0x2125   :  { %2987 = vperm.xlu0 %4871, %v2912_v34  }
0x2128   :  { %4866 = vset.pattern.permute.xlu1 %v5014_v11 }
0x2129   :  { %2965 = vperm.xlu1 %4866, %v2914_v31   ;;  %4872 = vset.pattern.permute.xlu0 %v5015_v12 }
0x212d   :  { %2969 = vperm.xlu1 %4866, %v2912_v34  }
0x2131   :  { %4869 = vset.pattern.permute.xlu1 %v5016_v44 }
0x2132   :  { %2978 = vperm.xlu1 %4869, %v2912_v34  }
0x2136   :  { %4870 = vset.pattern.permute.xlu1 %v5017_v47 }
0x2137   :  { %2983 = vperm.xlu1 %4870, %v2914_v31  }
0x213b   :  { %4873 = vset.pattern.permute.xlu1 %v5015_v12 }
0x218b   :  { %v2923_v10 = vpop.permute.xlu1 %2922  ;;  %v2918_v43 = vpop.permute.xlu0 %2917 }
0x218c   :  { %v2925_v61 = vsel %vm62_vm3, %v2918_v43, %v2923_v10 }
0x2190   :  { %v2928_v35 = vpop.permute.xlu1 %2927  ;;  %v2932_v48 = vpop.permute.xlu0 %2931 }
0x2191   :  { %v2934_v57 = vsel %vm65_vm2, %v2928_v35, %v2932_v48 }
0x2192   :  { %v2991_v56 = vmul.f32 %v2934_v57, %v2925_v61 }
0x2195   :  { %v2937_v40 = vpop.permute.xlu1 %2936  ;;  %v2946_v9 = vpop.permute.xlu0 %2945 }
0x2199   :  { %v2941_v45 = vpop.permute.xlu1 %2940 }
0x219a   :  { %v2975_v51 = vpop.permute.xlu0 %2974  ;;  %v2943_v3 = vsel %vm68_vm5, %v2937_v40, %v2941_v45 }
0x219e   :  { %v2950_v6 = vpop.permute.xlu1 %2949 }
0x219f   :  { %v2961_v53 = vpop.permute.xlu0 %2960  ;;  %v2952_v59 = vsel %vm5137_vm4, %v2946_v9, %v2950_v6 }
0x21a0   :  { %v2997_v18 = vmul.f32 %v2952_v59, %v2943_v3 }
0x21a3   :  { %v2956_v17 = vpop.permute.xlu1 %2955 }
0x21a4   :  { %v2963_v62 = vsel %vm62_vm3, %v2956_v17, %v2961_v53  ;;  %v2988_v7 = vpop.permute.xlu0 %2987 }
0x21a5   :  { %v2995_v20 = vmul.f32 %v2963_v62, %v2934_v57 }
0x21a8   :  { %v2966_v50 = vpop.permute.xlu1 %2965 }
0x21ac   :  { %v2970_v52 = vpop.permute.xlu1 %2969 }
0x21ad   :  { %v2972_v30 = vsel %vm65_vm2, %v2966_v50, %v2970_v52 }
0x21ae   :  { %v2992_v36 = vmul.f32 %v2972_v30, %v2963_v62  ;;  %v2994_v13 = vmul.f32 %v2972_v30, %v2925_v61 }
0x21b0   :  { %v2993_v26 = vsub.f32 %v2991_v56, %v2992_v36  ;;  %v2996_v27 = vadd.f32 %v2995_v20, %v2994_v13 }
0x21b1   :  { %v2979_v55 = vpop.permute.xlu1 %2978 }
0x21b2   :  { %v2981_v2 = vsel %vm68_vm5, %v2975_v51, %v2979_v55 }
0x21b3   :  { %v3001_v21 = vmul.f32 %v2981_v2, %v2952_v59 }
0x21b6   :  { %v2984_v16 = vpop.permute.xlu1 %2983 }
0x21b7   :  { %v2990_v33 = vsel %vm5137_vm4, %v2984_v16, %v2988_v7 }
0x21b8   :  { %v2998_v22 = vmul.f32 %v2990_v33, %v2981_v2  ;;  %v3000_v23 = vmul.f32 %v2990_v33, %v2943_v3 }
0x21ba   :  { %v2999_v28 = vsub.f32 %v2997_v18, %v2998_v22  ;;  %v3002_v29 = vadd.f32 %v3001_v21, %v3000_v23 }
0x21bc   :  { %v3006_v31 = vmul.f32 %v3002_v29, %v2993_v26  ;;  %v3007_v5 = vmul.f32 %v2999_v28, %v2996_v27  ;;  %v3003_v10 = vmul.f32 %v2999_v28, %v2993_v26  ;;  %v3004_v35 = vmul.f32 %v3002_v29, %v2996_v27 }
0x21be   :  { %v3008_v34 = vadd.f32 %v3007_v5, %v3006_v31  ;;  %v3005_v43 = vsub.f32 %v3003_v10, %v3004_v35 }
0x21c0   :  { %v3010_v40 = vrot.slane %v3008_v34, 4  ;;  %v3084_v45 = vrot.slane %v3005_v43, 4 }
0x21c2   :  { %4354 = vmatmul.mubr.msk.f32.vlgmr.msra.gmra.mrb[20].mxu1 %vm365_vm6, %v3010_v40 }
0x21c3   :  { %4685 = vmatpush3.bf16.msra.mxu1 %v5158_v24  ;;  %4360 = vmatprep.mubr.msk.f32.mxu1 %vm5012_vm0, %v5013_v1 }
0x21c4   :  { %4686 = vmatprep.subr.bf16.mxu1 %v5011_v0 }
0x21ca   :  { %4361 = vmatmul.mubr.msk.f32.vlgmr.msra.gmra.mrb[20].mxu1 %vm365_vm6, %v3084_v45 }
0x21cb   :  { %4688 = vmatpush3.bf16.msra.mxu1 %v5095_v58  ;;  %4395 = vmatprep.mubr.msk.f32.mxu1 %vm5012_vm0, %v5013_v1 }
0x21cc   :  { %4689 = vmatprep.subr.bf16.mxu1 %v5011_v0 }
0x21cf   :  { %4691 = vmatpush3.bf16.msra.mxu1 %v5098_v60 }
0x21d0   :  { %4692 = vmatprep.subr.bf16.mxu1 %v5011_v0 }
0x21d3   :  { %4694 = vmatpush3.bf16.msra.mxu1 %v5102_v63 }
0x21d4   :  { %4695 = vmatprep.subr.bf16.mxu1 %v5011_v0 }
0x21d7   :  { %4697 = vmatpush3.bf16.msra.mxu1 %v5106_v4 }
0x21d8   :  { %4698 = vmatprep.subr.bf16.mxu1 %v5011_v0 }
0x21db   :  { %4700 = vmatpush3.bf16.msra.mxu1 %v5110_v8 }
0x21dc   :  { %4701 = vmatprep.subr.bf16.mxu1 %v5011_v0 }
0x21df   :  { %4703 = vmatpush3.bf16.msra.mxu1 %v5114_v14 }
0x21e0   :  { %4704 = vmatprep.subr.bf16.mxu1 %v5011_v0 }
0x21e3   :  { %4706 = vmatpush3.bf16.msra.mxu1 %v5118_v19 }
0x21e4   :  { %4707 = vmatprep.subr.bf16.mxu1 %v5011_v0 }
0x21e7   :  { %4709 = vmatpush3.bf16.msra.mxu1 %v5170_v32 }
0x229d   :  { %v3153_v48 = vpop.f32.mrb[20].mxu1 }
0x229e   :  { %v3157_v6 = vmul.f32 %v3153_v48, %v3153_v48  ;;  %v4362_v17 = vpop.f32.mrb[21].mxu1 }
0x22a0   :  { %4396 = vmatmul.mubr.f32.vlgmr.msra.gmra.mrb[22].mxu1 %v3157_v6 }
0x2373   :  { %v3224_v9 = vpop.f32.mrb[22].mxu1 }
0x2374   :  { %v3225_v50 = vadd.f32 %v5420_v25, %v3224_v9  ;;  %v4397_v51 = vpop.f32.mrb[23].mxu1 }
0x2376   :  { %4966 = vtanh.f32 %v3225_v50 }
0x2380   :  { %v4967_v52 = vpop.eup %4966 }
0x2381   :  { %v3229_v53 = vmul.f32 %v4967_v52, %v5185_v46 }
0x2383   :  { %v3230_v55 = vadd.f32 %v3229_v53, %v5187_v49 }
0x2385   :  { %3233 = vrot.lane.b32.xlu1 %v3230_v55, %s5019_s0  ;;  %v3231_v59 = vmul.f32 %v3230_v55, %v5582_v39 }
0x23f7   :  { %v3234_v30 = vpop.permute.xlu1 %3233 }
0x23f8   :  { %v3236_v57 = vmul.f32 %v3234_v30, %v3230_v55 }
0x23fa   :  { %3238 = vrot.lane.b32.xlu1 %v3236_v57, %s5019_s0 }
0x246c   :  { %v3239_v61 = vpop.permute.xlu1 %3238 }
0x246d   :  { %v5652_v62 = vadd.f32 %v3239_v61, %v3231_v59 }
0x246f   :  { %4968 = vtanh.f32 %v5652_v62 }
0x2479   :  { %v4969_v25 = vpop.eup %4968 }
0x247a   :  { %3244 = vrot.lane.b32.xlu0 %v4969_v25, %s5019_s0 }
0x24ec   :  { %v3245_v2 = vpop.permute.xlu0 %3244 }
0x24ed   :  { %v3247_v3 = vmul.f32 %v3245_v2, %v3230_v55 }
0x24ef   :  { %3249 = vrot.lane.b32.xlu1 %v3247_v3, %s5020_s26 }
0x2561   :  { %v3250_v7 = vpop.permute.xlu1 %3249 }
0x2562   :  { %4407 = vmatmul.mubr.msk.f32.vlgmr.msra.gmra.mrb[20].mxu0 %vm159_vm10, %v3250_v7 }
0x2563   :  { %4718 = vmatpush3.bf16.msra.mxu0 %v5090_v54  ;;  %4413 = vmatprep.mubr.msk.f32.mxu0 %vm5012_vm0, %v5013_v1 }
0x2564   :  { %4719 = vmatprep.subr.bf16.mxu0 %v5011_v0 }
0x2635   :  { %v3319_v39 = vpop.f32.mrb[20].mxu0 }
0x2636   :  { %v3324_v36 = vrot.slane %v3319_v39, 2  ;;  %v4408_v13 = vpop.f32.mrb[21].mxu0 }
0x2638   :  { %v3326_v16 = vadd.f32 %v3324_v36, %v5073_v15 }
0x263a   :  { %v3327_v56 = vmul.f32 %v3326_v16, %v3326_v16 }
0x263c   :  { %v3328_v18 = vadd.f32 1.0, %v3327_v56  ;;  %v3341_v33 = vmul.f32 %v3327_v56, %v3327_v56 }
0x263e   :  { %4970 = vrsqrt.f32 %v3328_v18  ;;  %v3342_v20 = vadd.f32 1.0, %v3341_v33 }
0x2640   :  { %4972 = vrsqrt.f32 %v3342_v20 }
0x2648   :  { %v4971_v21 = vpop.eup %4970 }
0x2649   :  { %v3331_v22 = vadd.f32 1.0, %v4971_v21  ;;  %v3330_v28 = vmul.f32 %v4971_v21, %v3326_v16 }
0x264a   :  { %v4973_v23 = vpop.eup %4972 }
0x264b   :  { %v3332_v54 = vmul.f32 0.5, %v3331_v22  ;;  %v3345_v26 = vadd.f32 1.0, %v4973_v23  ;;  %v3335_v29 = vmul.f32 0.5, %v3330_v28  ;;  %v3344_v17 = vmul.f32 %v4973_v23, %v3327_v56 }
0x264d   :  { %4974 = vrsqrt.f32 %v3332_v54  ;;  %v3346_v27 = vmul.f32 0.5, %v3345_v26  ;;  %v3349_v9 = vmul.f32 0.5, %v3344_v17 }
0x264f   :  { %4976 = vrsqrt.f32 %v3346_v27 }
0x2657   :  { %v4975_v31 = vpop.eup %4974 }
0x2658   :  { %v3334_v5 = vmul.f32 %v4975_v31, %v3332_v54  ;;  %v3336_v34 = vmul.f32 %v4975_v31, %v3335_v29 }
0x2659   :  { %v4977_v15 = vpop.eup %4976 }
0x265a   :  { %v3337_v10 = vsub.f32 %v3334_v5, %v3336_v34  ;;  %v3339_v35 = vadd.f32 %v3336_v34, %v3334_v5  ;;  %v3348_v43 = vmul.f32 %v4977_v15, %v3346_v27  ;;  %v3350_v50 = vmul.f32 %v4977_v15, %v3349_v9 }
0x265c   :  { %v3340_v40 = vmul.f32 0.70710677, %v3339_v35  ;;  %v3338_v45 = vmul.f32 0.70710677, %v3337_v10 }
0x265e   :  { %v3354_v48 = vmul.f32 %v3348_v43, %v3340_v40  ;;  %v3351_v6 = vmul.f32 %v3348_v43, %v3338_v45  ;;  %v3355_v51 = vmul.f32 %v3350_v50, %v3340_v40  ;;  %v3352_v52 = vmul.f32 %v3350_v50, %v3338_v45 }
0x2660   :  { %3358 = vperm.xlu0 %4872, %v3354_v48   ;;  %3363 = vperm.xlu1 %4873, %v3351_v6   ;;  %v3353_v53 = vsub.f32 0.0, %v3352_v52 }
0x2664   :  { %4875 = vset.pattern.permute.xlu0 %v5014_v11  ;;  %4874 = vset.pattern.permute.xlu1 %v5014_v11 }
0x2665   :  { %3372 = vperm.xlu0 %4875, %v3351_v6   ;;  %3368 = vperm.xlu1 %4874, %v3354_v48  }
0x2669   :  { %4877 = vset.pattern.permute.xlu0 %v5017_v47  ;;  %4876 = vset.pattern.permute.xlu1 %v5016_v44 }
0x266a   :  { %3386 = vperm.xlu0 %4877, %v3354_v48   ;;  %3377 = vperm.xlu1 %4876, %v3354_v48  }
0x266e   :  { %4881 = vset.pattern.permute.xlu0 %v5016_v44  ;;  %3381 = vperm.xlu1 %4876, %v3351_v6  }
0x266f   :  { %3415 = vperm.xlu0 %4881, %v3355_v51  }
0x2672   :  { %4878 = vset.pattern.permute.xlu1 %v5017_v47 }
0x2673   :  { %4882 = vset.pattern.permute.xlu0 %v5015_v12  ;;  %3390 = vperm.xlu1 %4878, %v3351_v6  }
0x2674   :  { %3401 = vperm.xlu0 %4882, %v3353_v53  }
0x2677   :  { %4879 = vset.pattern.permute.xlu1 %v5015_v12 }
0x2678   :  { %4885 = vset.pattern.permute.xlu0 %v5017_v47  ;;  %3396 = vperm.xlu1 %4879, %v3355_v51  }
0x2679   :  { %3428 = vperm.xlu0 %4885, %v3353_v53  }
0x267c   :  { %4880 = vset.pattern.permute.xlu1 %v5014_v11 }
0x267d   :  { %3406 = vperm.xlu1 %4880, %v3355_v51  }
0x2681   :  { %3410 = vperm.xlu1 %4880, %v3353_v53  }
0x2685   :  { %4883 = vset.pattern.permute.xlu1 %v5016_v44 }
0x2686   :  { %3419 = vperm.xlu1 %4883, %v3353_v53  }
0x268a   :  { %4884 = vset.pattern.permute.xlu1 %v5017_v47 }
0x268b   :  { %3424 = vperm.xlu1 %4884, %v3355_v51  }
0x26df   :  { %v3364_v55 = vpop.permute.xlu1 %3363  ;;  %v3359_v59 = vpop.permute.xlu0 %3358 }
0x26e0   :  { %v3366_v56 = vsel %vm62_vm3, %v3359_v59, %v3364_v55 }
0x26e4   :  { %v3369_v30 = vpop.permute.xlu1 %3368  ;;  %v3373_v12 = vpop.permute.xlu0 %3372 }
0x26e5   :  { %v3375_v47 = vsel %vm65_vm2, %v3369_v30, %v3373_v12 }
0x26e6   :  { %v3432_v54 = vmul.f32 %v3375_v47, %v3366_v56 }
0x26e9   :  { %v3378_v57 = vpop.permute.xlu1 %3377  ;;  %v3387_v3 = vpop.permute.xlu0 %3386 }
0x26ed   :  { %v3382_v61 = vpop.permute.xlu1 %3381 }
0x26ee   :  { %v3416_v39 = vpop.permute.xlu0 %3415  ;;  %v3384_v20 = vsel %vm68_vm5, %v3378_v57, %v3382_v61 }
0x26f2   :  { %v3391_v25 = vpop.permute.xlu1 %3390 }
0x26f3   :  { %v3402_v36 = vpop.permute.xlu0 %3401  ;;  %v3393_v16 = vsel %vm5137_vm4, %v3387_v3, %v3391_v25 }
0x26f4   :  { %v3438_v26 = vmul.f32 %v3393_v16, %v3384_v20 }
0x26f7   :  { %v3397_v2 = vpop.permute.xlu1 %3396 }
0x26f8   :  { %v3404_v18 = vsel %vm62_vm3, %v3397_v2, %v3402_v36  ;;  %v3429_v21 = vpop.permute.xlu0 %3428 }
0x26f9   :  { %v3436_v28 = vmul.f32 %v3404_v18, %v3375_v47 }
0x26fc   :  { %v3407_v7 = vpop.permute.xlu1 %3406 }
0x2700   :  { %v3411_v11 = vpop.permute.xlu1 %3410 }
0x2701   :  { %v3413_v44 = vsel %vm65_vm2, %v3407_v7, %v3411_v11 }
0x2702   :  { %v3433_v22 = vmul.f32 %v3413_v44, %v3404_v18  ;;  %v3435_v23 = vmul.f32 %v3413_v44, %v3366_v56 }
0x2704   :  { %v3434_v5 = vsub.f32 %v3432_v54, %v3433_v22  ;;  %v3437_v34 = vadd.f32 %v3436_v28, %v3435_v23 }
0x2705   :  { %v3420_v13 = vpop.permute.xlu1 %3419 }
0x2706   :  { %v3422_v33 = vsel %vm68_vm5, %v3416_v39, %v3420_v13 }
0x2707   :  { %v3442_v29 = vmul.f32 %v3422_v33, %v3393_v16 }
0x270a   :  { %v3425_v37 = vpop.permute.xlu1 %3424 }
0x270b   :  { %v3431_v27 = vsel %vm5137_vm4, %v3425_v37, %v3429_v21 }
0x270c   :  { %v3439_v31 = vmul.f32 %v3431_v27, %v3422_v33  ;;  %v3441_v38 = vmul.f32 %v3431_v27, %v3384_v20 }
0x270e   :  { %v3440_v15 = vsub.f32 %v3438_v26, %v3439_v31  ;;  %v3443_v10 = vadd.f32 %v3442_v29, %v3441_v38 }
0x2710   :  { %v3447_v35 = vmul.f32 %v3443_v10, %v3434_v5  ;;  %v3448_v41 = vmul.f32 %v3440_v15, %v3437_v34  ;;  %v3444_v43 = vmul.f32 %v3440_v15, %v3434_v5  ;;  %v3445_v45 = vmul.f32 %v3443_v10, %v3437_v34 }
0x2712   :  { %v3449_v40 = vadd.f32 %v3448_v41, %v3447_v35  ;;  %v3446_v42 = vsub.f32 %v3444_v43, %v3445_v45 }
0x2714   :  { %v3451_v48 = vrot.slane %v3449_v40, 6  ;;  %v3525_v6 = vrot.slane %v3446_v42, 6 }
0x2716   :  { %4414 = vmatmul.mubr.msk.f32.vlgmr.msra.gmra.mrb[22].mxu0 %vm365_vm6, %v3451_v48 }
0x2717   :  { %4721 = vmatpush3.bf16.msra.mxu0 %v5158_v24  ;;  %4420 = vmatprep.mubr.msk.f32.mxu0 %vm5012_vm0, %v5013_v1 }
0x2718   :  { %4722 = vmatprep.subr.bf16.mxu0 %v5011_v0 }
0x271e   :  { %4421 = vmatmul.mubr.msk.f32.vlgmr.msra.gmra.mrb[22].mxu0 %vm365_vm6, %v3525_v6 }
0x271f   :  { %4724 = vmatpush3.bf16.msra.mxu0 %v5095_v58  ;;  %4455 = vmatprep.mubr.msk.f32.mxu0 %vm5012_vm0, %v5013_v1 }
0x2720   :  { %4725 = vmatprep.subr.bf16.mxu0 %v5011_v0 }
0x2723   :  { %4727 = vmatpush3.bf16.msra.mxu0 %v5098_v60 }
0x2724   :  { %4728 = vmatprep.subr.bf16.mxu0 %v5011_v0 }
0x2727   :  { %4730 = vmatpush3.bf16.msra.mxu0 %v5102_v63 }
0x2728   :  { %4731 = vmatprep.subr.bf16.mxu0 %v5011_v0 }
0x272b   :  { %4733 = vmatpush3.bf16.msra.mxu0 %v5106_v4  ;;  %v4983_v4 = vld [vmem:[#allocation2 + $0xa0] ss:$0 sm:$0xff] }
0x272c   :  { %4734 = vmatprep.subr.bf16.mxu0 %v5011_v0 }
0x272f   :  { %4736 = vmatpush3.bf16.msra.mxu0 %v5110_v8 }
0x2730   :  { %4737 = vmatprep.subr.bf16.mxu0 %v5011_v0 }
0x2733   :  { %4739 = vmatpush3.bf16.msra.mxu0 %v5114_v14 }
0x2734   :  { %4740 = vmatprep.subr.bf16.mxu0 %v5011_v0 }
0x2737   :  { %4742 = vmatpush3.bf16.msra.mxu0 %v5118_v19 }
0x2738   :  { %4743 = vmatprep.subr.bf16.mxu0 %v5011_v0 }
0x273b   :  { %4745 = vmatpush3.bf16.msra.mxu0 %v5170_v32  ;;  %v3745_v32 = vld [vmem:[#allocation2 + $0xa1] ss:$0 sm:$0xff] }
0x27f1   :  { %v3594_v1 = vpop.f32.mrb[22].mxu0 }
0x27f2   :  { %v3598_v58 = vmul.f32 %v3594_v1, %v3594_v1  ;;  %v4422_v60 = vpop.f32.mrb[23].mxu0 }
0x27f4   :  { %4456 = vmatmul.mubr.f32.vlgmr.msra.gmra.mrb[24].mxu0 %v3598_v58 }
0x28c7   :  { %v3665_v63 = vpop.f32.mrb[24].mxu0 }
0x28c8   :  { %v3666_v24 = vadd.f32 %v4983_v4, %v3665_v63  ;;  %v4457_v8 = vpop.f32.mrb[25].mxu0 }
0x28ca   :  { %4978 = vtanh.f32 %v3666_v24 }
0x28d4   :  { %v4979_v17 = vpop.eup %4978 }
0x28d5   :  { %v3670_v14 = vmul.f32 %v4979_v17, %v5185_v46 }
0x28d7   :  { %v3671_v9 = vadd.f32 %v3670_v14, %v5187_v49 }
0x28d9   :  { %3674 = vrot.lane.b32.xlu1 %v3671_v9, %s5019_s0  ;;  %v3672_v50 = vmul.f32 %v3671_v9, %v5652_v62 }
0x294b   :  { %v3675_v19 = vpop.permute.xlu1 %3674 }
0x294c   :  { %v3677_v0 = vmul.f32 %v3675_v19, %v3671_v9 }
0x294e   :  { %3679 = vrot.lane.b32.xlu1 %v3677_v0, %s5019_s0 }
0x2952   :  { %3694 = vrot.lane.b32.xlu1 %v3745_v32, %s5019_s0 }
0x29c0   :  { %v3680_v51 = vpop.permute.xlu1 %3679 }
0x29c1   :  { %v3682_v52 = vadd.f32 %v3680_v51, %v3672_v50 }
0x29c3   :  { %4980 = vtanh.f32 %v3682_v52 }
0x29c4   :  { %v3695_v55 = vpop.permute.xlu1 %3694 }
0x29cd   :  { %v4981_v53 = vpop.eup %4980 }
0x29ce   :  { %3685 = vrot.lane.b32.xlu0 %v4981_v53, %s5019_s0 }
0x2a40   :  { %v3686_v46 = vpop.permute.xlu0 %3685 }
0x2a41   :  { %v3688_v49 = vmul.f32 %v3686_v46, %v3671_v9 }
0x2a43   :  { %v3697_v30 = vmul.f32 %v3695_v55, %v3688_v49 }
0x2a45   :  { %3699 = vrot.lane.b32.xlu0 %v3697_v30, %s5020_s26 }
0x2ab7   :  { %v3700_v57 = vpop.permute.xlu0 %3699 }
0x2ab8   :  { %v3703_v59 = vsel %vm3702_vm11, %v3700_v57, 0.0 }
0x2ab9   :  { %3704 = vadd.xlane.f32.xlu1 %v3703_v59 }
0x2b46   :  { %v3705_v61 = vpop.xlane.xlu1 %3704 }
0x2b47   :  { %v3706_v12 = vadd.f32 %v3745_v32, %v3705_v61 }
0x2b49   :  { %3708 = vrot.lane.b32.xlu0 %v3706_v12, %s5019_s0 }
0x2bbb   :  { %v3709_v62 = vpop.permute.xlu0 %3708 }
0x2bbc   :  { %3712 = vst.msk [vmem:[%s5728_s2] sm:$0x3] %vm3711_vm12, %v3709_v62 }
0x2bbd   :  { %3717 = vsyncpa [#allocation3], 1 }

</bundles_post_ra>
